<compile_context>
chip_gen: v7x
topology: tpu7x:2x2x1
jax: 0.10.0
libtpu: 0.0.40
codegen_flags: <defaults>
</compile_context>

<pallas_src>
import functools

import jax
import jax.numpy as jnp
from jax import lax
from jax.experimental import pallas as pl
from jax.experimental.pallas import tpu as pltpu

LANE = 128  # TPU vreg lane width.


def _round_up(a, b):
    return (a + b - 1) // b * b


def _detect_num_cores():
    """Best-effort TensorCore count (v7x has 2 per chip). Safe fallback: 1."""
    try:
        info = pltpu.get_tpu_info()
    except Exception:
        return 1
    for name in ("num_cores", "core_count", "num_tensorcores",
                 "tensorcore_count", "cores_per_chip"):
        v = getattr(info, name, None)
        if v is None:
            continue
        try:
            v = int(v)
        except Exception:
            continue
        if v >= 1:
            return v
    return 1


# ---------------------------------------------------------------------------
# Parameter preparation: fold biases into the weights ("ones lane" trick).
# ---------------------------------------------------------------------------
def prepare_params(params, *, matmul_dtype=jnp.float32, lane=LANE):
    """Pad + augment weights ONCE; reuse the result across kernel calls.

    Layer l becomes a single (lane, lane) matrix W_aug with
      W_aug[:in_dim, :out_dim] = W,   W_aug[in_dim, :out_dim] = b
    and (for all but the final layer) W_aug[in_dim, out_dim] = 1 so the
    constant-1 "ones lane" propagates to the next layer's input.  With the
    activation carrying 1.0 at lane `in_dim`, the bias add rides the MXU for
    free -- no (m, lane) bias broadcasts live across the Euler time loop.
    Zero padding is exact: padded lanes see zero weight rows/cols, ReLU(0)=0,
    and only the first `latent` output lanes are stored.
    """
    latent, nhidden = params["w1"].shape
    assert latent + 1 <= lane and nhidden + 1 <= lane

    def aug(w, b, in_dim, out_dim, prop):
        m = jnp.zeros((lane, lane), jnp.float32)
        m = m.at[:in_dim, :out_dim].set(w.astype(jnp.float32))
        m = m.at[in_dim, :out_dim].set(jnp.reshape(b, (-1,)).astype(jnp.float32))
        if prop:
            m = m.at[in_dim, out_dim].set(1.0)  # propagate the ones lane
        return m.astype(matmul_dtype)

    weights = [aug(params["w1"], params["b1"], latent, nhidden, True)]
    for w, b in params["middle"]:
        weights.append(aug(w, b, nhidden, nhidden, True))
    weights.append(aug(params["wf"], params["bf"], nhidden, latent, False))
    return {"weights": weights, "latent": latent, "nhidden": nhidden}


# ---------------------------------------------------------------------------
# Kernels
# ---------------------------------------------------------------------------
def _augment(x, latent):
    """Build [x | 1 | 0 ...] as a lane-dense (m, LANE) f32 value, in vregs."""
    m = x.shape[0]
    x = x.astype(jnp.float32)
    lane_ids = lax.broadcasted_iota(jnp.int32, (m, LANE), 1)
    h = jnp.where(lane_ids == latent, jnp.float32(1.0), jnp.float32(0.0))
    for c in range(latent):  # latent is tiny (4): a handful of selects
        h = jnp.where(lane_ids == c, x[:, c:c + 1], h)
    return h


def _mlp(h, ws, precision):
    """fc1 -> relu -> (middle -> relu)* -> fc_final, all lane-dense (m, LANE)."""
    n = len(ws)
    for i, w in enumerate(ws):
        h = jnp.dot(h.astype(w.dtype), w,
                    preferred_element_type=jnp.float32, precision=precision)
        if i < n - 1:
            h = jnp.maximum(h, 0.0)
    return h


def _odefunc_kernel(x_ref, *rest, latent, precision):
    """Single MLP forward; x_ref/o_ref are narrow (tile_m, latent) blocks."""
    w_refs, o_ref = rest[:-1], rest[-1]
    ws = [r[...] for r in w_refs]
    out = _mlp(_augment(x_ref[...], latent), ws, precision)
    o_ref[...] = out[:, :latent].astype(o_ref.dtype)


def _euler_kernel(x_ref, *rest, latent, precision, num_steps, dt, unroll):
    """Fused fixed-step Euler: state stays in VMEM/vregs for all steps.

    The ones lane (at index `latent`) survives integration because the final
    layer writes zeros to every lane >= latent, so x + dt*dxdt keeps it at 1.
    """
    w_refs, o_ref = rest[:-1], rest[-1]
    ws = [r[...] for r in w_refs]           # weights loaded once per tile
    x0 = _augment(x_ref[...], latent)

    def step(_, x):
        return x + dt * _mlp(x, ws, precision)

    xT = lax.fori_loop(0, num_steps, step, x0, unroll=unroll)
    o_ref[...] = xT[:, :latent].astype(o_ref.dtype)


# ---------------------------------------------------------------------------
# Call plumbing
# ---------------------------------------------------------------------------
def _tile_plan(batch, tile_m, num_cores):
    """Return None for the gridless fast path, else (tile, num_tiles, m_pad)."""
    if batch <= tile_m and num_cores <= 1:
        return None
    num_tiles = max(pl.cdiv(batch, tile_m), num_cores)
    tile = _round_up(pl.cdiv(batch, num_tiles), 8)
    num_tiles = pl.cdiv(batch, tile)
    return tile, num_tiles, tile * num_tiles


def _cost(batch, latent, nhidden, n_layers, n_steps=1):
    n_mid = n_layers - 2
    flops = 2 * batch * (latent * nhidden + n_mid * nhidden * nhidden
                         + nhidden * latent) * n_steps
    return pl.CostEstimate(
        flops=int(flops),
        transcendentals=0,
        bytes_accessed=int(4 * (2 * batch * latent) + 4 * n_layers * LANE * LANE))


def _run_tiled(kernel, x, weights, latent, cost, *, tile_m, num_cores):
    batch = x.shape[0]
    n_layers = len(weights)
    plan = _tile_plan(batch, tile_m, num_cores)

    if plan is None:
        # Gridless fast path: whole arrays land in VMEM, no pipeline
        # prologue/epilogue.  Only taken on 1-TC chips (v5e/v6e).
        return pl.pallas_call(
            kernel,
            out_shape=jax.ShapeDtypeStruct((batch, latent), x.dtype),
            cost_estimate=cost,
        )(x, *weights)

    tile, num_tiles, m_pad = plan
    x_in = x if m_pad == batch else jnp.pad(x, ((0, m_pad - batch), (0, 0)))
    in_specs = [pl.BlockSpec((tile, latent), lambda i: (i, 0))]
    # Constant block index -> weights stay VMEM-resident across grid steps.
    in_specs += [pl.BlockSpec((LANE, LANE), lambda i: (0, 0))
                 for _ in range(n_layers)]
    out = pl.pallas_call(
        kernel,
        out_shape=jax.ShapeDtypeStruct((m_pad, latent), x.dtype),
        grid=(num_tiles,),
        in_specs=in_specs,
        out_specs=pl.BlockSpec((tile, latent), lambda i: (i, 0)),
        compiler_params=pltpu.CompilerParams(
            dimension_semantics=("parallel",)),
        cost_estimate=cost,
    )(x_in, *weights)
    return out if m_pad == batch else out[:batch]


# ---------------------------------------------------------------------------
# Public wrappers
# ---------------------------------------------------------------------------
def odefunc_forward(t, x, prepared, *, tile_m=512, num_cores=None,
                    precision=lax.Precision.HIGHEST):
    """Pallas implementation of ODEFunc.forward(t, x).

    `t` is accepted for API parity with the PyTorch module but unused (the
    PyTorch forward ignores it too).  `prepared` comes from prepare_params().
    """
    del t
    batch, latent = x.shape
    assert latent == prepared["latent"]
    weights = prepared["weights"]
    kernel = functools.partial(_odefunc_kernel, latent=latent,
                               precision=precision)
    cost = _cost(batch, latent, prepared["nhidden"], len(weights))
    cores = _detect_num_cores() if num_cores is None else num_cores
    return _run_tiled(kernel, x, weights, latent, cost,
                      tile_m=tile_m, num_cores=cores)


def odefunc_integrate_euler(x0, prepared, *, dt, num_steps, tile_m=512,
                            num_cores=None, unroll=2,
                            precision=lax.Precision.HIGHEST):
    """Fixed-step Euler solve of dx/dt = ODEFunc(t, x), fused in ONE kernel.

    Weights are loaded once per batch tile; the state never touches HBM
    between derivative evaluations.  Batch is tiled so large batches never
    exceed VMEM and v7x shards tiles across both TensorCores.
    """
    batch, latent = x0.shape
    assert latent == prepared["latent"]
    weights = prepared["weights"]
    kernel = functools.partial(_euler_kernel, latent=latent,
                               precision=precision,
                               num_steps=int(num_steps), dt=float(dt),
                               unroll=int(unroll))
    cost = _cost(batch, latent, prepared["nhidden"], len(weights),
                 n_steps=int(num_steps))
    cores = _detect_num_cores() if num_cores is None else num_cores
    return _run_tiled(kernel, x0, weights, latent, cost,
                      tile_m=tile_m, num_cores=cores)


# ---------------------------------------------------------------------------
# Deterministic init (mimics nn.Linear default U(-k, k), k = 1/sqrt(fan_in))
# and a pure-JAX reference for correctness checks.
# ---------------------------------------------------------------------------
def init_params(key, latent_dim=4, nhidden=20, num_layers=2, dtype=jnp.float32):
    def linear(key, fan_in, fan_out):
        kw, kb = jax.random.split(key)
        k = 1.0 / jnp.sqrt(jnp.asarray(fan_in, dtype))
        # Stored as (in, out) so kernels/reference compute x @ W + b.
        w = jax.random.uniform(kw, (fan_in, fan_out), dtype, -k, k)
        b = jax.random.uniform(kb, (1, fan_out), dtype, -k, k)
        return w, b

    n_middle = max(num_layers - 2, 0)
    keys = jax.random.split(key, 2 + n_middle)
    w1, b1 = linear(keys[0], latent_dim, nhidden)
    middle = [linear(keys[1 + i], nhidden, nhidden) for i in range(n_middle)]
    wf, bf = linear(keys[1 + n_middle], nhidden, latent_dim)
    return {"w1": w1, "b1": b1, "middle": middle, "wf": wf, "bf": bf}


def odefunc_reference(t, x, params):
    del t
    h = jnp.maximum(x @ params["w1"] + params["b1"], 0.0)
    for w, b in params["middle"]:
        h = jnp.maximum(h @ w + b, 0.0)
    return h @ params["wf"] + params["bf"]


# ---------------------------------------------------------------------------
# Main
# ---------------------------------------------------------------------------
if __name__ == "__main__":
    latent_dim, nhidden, num_layers = 4, 20, 2
    batch = 256

    key = jax.random.PRNGKey(0)
    k_params, k_x = jax.random.split(key)
    params = init_params(k_params, latent_dim, nhidden, num_layers)
    x = jax.random.normal(k_x, (batch, latent_dim), jnp.float32)
    t = jnp.float32(0.0)  # unused by forward, kept for signature parity

    prepared = prepare_params(params)          # pad / fold biases ONCE
    ref = odefunc_reference(t, x, params)

    # --- forward, default tiling (gridless on 1-TC chips, parallel on v7x) ---
    out = jax.block_until_ready(odefunc_forward(t, x, prepared))
    assert out.shape == (batch, latent_dim)
    assert jnp.allclose(out, ref, atol=1e-5, rtol=1e-5), "forward mismatch"

    # --- forward, forced multi-tile grid (exercises the gridded path) ---
    out_g = jax.block_until_ready(odefunc_forward(t, x, prepared, tile_m=128))
    assert jnp.allclose(out_g, ref, atol=1e-5, rtol=1e-5), "gridded forward mismatch"

    # --- fused Euler integration (solver time loop inside one kernel) ---
    dt, num_steps = 0.05, 16
    xr = x
    for _ in range(num_steps):
        xr = xr + dt * odefunc_reference(t, xr, params)

    xT = jax.block_until_ready(
        odefunc_integrate_euler(x, prepared, dt=dt, num_steps=num_steps))
    assert xT.shape == (batch, latent_dim)
    assert jnp.allclose(xT, xr, atol=1e-4, rtol=1e-4), "integrator mismatch"

    # --- fused Euler, forced multi-tile grid (the v7x / big-batch path) ---
    xT_g = jax.block_until_ready(
        odefunc_integrate_euler(x, prepared, dt=dt, num_steps=num_steps,
                                tile_m=128))
    assert jnp.allclose(xT_g, xr, atol=1e-4, rtol=1e-4), "gridded integrator mismatch"

    print("KERNEL_OK")
</pallas_src>

<mosaic_0001>
module attributes {stable_mosaic.version = 11 : i64} {
  func.func @_odefunc_kernel(%arg0: memref<256x4xf32, #tpu.memory_space<vmem>>, %arg1: memref<128x128xf32, #tpu.memory_space<vmem>>, %arg2: memref<128x128xf32, #tpu.memory_space<vmem>>, %arg3: memref<256x4xf32, #tpu.memory_space<vmem>>) attributes {dimension_semantics = [], scalar_prefetch = 0 : i64, scratch_operands = 0 : i64, tpu.core_type = #tpu.core_type<tc>} {
    %c0 = arith.constant 0 : index
    %c0_0 = arith.constant 0 : index
    %0 = vector.load %arg1[%c0, %c0_0] : memref<128x128xf32, #tpu.memory_space<vmem>>, vector<128x128xf32>
    %c0_1 = arith.constant 0 : index
    %c0_2 = arith.constant 0 : index
    %1 = vector.load %arg2[%c0_1, %c0_2] : memref<128x128xf32, #tpu.memory_space<vmem>>, vector<128x128xf32>
    %c0_3 = arith.constant 0 : index
    %c0_4 = arith.constant 0 : index
    %2 = vector.load %arg0[%c0_3, %c0_4] : memref<256x4xf32, #tpu.memory_space<vmem>>, vector<256x4xf32>
    %3 = tpu.iota {dimensions = array<i32: 1>} : vector<256x128xi32>
    %c4_i32 = arith.constant 4 : i32
    %4 = vector.broadcast %c4_i32 : i32 to vector<256x128xi32>
    %5 = arith.cmpi eq, %3, %4 : vector<256x128xi32>
    %cst = arith.constant 1.000000e+00 : f32
    %cst_5 = arith.constant 0.000000e+00 : f32
    %6 = vector.broadcast %cst : f32 to vector<256x128xf32>
    %7 = vector.broadcast %cst_5 : f32 to vector<256x128xf32>
    %8 = arith.select %5, %6, %7 : vector<256x128xi1>, vector<256x128xf32>
    %c0_i32 = arith.constant 0 : i32
    %9 = vector.broadcast %c0_i32 : i32 to vector<256x128xi32>
    %10 = arith.cmpi eq, %3, %9 : vector<256x128xi32>
    %11 = vector.extract_strided_slice %2 {offsets = [0, 0], sizes = [256, 1], strides = [1, 1]} : vector<256x4xf32> to vector<256x1xf32>
    %12 = vector.shape_cast %11 : vector<256x1xf32> to vector<256x1xf32>
    %13 = vector.broadcast %12 : vector<256x1xf32> to vector<256x128xf32>
    %14 = arith.select %10, %13, %8 : vector<256x128xi1>, vector<256x128xf32>
    %c1_i32 = arith.constant 1 : i32
    %15 = vector.broadcast %c1_i32 : i32 to vector<256x128xi32>
    %16 = arith.cmpi eq, %3, %15 : vector<256x128xi32>
    %17 = vector.extract_strided_slice %2 {offsets = [0, 1], sizes = [256, 1], strides = [1, 1]} : vector<256x4xf32> to vector<256x1xf32>
    %18 = vector.shape_cast %17 : vector<256x1xf32> to vector<256x1xf32>
    %19 = vector.broadcast %18 : vector<256x1xf32> to vector<256x128xf32>
    %20 = arith.select %16, %19, %14 : vector<256x128xi1>, vector<256x128xf32>
    %c2_i32 = arith.constant 2 : i32
    %21 = vector.broadcast %c2_i32 : i32 to vector<256x128xi32>
    %22 = arith.cmpi eq, %3, %21 : vector<256x128xi32>
    %23 = vector.extract_strided_slice %2 {offsets = [0, 2], sizes = [256, 1], strides = [1, 1]} : vector<256x4xf32> to vector<256x1xf32>
    %24 = vector.shape_cast %23 : vector<256x1xf32> to vector<256x1xf32>
    %25 = vector.broadcast %24 : vector<256x1xf32> to vector<256x128xf32>
    %26 = arith.select %22, %25, %20 : vector<256x128xi1>, vector<256x128xf32>
    %c3_i32 = arith.constant 3 : i32
    %27 = vector.broadcast %c3_i32 : i32 to vector<256x128xi32>
    %28 = arith.cmpi eq, %3, %27 : vector<256x128xi32>
    %29 = vector.extract_strided_slice %2 {offsets = [0, 3], sizes = [256, 1], strides = [1, 1]} : vector<256x4xf32> to vector<256x1xf32>
    %30 = vector.shape_cast %29 : vector<256x1xf32> to vector<256x1xf32>
    %31 = vector.broadcast %30 : vector<256x1xf32> to vector<256x128xf32>
    %32 = arith.select %28, %31, %26 : vector<256x128xi1>, vector<256x128xf32>
    %cst_6 = arith.constant dense<0.000000e+00> : vector<256x128xf32>
    %33 = tpu.matmul %32, %0, %cst_6 {dimension_numbers = #tpu.dot_dimension_numbers<[1], [0], [0], [1], [0, 0, 1, 1], [], []>, precision = #tpu.contract_precision<fp32>} : vector<256x128xf32>, vector<128x128xf32>, vector<256x128xf32> -> vector<256x128xf32>
    %cst_7 = arith.constant 0.000000e+00 : f32
    %34 = vector.broadcast %cst_7 : f32 to vector<256x128xf32>
    %35 = arith.maximumf %33, %34 : vector<256x128xf32>
    %cst_8 = arith.constant dense<0.000000e+00> : vector<256x128xf32>
    %36 = tpu.matmul %35, %1, %cst_8 {dimension_numbers = #tpu.dot_dimension_numbers<[1], [0], [0], [1], [0, 0, 1, 1], [], []>, precision = #tpu.contract_precision<fp32>} : vector<256x128xf32>, vector<128x128xf32>, vector<256x128xf32> -> vector<256x128xf32>
    %37 = vector.extract_strided_slice %36 {offsets = [0, 0], sizes = [256, 4], strides = [1, 1]} : vector<256x128xf32> to vector<256x4xf32>
    %c0_9 = arith.constant 0 : index
    %c0_10 = arith.constant 0 : index
    %38 = vector.load %arg3[%c0_9, %c0_10] : memref<256x4xf32, #tpu.memory_space<vmem>>, vector<256x4xf32>
    tpu.vector_store %arg3[%c0_9, %c0_10], %37 {strides = array<i32>} : memref<256x4xf32, #tpu.memory_space<vmem>>, vector<256x4xf32>,
    return
  }
}

</mosaic_0001>

<bundles_post_ra>
// kernel: tpu_custom_call.1
= control target key start
LH: loop header
LB: loop body
LE: loop exit
PB: predicated region body
PF: predicated region fallthrough
CT: control target
= control target key end

     0   :  { %v9833_v0 = vmov 2   ;;  %v9827_v1 = vmov 1   ;;  %v9837_v7 = vmov 3   ;;  %v9829_v11 = vmov 0   ;;  %s9807_s0 = inlined_call_operand.vmem [shape: f32[256,4], index: 0, kind: input, shape index: {}]   ;;  %s9808_s1 = inlined_call_operand.vmem [shape: f32[128,128], index: 1, kind: input, shape index: {}]   ;;  %s9809_s2 = inlined_call_operand.vmem [shape: f32[128,128], index: 2, kind: input, shape index: {}]   ;;  %s9810_s3 = inlined_call_operand.vmem [shape: f32[256,4], index: 3, kind: output, shape index: {}]  }
   0x1   :  { %7021 = vset.pattern.permute.xlu0 %v9833_v0  ;;  %7020 = vset.pattern.permute.xlu1 %v9827_v1  ;;  %v7124_v2 = vld [vmem:[%s9807_s0] sm:$0xff]  ;;  %v7131_v3 = vld [vmem:[%s9807_s0 + $0x18] sm:$0xff]  ;;  %v7136_v4 = vld [vmem:[%s9807_s0 + $0x8] sm:$0xff]  ;;  %vm4738_vm5 = vcmask 31744  }
   0x2   :  { %438 = vperm.xlu0 %7021, %v7124_v2   ;;  %277 = vperm.xlu1 %7020, %v7124_v2   ;;  %v7143_v5 = vld [vmem:[%s9807_s0 + $0x30] sm:$0xff]  ;;  %v7151_v6 = vld [vmem:[%s9807_s0 + $0x48] sm:$0xff]  ;;  %v7158_v8 = vld [vmem:[%s9807_s0 + $0x60] sm:$0xff] }
   0x3   :  { %v7165_v9 = vld [vmem:[%s9807_s0 + $0x78] sm:$0xff]  ;;  %v7172_v10 = vld [vmem:[%s9807_s0 + $0x90] sm:$0xff]  ;;  %v7180_v12 = vld [vmem:[%s9807_s0 + $0xa8] sm:$0xff] }
   0x4   :  { %v7188_v13 = vld [vmem:[%s9807_s0 + $0x10] sm:$0xff]  ;;  %v51_v14 = vld [vmem:[%s9807_s0 + $0x28] sm:$0xff]  ;;  %v7202_v15 = vld [vmem:[%s9807_s0 + $0x40] sm:$0xff] }
   0x5   :  { %v50_v16 = vld [vmem:[%s9807_s0 + $0x20] sm:$0xff]  ;;  %v7212_v17 = vld [vmem:[%s9807_s0 + $0x58] sm:$0xff]  ;;  %v7218_v18 = vld [vmem:[%s9807_s0 + $0x70] sm:$0xff] }
   0x6   :  { %450 = vperm.xlu0 %7021, %v7131_v3   ;;  %281 = vperm.xlu1 %7020, %v7136_v4   ;;  %v7224_v19 = vld [vmem:[%s9807_s0 + $0x88] sm:$0xff]  ;;  %v7231_v20 = vld [vmem:[%s9807_s0 + $0xa0] sm:$0xff]  ;;  %v7238_v21 = vld [vmem:[%s9807_s0 + $0xb8] sm:$0xff] }
   0x7   :  { %v7244_v22 = vld [vmem:[%s9807_s0 + $0xd0] sm:$0xff]  ;;  %v7252_v23 = vld [vmem:[%s9807_s0 + $0xe8] sm:$0xff]  ;;  %v7263_v24 = vld [vmem:[%s9807_s0 + $0x38] sm:$0xff] }
   0x8   :  { %10188 = vst [vmem:[#allocation2_spill] sm:$0xff] %v7252_v23  ;;  %v7270_v25 = vld [vmem:[%s9807_s0 + $0x50] sm:$0xff]  ;;  %v7281_v26 = vld [vmem:[%s9807_s0 + $0x80] sm:$0xff]  ;;  %v7293_v28 = vld [vmem:[%s9808_s1 + $0x8] sm:$0xff] }
   0x9   :  { %v7288_v27 = vld [vmem:[%s9808_s1] sm:$0xff]  ;;  %10190 = vst [vmem:[#allocation4_spill] sm:$0xff] %v7293_v28  ;;  %v9825_v30 = vand.u32 4294901760, %v7293_v28  ;;  %v7303_v31 = vld [vmem:[%s9807_s0 + $0xb0] sm:$0xff]  ;;  %v7319_v34 = vld [vmem:[%s9808_s1 + $0x18] sm:$0xff] }
   0xa   :  { %462 = vperm.xlu0 %7021, %v7143_v5   ;;  %7022 = vset.pattern.permute.xlu1 %v9833_v0  ;;  %10189 = vst [vmem:[#allocation3_spill] sm:$0xff] %v7288_v27  ;;  %v9826_v29 = vand.u32 4294901760, %v7288_v27  ;;  %v7314_v33 = vld [vmem:[%s9808_s1 + $0x10] sm:$0xff]  ;;  %10193 = vst [vmem:[#allocation7_spill] sm:$0xff] %v7319_v34  ;;  %v9823_v36 = vand.u32 4294901760, %v7319_v34  ;;  %v7330_v37 = vld [vmem:[%s9807_s0 + $0xd8] sm:$0xff] }
   0xb   :  { %442 = vperm.xlu1 %7022, %v7136_v4   ;;  %10192 = vst [vmem:[#allocation6_spill] sm:$0xff] %v7314_v33  ;;  %v9824_v35 = vand.u32 4294901760, %v7314_v33  ;;  %v7342_v39 = vld [vmem:[%s9808_s1 + $0x20] sm:$0xff]  ;;  %v7347_v40 = vld [vmem:[%s9808_s1 + $0x28] sm:$0xff]  ;;  %v7369_v45 = vld [vmem:[%s9808_s1 + $0x30] sm:$0xff] }
   0xc   :  { %v7309_v32 = vpack.c.bf16 %v9825_v30, %v9826_v29  ;;  %10195 = vst [vmem:[#allocation9_spill] sm:$0xff] %v7342_v39  ;;  %10196 = vst [vmem:[#allocation10_spill] sm:$0xff] %v7347_v40  ;;  %v9822_v41 = vand.u32 4294901760, %v7342_v39  ;;  %v9821_v42 = vand.u32 4294901760, %v7347_v40  ;;  %v7357_v43 = vld [vmem:[%s9807_s0 + $0xe0] sm:$0xff]  ;;  %v7374_v46 = vld [vmem:[%s9808_s1 + $0x38] sm:$0xff] }
   0xd   :  { %v7336_v38 = vpack.c.bf16 %v9823_v36, %v9824_v35  ;;  %10197 = vst [vmem:[#allocation11_spill] sm:$0xff] %v7357_v43  ;;  %10199 = vst [vmem:[#allocation13_spill] sm:$0xff] %v7369_v45  ;;  %v9820_v47 = vand.u32 4294901760, %v7369_v45  ;;  %v9819_v48 = vand.u32 4294901760, %v7374_v46  ;;  %v7391_v50 = vld [vmem:[%s9808_s1 + $0x40] sm:$0xff]  ;;  %v7396_v51 = vld [vmem:[%s9808_s1 + $0x48] sm:$0xff] }
   0xe   :  { %474 = vperm.xlu0 %7021, %v7151_v6   ;;  %10191 = vst [vmem:[#allocation5_spill] sm:$0xff] %v7309_v32  ;;  %6312 = vmatprep.subr.bf16.mxu0 %v7309_v32  ;;  %v7363_v44 = vpack.c.bf16 %v9821_v42, %v9822_v41  ;;  %10200 = vst [vmem:[#allocation14_spill] sm:$0xff] %v7374_v46  ;;  %v9818_v52 = vand.u32 4294901760, %v7391_v50  ;;  %v9817_v53 = vand.u32 4294901760, %v7396_v51  ;;  %v7415_v55 = vld [vmem:[%s9808_s1 + $0x50] sm:$0xff]  ;;  %v7420_v56 = vld [vmem:[%s9808_s1 + $0x58] sm:$0xff] }
   0xf   :  { %7023 = vset.pattern.permute.xlu1 %v9837_v7  ;;  %6314 = vmatpush3.bf16.msra.mxu0 %v7309_v32  ;;  %10194 = vst [vmem:[#allocation8_spill] sm:$0xff] %v7336_v38  ;;  %v7386_v49 = vpack.c.bf16 %v9819_v48, %v9820_v47  ;;  %10202 = vst [vmem:[#allocation16_spill] sm:$0xff] %v7391_v50  ;;  %v9816_v57 = vand.u32 4294901760, %v7415_v55  ;;  %v9815_v58 = vand.u32 4294901760, %v7420_v56  ;;  %v7438_v60 = vld [vmem:[%s9808_s1 + $0x60] sm:$0xff]  ;;  %v7443_v61 = vld [vmem:[%s9808_s1 + $0x68] sm:$0xff] }
  0x10   :  { %599 = vperm.xlu1 %7023, %v7124_v2   ;;  %6316 = vmatprep.subr.bf16.mxu0 %v7336_v38  ;;  %10198 = vst [vmem:[#allocation12_spill] sm:$0xff] %v7363_v44  ;;  %10203 = vst [vmem:[#allocation17_spill] sm:$0xff] %v7396_v51  ;;  %v7410_v54 = vpack.c.bf16 %v9817_v53, %v9818_v52  ;;  %v9812_v62 = vand.u32 4294901760, %v7438_v60  ;;  %v9811_v63 = vand.u32 4294901760, %v7443_v61  ;;  %v7526_v48 = vld [vmem:[%s9807_s0 + $0xc8] sm:$0xff]  ;;  %v7680_v28 = vld [vmem:[%s9807_s0 + $0xf0] sm:$0xff] }
  0x11   :  { %10201 = vst [vmem:[#allocation15_spill] sm:$0xff] %v7386_v49  ;;  %10205 = vst [vmem:[#allocation19_spill] sm:$0xff] %v7415_v55  ;;  %v7432_v59 = vpack.c.bf16 %v9815_v58, %v9816_v57  ;;  %v7507_v58 = vld [vmem:[%s9807_s0 + $0x98] sm:$0xff] }
  0x12   :  { %486 = vperm.xlu0 %7021, %v7158_v8   ;;  %10204 = vst [vmem:[#allocation18_spill] sm:$0xff] %v7410_v54  ;;  %10206 = vst [vmem:[#allocation20_spill] sm:$0xff] %v7420_v56 }
  0x13   :  { %6318 = vmatpush3.bf16.msra.mxu0 %v7336_v38  ;;  %10207 = vst [vmem:[#allocation21_spill] sm:$0xff] %v7432_v59  ;;  %10208 = vst [vmem:[#allocation22_spill] sm:$0xff] %v7438_v60 }
  0x14   :  { %603 = vperm.xlu1 %7023, %v7136_v4   ;;  %6320 = vmatprep.subr.bf16.mxu0 %v7363_v44  ;;  %10209 = vst [vmem:[#allocation23_spill] sm:$0xff] %v7443_v61  ;;  %v10222_v61 = vmov 3  }
  0x16   :  { %498 = vperm.xlu0 %7021, %v7165_v9  }
  0x17   :  { %6322 = vmatpush3.bf16.msra.mxu0 %v7363_v44 }
  0x18   :  { %7024 = vset.pattern.permute.xlu1 %v9829_v11  ;;  %6324 = vmatprep.subr.bf16.mxu0 %v7386_v49 }
  0x19   :  { %100 = vperm.xlu1 %7024, %v7131_v3  }
  0x1a   :  { %510 = vperm.xlu0 %7021, %v7172_v10  }
  0x1b   :  { %6326 = vmatpush3.bf16.msra.mxu0 %v7386_v49 }
  0x1c   :  { %6328 = vmatprep.subr.bf16.mxu0 %v7410_v54 }
  0x1d   :  { %7025 = vset.pattern.permute.xlu1 %v9827_v1 }
  0x1e   :  { %522 = vperm.xlu0 %7021, %v7180_v12   ;;  %289 = vperm.xlu1 %7025, %v7131_v3  }
  0x1f   :  { %6330 = vmatpush3.bf16.msra.mxu0 %v7410_v54  ;;  %v10218_v54 = vmov 1  }
  0x20   :  { %6332 = vmatprep.subr.bf16.mxu0 %v7432_v59 }
  0x22   :  { %7063 = vset.pattern.permute.xlu0 %v9827_v1  ;;  %7026 = vset.pattern.permute.xlu1 %v9833_v0 }
  0x23   :  { %285 = vperm.xlu0 %7063, %v7188_v13   ;;  %446 = vperm.xlu1 %7026, %v7188_v13  }
  0x24   :  { %6334 = vmatpush3.bf16.msra.mxu0 %v7432_v59  ;;  %v10217_v59 = vmov 2  }
  0x27   :  { %297 = vperm.xlu0 %7063, %v51_v14   ;;  %7027 = vset.pattern.permute.xlu1 %v9837_v7 }
  0x28   :  { %607 = vperm.xlu1 %7027, %v7188_v13  }
  0x2b   :  { %309 = vperm.xlu0 %7063, %v7202_v15  }
  0x2c   :  { %7028 = vset.pattern.permute.xlu1 %v9829_v11 }
  0x2d   :  { %105 = vperm.xlu1 %7028, %v50_v16  }
  0x2f   :  { %321 = vperm.xlu0 %7063, %v7212_v17  }
  0x31   :  { %110 = vperm.xlu1 %7028, %v51_v14  }
  0x33   :  { %333 = vperm.xlu0 %7063, %v7218_v18  }
  0x35   :  { %7029 = vset.pattern.permute.xlu1 %v9827_v1 }
  0x36   :  { %293 = vperm.xlu1 %7029, %v50_v16  }
  0x37   :  { %345 = vperm.xlu0 %7063, %v7224_v19  }
  0x3a   :  { %7030 = vset.pattern.permute.xlu1 %v9833_v0 }
  0x3b   :  { %357 = vperm.xlu0 %7063, %v7231_v20   ;;  %454 = vperm.xlu1 %7030, %v50_v16  }
  0x3f   :  { %369 = vperm.xlu0 %7063, %v7238_v21   ;;  %458 = vperm.xlu1 %7030, %v51_v14  }
  0x43   :  { %381 = vperm.xlu0 %7063, %v7244_v22   ;;  %7031 = vset.pattern.permute.xlu1 %v9829_v11 }
  0x44   :  { %115 = vperm.xlu1 %7031, %v7143_v5  }
  0x47   :  { %393 = vperm.xlu0 %7063, %v7252_v23  }
  0x48   :  { %7032 = vset.pattern.permute.xlu1 %v9837_v7 }
  0x49   :  { %619 = vperm.xlu1 %7032, %v51_v14  }
  0x4b   :  { %7079 = vset.pattern.permute.xlu0 %v9837_v7 }
  0x4c   :  { %611 = vperm.xlu0 %7079, %v7131_v3   ;;  %v7460_v3 = vld [vmem:[%s9808_s1 + $0x70] sm:$0xff] }
  0x4d   :  { %7033 = vset.pattern.permute.xlu1 %v9827_v1  ;;  %10211 = vst [vmem:[#allocation25_spill] sm:$0xff] %v7460_v3 }
  0x4e   :  { %301 = vperm.xlu1 %7033, %v7143_v5  }
  0x50   :  { %615 = vperm.xlu0 %7079, %v50_v16  }
  0x52   :  { %305 = vperm.xlu1 %7033, %v7263_v24  }
  0x54   :  { %635 = vperm.xlu0 %7079, %v7151_v6  }
  0x56   :  { %7034 = vset.pattern.permute.xlu1 %v9833_v0 }
  0x57   :  { %466 = vperm.xlu1 %7034, %v7263_v24  }
  0x58   :  { %639 = vperm.xlu0 %7079, %v7270_v25  }
  0x5b   :  { %7035 = vset.pattern.permute.xlu1 %v9837_v7 }
  0x5c   :  { %659 = vperm.xlu0 %7079, %v7165_v9   ;;  %623 = vperm.xlu1 %7035, %v7143_v5   ;;  %v9814_v5 = vand.u32 4294901760, %v7460_v3 }
  0x60   :  { %663 = vperm.xlu0 %7079, %v7281_v26   ;;  %627 = vperm.xlu1 %7035, %v7263_v24  }
  0x64   :  { %683 = vperm.xlu0 %7079, %v7180_v12   ;;  %7036 = vset.pattern.permute.xlu1 %v9829_v11 }
  0x65   :  { %130 = vperm.xlu1 %7036, %v7151_v6  }
  0x68   :  { %687 = vperm.xlu0 %7079, %v7303_v31  }
  0x69   :  { %7037 = vset.pattern.permute.xlu1 %v9827_v1 }
  0x6a   :  { %313 = vperm.xlu1 %7037, %v7151_v6  }
  0x6c   :  { %707 = vperm.xlu0 %7079, %v7330_v37  }
  0x6e   :  { %7038 = vset.pattern.permute.xlu1 %v9833_v0 }
  0x6f   :  { %470 = vperm.xlu1 %7038, %v7202_v15  }
  0x70   :  { %711 = vperm.xlu0 %7079, %v7357_v43  }
  0x73   :  { %7039 = vset.pattern.permute.xlu1 %v9837_v7 }
  0x74   :  { %7081 = vset.pattern.permute.xlu0 %v9829_v11  ;;  %631 = vperm.xlu1 %7039, %v7202_v15  }
  0x75   :  { %85 = vperm.xlu0 %7081, %v7124_v2   ;;  %v7454_v2 = vpack.c.bf16 %v9811_v63, %v9812_v62  ;;  %v59_v62 = vld [vmem:[%s9807_s0 + $0x68] sm:$0xff] }
  0x77   :  { %10210 = vst [vmem:[#allocation24_spill] sm:$0xff] %v7454_v2  ;;  %6336 = vmatprep.subr.bf16.mxu0 %v7454_v2 }
  0x78   :  { %7040 = vset.pattern.permute.xlu1 %v9829_v11  ;;  %6338 = vmatpush3.bf16.msra.mxu0 %v7454_v2  ;;  %v10216_v2 = vmov 0  }
  0x79   :  { %90 = vperm.xlu0 %7081, %v7136_v4   ;;  %135 = vperm.xlu1 %7040, %v7270_v25   ;;  %v7465_v4 = vld [vmem:[%s9808_s1 + $0x78] sm:$0xff] }
  0x7a   :  { %10212 = vst [vmem:[#allocation26_spill] sm:$0xff] %v7465_v4  ;;  %v9813_v6 = vand.u32 4294901760, %v7465_v4 }
  0x7c   :  { %v7480_v16 = vpack.c.bf16 %v9813_v6, %v9814_v5 }
  0x7d   :  { %95 = vperm.xlu0 %7081, %v7188_v13   ;;  %140 = vperm.xlu1 %7040, %v7212_v17  }
  0x7e   :  { %10213 = vst [vmem:[#allocation27_spill] sm:$0xff] %v7480_v16  ;;  %6340 = vmatprep.subr.bf16.mxu0 %v7480_v16 }
  0x7f   :  { %6342 = vmatpush3.bf16.msra.mxu0 %v7480_v16 }
  0x81   :  { %120 = vperm.xlu0 %7081, %v7263_v24   ;;  %7041 = vset.pattern.permute.xlu1 %v9827_v1  ;;  %v7472_v13 = vpop.permute.xlu1 %277  ;;  %v7474_v14 = vpop.permute.xlu0 %438 }
  0x82   :  { %317 = vperm.xlu1 %7041, %v7270_v25  }
  0x85   :  { %125 = vperm.xlu0 %7081, %v7202_v15   ;;  %v7486_v24 = vpop.permute.xlu1 %281  ;;  %v7488_v63 = vpop.permute.xlu0 %450 }
  0x86   :  { %7042 = vset.pattern.permute.xlu1 %v9833_v0 }
  0x87   :  { %478 = vperm.xlu1 %7042, %v7270_v25  }
  0x89   :  { %v7496_v6 = vpop.permute.xlu0 %462  ;;  %150 = vperm.xlu0 %7081, %v59_v62  }
  0x8a   :  { %v7498_v5 = vpop.permute.xlu1 %442 }
  0x8b   :  { %482 = vperm.xlu1 %7042, %v7212_v17  }
  0x8d   :  { %v7501_v15 = vpop.permute.xlu0 %474  ;;  %155 = vperm.xlu0 %7081, %v7218_v18  }
  0x8f   :  { %7043 = vset.pattern.permute.xlu1 %v9829_v11  ;;  %v7510_v57 = vpop.permute.xlu1 %599 }
  0x90   :  { %145 = vperm.xlu1 %7043, %v7158_v8  }
  0x91   :  { %v7513_v25 = vpop.permute.xlu0 %486  ;;  %180 = vperm.xlu0 %7081, %v7507_v58  }
  0x93   :  { %v7516_v53 = vpop.permute.xlu1 %603 }
  0x94   :  { %7044 = vset.pattern.permute.xlu1 %v9837_v7 }
  0x95   :  { %643 = vperm.xlu1 %7044, %v7212_v17   ;;  %v7520_v52 = vpop.permute.xlu0 %498  ;;  %185 = vperm.xlu0 %7081, %v7231_v20  }
  0x98   :  { %v7528_v47 = vpop.permute.xlu1 %100 }
  0x99   :  { %7045 = vset.pattern.permute.xlu1 %v9827_v1  ;;  %v7531_v42 = vpop.permute.xlu0 %510  ;;  %210 = vperm.xlu0 %7081, %v7526_v48  }
  0x9a   :  { %10214 = vst [vmem:[#allocation28_spill] sm:$0xff] %v7531_v42  ;;  %325 = vperm.xlu1 %7045, %v7158_v8  }
  0x9d   :  { %v7535_v17 = vpop.permute.xlu1 %289  ;;  %v7537_v41 = vpop.permute.xlu0 %522  ;;  %215 = vperm.xlu0 %7081, %v7244_v22  }
  0x9e   :  { %10215 = vst [vmem:[#allocation29_spill] sm:$0xff] %v7537_v41  ;;  %329 = vperm.xlu1 %7045, %v59_v62  }
  0xa2   :  { %7046 = vset.pattern.permute.xlu1 %v9833_v0  ;;  %v7541_v36 = vpop.permute.xlu1 %446  ;;  %v7543_v35 = vpop.permute.xlu0 %285  ;;  %v7560_v0 = vld [vmem:[%s9807_s0 + $0xf8] sm:$0xff] }
  0xa3   :  { %490 = vperm.xlu1 %7046, %v59_v62   ;;  %240 = vperm.xlu0 %7081, %v7560_v0  }
  0xa6   :  { %v7545_v30 = vpop.permute.xlu0 %297 }
  0xa7   :  { %7047 = vset.pattern.permute.xlu1 %v9837_v7  ;;  %v7548_v29 = vpop.permute.xlu1 %607  ;;  %7084 = vset.pattern.permute.xlu0 %v10217_v59 }
  0xa8   :  { %647 = vperm.xlu1 %7047, %v7158_v8  }
  0xaa   :  { %v7551_v1 = vpop.permute.xlu0 %309 }
  0xac   :  { %651 = vperm.xlu1 %7047, %v59_v62   ;;  %v7553_v11 = vpop.permute.xlu1 %105  ;;  %v7572_v62 = vld [vmem:[%s9807_s0 + $0xc0] sm:$0xff] }
  0xad   :  { %534 = vperm.xlu0 %7084, %v7572_v62  }
  0xae   :  { %v7555_v16 = vpop.permute.xlu0 %321 }
  0xb0   :  { %7048 = vset.pattern.permute.xlu1 %v10216_v2  ;;  %v7564_v7 = vpop.permute.xlu1 %110 }
  0xb1   :  { %160 = vperm.xlu1 %7048, %v7165_v9   ;;  %546 = vperm.xlu0 %7084, %v7330_v37  }
  0xb2   :  { %v7567_v8 = vpop.permute.xlu0 %333 }
  0xb5   :  { %7049 = vset.pattern.permute.xlu1 %v10218_v54  ;;  %v7577_v49 = vpop.permute.xlu1 %293  ;;  %558 = vperm.xlu0 %7084, %v7680_v28  }
  0xb6   :  { %337 = vperm.xlu1 %7049, %v7165_v9   ;;  %v7580_v44 = vpop.permute.xlu0 %345 }
  0xb7   :  { %10219 = vst [vmem:[#allocation30_spill] sm:$0xff] %v7580_v44 }
  0xb9   :  { %7088 = vset.pattern.permute.xlu0 %v10222_v61 }
  0xba   :  { %7050 = vset.pattern.permute.xlu1 %v10217_v59  ;;  %v7584_v38 = vpop.permute.xlu1 %454  ;;  %v7586_v32 = vpop.permute.xlu0 %357  ;;  %723 = vperm.xlu0 %7088, %v7560_v0  }
  0xbb   :  { %10220 = vst [vmem:[#allocation31_spill] sm:$0xff] %v7586_v32  ;;  %494 = vperm.xlu1 %7050, %v7218_v18  }
  0xbe   :  { %v7589_v4 = vpop.permute.xlu1 %458  ;;  %v7591_v3 = vpop.permute.xlu0 %369 }
  0xbf   :  { %10221 = vst [vmem:[#allocation32_spill] sm:$0xff] %v7591_v3  ;;  %7051 = vset.pattern.permute.xlu1 %v10222_v61 }
  0xc0   :  { %655 = vperm.xlu1 %7051, %v7218_v18  }
  0xc2   :  { %v7595_v9 = vpop.permute.xlu0 %381 }
  0xc3   :  { %10223 = vst [vmem:[#allocation33_spill] sm:$0xff] %v7595_v9  ;;  %v7597_v60 = vpop.permute.xlu1 %115 }
  0xc4   :  { %7052 = vset.pattern.permute.xlu1 %v10216_v2 }
  0xc5   :  { %165 = vperm.xlu1 %7052, %v7281_v26  }
  0xc6   :  { %v7601_v56 = vpop.permute.xlu0 %393 }
  0xc7   :  { %10224 = vst [vmem:[#allocation34_spill] sm:$0xff] %v7601_v56 }
  0xc8   :  { %v7603_v32 = vpop.permute.xlu1 %619 }
  0xc9   :  { %170 = vperm.xlu1 %7052, %v7224_v19  }
  0xcb   :  { %v612_v41 = vpop.permute.xlu0 %611 }
  0xcd   :  { %7053 = vset.pattern.permute.xlu1 %v10218_v54  ;;  %v302_v3 = vpop.permute.xlu1 %301 }
  0xce   :  { %341 = vperm.xlu1 %7053, %v7281_v26  }
  0xcf   :  { %v616_v18 = vpop.permute.xlu0 %615 }
  0xd1   :  { %v7608_v9 = vpop.permute.xlu1 %305 }
  0xd2   :  { %7054 = vset.pattern.permute.xlu1 %v10217_v59 }
  0xd3   :  { %502 = vperm.xlu1 %7054, %v7281_v26   ;;  %v7612_v55 = vpop.permute.xlu0 %635  ;;  %v78_v26 = vlaneseq }
  0xd5   :  { %v7634_v34 = vand.u32 127, %v78_v26 }
  0xd6   :  { %v7614_v56 = vpop.permute.xlu1 %466 }
  0xd7   :  { %506 = vperm.xlu1 %7054, %v7224_v19   ;;  %v7617_v51 = vpop.permute.xlu0 %639  ;;  %vm80_vm0 = vcmp.eq.s32.totalorder %v7634_v34, 4  ;;  %vm82_vm1 = vcmp.eq.s32.totalorder %v7634_v34, 0  ;;  %vm275_vm2 = vcmp.eq.s32.totalorder %v7634_v34, 1  ;;  %vm436_vm3 = vcmp.eq.s32.totalorder %v7634_v34, 2 }
  0xd8   :  { %vm597_vm4 = vcmp.eq.s32.totalorder %v7634_v34, 3 }
  0xdb   :  { %7055 = vset.pattern.permute.xlu1 %v10216_v2  ;;  %v7620_v50 = vpop.permute.xlu1 %623  ;;  %v7622_v42 = vpop.permute.xlu0 %659 }
  0xdc   :  { %175 = vperm.xlu1 %7055, %v7172_v10  }
  0xdf   :  { %v7625_v46 = vpop.permute.xlu1 %627  ;;  %v7627_v45 = vpop.permute.xlu0 %663 }
  0xe0   :  { %7056 = vset.pattern.permute.xlu1 %v10222_v61 }
  0xe1   :  { %667 = vperm.xlu1 %7056, %v7224_v19   ;;  %v7098_v19 = vmov 0.0  }
  0xe2   :  { %v7643_v43 = vsel %vm80_vm0, 1.0, %v7098_v19 }
  0xe3   :  { %v7631_v40 = vpop.permute.xlu0 %683 }
  0xe4   :  { %10225 = vst [vmem:[#allocation35_spill] sm:$0xff] %v7631_v40  ;;  %v131_v39 = vpop.permute.xlu1 %130 }
  0xe5   :  { %7057 = vset.pattern.permute.xlu1 %v10218_v54 }
  0xe6   :  { %349 = vperm.xlu1 %7057, %v7172_v10  }
  0xe7   :  { %v7637_v33 = vpop.permute.xlu0 %687 }
  0xe8   :  { %10226 = vst [vmem:[#allocation36_spill] sm:$0xff] %v7637_v33 }
  0xe9   :  { %v314_v23 = vpop.permute.xlu1 %313 }
  0xea   :  { %353 = vperm.xlu1 %7057, %v7507_v58  }
  0xeb   :  { %v7641_v44 = vpop.permute.xlu0 %707 }
  0xec   :  { %10227 = vst [vmem:[#allocation37_spill] sm:$0xff] %v7641_v44  ;;  %v246_v44 = vsel %vm82_vm1, %v7528_v47, %v7643_v43  ;;  %v248_v47 = vsel %vm82_vm1, %v7564_v7, %v7643_v43 }
  0xed   :  { %v407_v19 = vsel %vm275_vm2, %v7535_v17, %v246_v44 }
  0xee   :  { %7058 = vset.pattern.permute.xlu1 %v10217_v59  ;;  %v7648_v26 = vpop.permute.xlu1 %470  ;;  %v568_v44 = vsel %vm436_vm3, %v7488_v63, %v407_v19  ;;  %v249_v63 = vsel %vm82_vm1, %v7597_v60, %v7643_v43 }
  0xef   :  { %514 = vperm.xlu1 %7058, %v7507_v58   ;;  %v7651_v33 = vpop.permute.xlu0 %711  ;;  %v729_v7 = vsel %vm597_vm4, %v612_v41, %v568_v44  ;;  %v409_v41 = vsel %vm275_vm2, %v7545_v30, %v248_v47 }
  0xf0   :  { %10228 = vst [vmem:[#allocation38_spill] sm:$0xff] %v7651_v33  ;;  %v247_v33 = vsel %vm82_vm1, %v7553_v11, %v7643_v43  ;;  %v570_v60 = vsel %vm436_vm3, %v7589_v4, %v409_v41  ;;  %v7714_v44 = vand.u32 4294901760, %v729_v7 }
  0xf1   :  { %v408_v11 = vsel %vm275_vm2, %v7577_v49, %v247_v33  ;;  %v410_v49 = vsel %vm275_vm2, %v302_v3, %v249_v63 }
  0xf3   :  { %7059 = vset.pattern.permute.xlu1 %v10222_v61  ;;  %v7662_v40 = vpop.permute.xlu1 %631 }
  0xf4   :  { %v86_v17 = vpop.permute.xlu0 %85  ;;  %671 = vperm.xlu1 %7059, %v7172_v10   ;;  %v569_v10 = vsel %vm436_vm3, %v7584_v38, %v408_v11 }
  0xf5   :  { %v243_v27 = vsel %vm82_vm1, %v86_v17, %v7643_v43  ;;  %v730_v19 = vsel %vm597_vm4, %v616_v18, %v569_v10 }
  0xf6   :  { %v404_v33 = vsel %vm275_vm2, %v7472_v13, %v243_v27  ;;  %v731_v13 = vsel %vm597_vm4, %v7603_v32, %v570_v60  ;;  %v7729_v4 = vand.u32 4294901760, %v730_v19 }
  0xf7   :  { %v565_v38 = vsel %vm436_vm3, %v7474_v14, %v404_v33  ;;  %v7747_v11 = vand.u32 4294901760, %v731_v13 }
  0xf8   :  { %v91_v27 = vpop.permute.xlu0 %90  ;;  %675 = vperm.xlu1 %7059, %v7507_v58   ;;  %v136_v30 = vpop.permute.xlu1 %135  ;;  %v726_v3 = vsel %vm597_vm4, %v7510_v57, %v565_v38  ;;  %v571_v58 = vsel %vm436_vm3, %v7496_v6, %v410_v49  ;;  %v7750_v6 = vsub.f32 %v729_v7, %v7714_v44 }
  0xf9   :  { %v244_v14 = vsel %vm82_vm1, %v91_v27, %v7643_v43  ;;  %v7726_v18 = vand.u32 4294901760, %v726_v3  ;;  %v732_v32 = vsel %vm597_vm4, %v7620_v50, %v571_v58 }
  0xfa   :  { %v405_v57 = vsel %vm275_vm2, %v7486_v24, %v244_v14  ;;  %v252_v24 = vsel %vm82_vm1, %v131_v39, %v7643_v43  ;;  %v7773_v41 = vand.u32 4294901760, %v732_v32 }
  0xfb   :  { %v566_v47 = vsel %vm436_vm3, %v7498_v5, %v405_v57  ;;  %v7745_v17 = vsub.f32 %v726_v3, %v7726_v18  ;;  %v413_v63 = vsel %vm275_vm2, %v314_v23, %v252_v24 }
  0xfc   :  { %v727_v50 = vsel %vm597_vm4, %v7516_v53, %v566_v47  ;;  %v96_v10 = vpop.permute.xlu0 %95  ;;  %7060 = vset.pattern.permute.xlu1 %v10216_v2  ;;  %v7759_v5 = vpop.permute.xlu1 %140  ;;  %v7771_v53 = vsub.f32 %v730_v19, %v7729_v4  ;;  %v7788_v19 = vsub.f32 %v731_v13, %v7747_v11  ;;  %v574_v27 = vsel %vm436_vm3, %v7501_v15, %v413_v63 }
  0xfd   :  { %v7763_v33 = vand.u32 4294901760, %v727_v50  ;;  %v245_v7 = vsel %vm82_vm1, %v96_v10, %v7643_v43  ;;  %190 = vperm.xlu1 %7060, %v7180_v12   ;;  %v9899_v39 = vand.u32 4294901760, %v7745_v17  ;;  %v7805_v15 = vsub.f32 %v732_v32, %v7773_v41 }
  0xfe   :  { %v406_v49 = vsel %vm275_vm2, %v7543_v35, %v245_v7  ;;  %v9895_v24 = vand.u32 4294901760, %v7771_v53  ;;  %v9894_v7 = vand.u32 4294901760, %v7788_v19 }
  0xff   :  { %v567_v23 = vsel %vm436_vm3, %v7541_v36, %v406_v49  ;;  %v842_v38 = vsub.f32 %v7745_v17, %v9899_v39  ;;  %v7785_v60 = vsub.f32 %v727_v50, %v7763_v33  ;;  %v9896_v36 = vand.u32 4294901760, %v7750_v6  ;;  %10229 = vst [vmem:[#allocation39_spill] sm:$0xff] %v7805_v15  ;;  %v10256_v39 = vld [vmem:[#allocation7_spill] sm:$0xff] }
 0x100   :  { %v728_v35 = vsel %vm597_vm4, %v7548_v29, %v567_v23  ;;  %v121_v3 = vpop.permute.xlu0 %120  ;;  %v735_v50 = vsel %vm597_vm4, %v7612_v55, %v574_v27 }
 0x101   :  { %v7797_v14 = vand.u32 4294901760, %v728_v35  ;;  %v250_v58 = vsel %vm82_vm1, %v121_v3, %v7643_v43  ;;  %7061 = vset.pattern.permute.xlu1 %v10218_v54  ;;  %v318_v13 = vpop.permute.xlu1 %317  ;;  %v843_v57 = vand.u32 4294901760, %v842_v38  ;;  %v9898_v47 = vand.u32 4294901760, %v7785_v60 }
 0x102   :  { %v411_v29 = vsel %vm275_vm2, %v7608_v9, %v250_v58  ;;  %361 = vperm.xlu1 %7061, %v7180_v12   ;;  %v253_v12 = vsel %vm82_vm1, %v136_v30, %v7643_v43  ;;  %v7840_v27 = vand.u32 4294901760, %v735_v50  ;;  %v882_v58 = vsub.f32 %v7771_v53, %v9895_v24 }
 0x103   :  { %v572_v10 = vsel %vm436_vm3, %v7614_v56, %v411_v29  ;;  %5383 = vmatprep.mubr.f32.mxu0 %v843_v57  ;;  %v852_v32 = vsub.f32 %v7785_v60, %v9898_v47  ;;  %v7822_v63 = vsub.f32 %v728_v35, %v7797_v14  ;;  %v872_v56 = vsub.f32 %v7750_v6, %v9896_v36  ;;  %v10253_v36 = vld [vmem:[#allocation6_spill] sm:$0xff] }
 0x104   :  { %v733_v55 = vsel %vm597_vm4, %v7625_v46, %v572_v10  ;;  %v126_v9 = vpop.permute.xlu0 %125  ;;  %v414_v46 = vsel %vm275_vm2, %v318_v13, %v253_v12  ;;  %v9883_v13 = vand.u32 4294901760, %v7805_v15 }
 0x105   :  { %v7834_v49 = vand.u32 4294901760, %v733_v55  ;;  %v251_v23 = vsel %vm82_vm1, %v126_v9, %v7643_v43  ;;  %v853_v38 = vand.u32 4294901760, %v852_v32  ;;  %v9897_v30 = vand.u32 4294901760, %v7822_v63 }
 0x106   :  { %v412_v35 = vsel %vm275_vm2, %v7551_v1, %v251_v23  ;;  %7062 = vset.pattern.permute.xlu1 %v10217_v59  ;;  %v479_v3 = vpop.permute.xlu1 %478 }
 0x107   :  { %v573_v57 = vsel %vm436_vm3, %v7648_v26, %v412_v35  ;;  %v575_v29 = vsel %vm436_vm3, %v479_v3, %v414_v46  ;;  %5384 = vmatmul.mubr.f32.vlgmr.msra.gmra.mrb[0].mxu0 %v853_v38  ;;  %518 = vperm.xlu1 %7062, %v7231_v20   ;;  %v862_v1 = vsub.f32 %v7822_v63, %v9897_v30  ;;  %v873_v35 = vand.u32 4294901760, %v872_v56 }
 0x108   :  { %v734_v10 = vsel %vm597_vm4, %v7662_v40, %v573_v57  ;;  %v736_v26 = vsel %vm597_vm4, %v7617_v51, %v575_v29  ;;  %v7868_v32 = vsub.f32 %v733_v55, %v7834_v49  ;;  %v7875_v38 = vsub.f32 %v735_v50, %v7840_v27 }
 0x109   :  { %v7870_v12 = vand.u32 4294901760, %v734_v10  ;;  %v7872_v9 = vand.u32 4294901760, %v736_v26  ;;  %v863_v23 = vand.u32 4294901760, %v862_v1  ;;  %v892_v40 = vsub.f32 %v7788_v19, %v9894_v7  ;;  %v10251_v7 = vld [vmem:[#allocation2_spill] sm:$0xff] }
 0x10a   :  { %10230 = vst [vmem:[#allocation40_spill] sm:$0xff] %v7868_v32  ;;  %10231 = vst [vmem:[#allocation41_spill] sm:$0xff] %v7875_v38  ;;  %v483_v46 = vpop.permute.xlu1 %482  ;;  %v9893_v3 = vand.u32 4294901760, %v7868_v32  ;;  %v883_v55 = vand.u32 4294901760, %v882_v58  ;;  %v902_v50 = vsub.f32 %v7805_v15, %v9883_v13  ;;  %v9885_v58 = vand.u32 4294901760, %v7875_v38 }
 0x10b   :  { %v7882_v51 = vsub.f32 %v736_v26, %v7872_v9  ;;  %7064 = vset.pattern.permute.xlu1 %v10222_v61  ;;  %5386 = vmatprep.mubr.f32.mxu0 %v863_v23  ;;  %v7889_v57 = vsub.f32 %v734_v10, %v7870_v12  ;;  %v893_v29 = vand.u32 4294901760, %v892_v40  ;;  %v10254_v30 = vand.u32 4294901760, %v10253_v36 }
 0x10c   :  { %679 = vperm.xlu1 %7064, %v7231_v20   ;;  %5387 = vmatmul.mubr.f32.gmra.mrb[2].mxu0 %v873_v35  ;;  %v912_v1 = vsub.f32 %v7868_v32, %v9893_v3  ;;  %v903_v23 = vand.u32 4294901760, %v902_v50  ;;  %v254_v20 = vsel %vm82_vm1, %v7759_v5, %v7643_v43  ;;  %v932_v40 = vsub.f32 %v7875_v38, %v9885_v58 }
 0x10d   :  { %10232 = vst [vmem:[#allocation42_spill] sm:$0xff] %v7882_v51  ;;  %10233 = vst [vmem:[#allocation43_spill] sm:$0xff] %v7889_v57  ;;  %5389 = vmatprep.mubr.f32.mxu0 %v883_v55  ;;  %v9884_v56 = vand.u32 4294901760, %v7889_v57  ;;  %v9892_v13 = vand.u32 4294901760, %v7882_v51  ;;  %v415_v55 = vsel %vm275_vm2, %v7555_v16, %v254_v20  ;;  %v8086_v47 = vsub.f32 %v10253_v36, %v10254_v30 }
 0x10e   :  { %v913_v35 = vand.u32 4294901760, %v912_v1  ;;  %v933_v58 = vand.u32 4294901760, %v932_v40 }
 0x10f   :  { %v146_v26 = vpop.permute.xlu1 %145  ;;  %v922_v10 = vsub.f32 %v7889_v57, %v9884_v56  ;;  %v942_v5 = vsub.f32 %v7882_v51, %v9892_v13 }
 0x110   :  { %7065 = vset.pattern.permute.xlu1 %v10216_v2  ;;  %5390 = vmatmul.mubr.f32.gmra.mrb[4].mxu0 %v893_v29  ;;  %v576_v29 = vsel %vm436_vm3, %v483_v46, %v415_v55  ;;  %v255_v55 = vsel %vm82_vm1, %v146_v26, %v7643_v43 }
 0x111   :  { %195 = vperm.xlu1 %7065, %v7303_v31   ;;  %5392 = vmatprep.mubr.f32.mxu0 %v903_v23  ;;  %v923_v50 = vand.u32 4294901760, %v922_v10  ;;  %v943_v16 = vand.u32 4294901760, %v942_v5  ;;  %v151_v5 = vpop.permute.xlu0 %150 }
 0x114   :  { %5393 = vmatmul.mubr.f32.gmra.mrb[6].mxu0 %v913_v35  ;;  %v644_v56 = vpop.permute.xlu1 %643 }
 0x115   :  { %v737_v1 = vsel %vm597_vm4, %v644_v56, %v576_v29  ;;  %200 = vperm.xlu1 %7065, %v7238_v21   ;;  %5395 = vmatprep.mubr.f32.mxu0 %v923_v50  ;;  %v256_v29 = vsel %vm82_vm1, %v151_v5, %v7643_v43 }
 0x116   :  { %v7921_v23 = vand.u32 4294901760, %v737_v1 }
 0x118   :  { %v7924_v10 = vsub.f32 %v737_v1, %v7921_v23  ;;  %5396 = vmatmul.mubr.f32.gmra.mrb[8].mxu0 %v933_v58 }
 0x119   :  { %7066 = vset.pattern.permute.xlu1 %v10218_v54  ;;  %5398 = vmatprep.mubr.f32.mxu0 %v943_v16  ;;  %v326_v46 = vpop.permute.xlu1 %325 }
 0x11a   :  { %10234 = vst [vmem:[#allocation44_spill] sm:$0xff] %v7924_v10  ;;  %365 = vperm.xlu1 %7066, %v7303_v31   ;;  %v9890_v20 = vand.u32 4294901760, %v7924_v10  ;;  %v416_v50 = vsel %vm275_vm2, %v326_v46, %v255_v55 }
 0x11c   :  { %v952_v56 = vsub.f32 %v7924_v10, %v9890_v20 }
 0x11d   :  { %v330_v35 = vpop.permute.xlu1 %329 }
 0x11e   :  { %7067 = vset.pattern.permute.xlu1 %v10217_v59  ;;  %v953_v40 = vand.u32 4294901760, %v952_v56  ;;  %v417_v46 = vsel %vm275_vm2, %v330_v35, %v256_v29 }
 0x11f   :  { %526 = vperm.xlu1 %7067, %v7303_v31   ;;  %v577_v31 = vsel %vm436_vm3, %v7513_v25, %v416_v50 }
 0x120   :  { %5399 = vmatmul.mubr.f32.gmra.mrb[10].mxu0 %v953_v40 }
 0x122   :  { %v491_v58 = vpop.permute.xlu1 %490 }
 0x123   :  { %530 = vperm.xlu1 %7067, %v7238_v21   ;;  %v578_v56 = vsel %vm436_vm3, %v491_v58, %v417_v46 }
 0x127   :  { %7068 = vset.pattern.permute.xlu1 %v10216_v2  ;;  %v648_v1 = vpop.permute.xlu1 %647 }
 0x128   :  { %v738_v26 = vsel %vm597_vm4, %v648_v1, %v577_v31  ;;  %205 = vperm.xlu1 %7068, %v7572_v62  }
 0x129   :  { %v7950_v16 = vand.u32 4294901760, %v738_v26 }
 0x12b   :  { %10235 = vst [vmem:[#allocation45_spill] sm:$0xff] %v7950_v16  ;;  %v7957_v40 = vsub.f32 %v738_v26, %v7950_v16  ;;  %v652_v55 = vpop.permute.xlu1 %651 }
 0x12c   :  { %v739_v25 = vsel %vm597_vm4, %v652_v55, %v578_v56  ;;  %7069 = vset.pattern.permute.xlu1 %v10222_v61 }
 0x12d   :  { %10236 = vst [vmem:[#allocation46_spill] sm:$0xff] %v7957_v40  ;;  %v7962_v50 = vand.u32 4294901760, %v739_v25  ;;  %691 = vperm.xlu1 %7069, %v7238_v21   ;;  %v9889_v5 = vand.u32 4294901760, %v7957_v40 }
 0x12f   :  { %10237 = vst [vmem:[#allocation47_spill] sm:$0xff] %v7962_v50  ;;  %v7967_v35 = vsub.f32 %v739_v25, %v7962_v50  ;;  %v962_v58 = vsub.f32 %v7957_v40, %v9889_v5  ;;  %v156_v25 = vpop.permute.xlu0 %155  ;;  %v10249_v5 = vld [vmem:[#allocation11_spill] sm:$0xff] }
 0x130   :  { %v161_v29 = vpop.permute.xlu1 %160 }
 0x131   :  { %10238 = vst [vmem:[#allocation48_spill] sm:$0xff] %v7967_v35  ;;  %7070 = vset.pattern.permute.xlu1 %v10218_v54  ;;  %v963_v31 = vand.u32 4294901760, %v962_v58  ;;  %v9888_v1 = vand.u32 4294901760, %v7967_v35  ;;  %v258_v26 = vsel %vm82_vm1, %v161_v29, %v7643_v43  ;;  %v257_v29 = vsel %vm82_vm1, %v156_v25, %v7643_v43 }
 0x132   :  { %373 = vperm.xlu1 %7070, %v7572_v62  }
 0x133   :  { %5401 = vmatprep.mubr.f32.mxu0 %v963_v31  ;;  %v972_v21 = vsub.f32 %v7967_v35, %v9888_v1 }
 0x135   :  { %v338_v46 = vpop.permute.xlu1 %337  ;;  %v973_v56 = vand.u32 4294901760, %v972_v21 }
 0x136   :  { %v419_v55 = vsel %vm275_vm2, %v338_v46, %v258_v26  ;;  %377 = vperm.xlu1 %7070, %v7526_v48  }
 0x137   :  { %v580_v58 = vsel %vm436_vm3, %v7520_v52, %v419_v55  ;;  %5402 = vmatmul.mubr.f32.gmra.mrb[12].mxu0 %v973_v56  ;;  %v418_v52 = vsel %vm275_vm2, %v7567_v8, %v257_v29 }
 0x138   :  { %v741_v31 = vsel %vm597_vm4, %v7622_v42, %v580_v58 }
 0x139   :  { %v7993_v21 = vand.u32 4294901760, %v741_v31 }
 0x13a   :  { %7071 = vset.pattern.permute.xlu1 %v10217_v59  ;;  %v495_v26 = vpop.permute.xlu1 %494 }
 0x13b   :  { %10239 = vst [vmem:[#allocation49_spill] sm:$0xff] %v7993_v21  ;;  %538 = vperm.xlu1 %7071, %v7526_v48   ;;  %v8001_v46 = vsub.f32 %v741_v31, %v7993_v21  ;;  %v579_v42 = vsel %vm436_vm3, %v495_v26, %v418_v52 }
 0x13d   :  { %10240 = vst [vmem:[#allocation50_spill] sm:$0xff] %v8001_v46  ;;  %v9886_v58 = vand.u32 4294901760, %v8001_v46 }
 0x13f   :  { %7072 = vset.pattern.permute.xlu1 %v10222_v61  ;;  %v656_v56 = vpop.permute.xlu1 %655  ;;  %v992_v26 = vsub.f32 %v8001_v46, %v9886_v58 }
 0x140   :  { %v740_v55 = vsel %vm597_vm4, %v656_v56, %v579_v42  ;;  %695 = vperm.xlu1 %7072, %v7572_v62  }
 0x141   :  { %v8009_v25 = vand.u32 4294901760, %v740_v55  ;;  %v993_v56 = vand.u32 4294901760, %v992_v26 }
 0x143   :  { %10241 = vst [vmem:[#allocation51_spill] sm:$0xff] %v8009_v25  ;;  %v8013_v8 = vsub.f32 %v740_v55, %v8009_v25 }
 0x144   :  { %699 = vperm.xlu1 %7072, %v7526_v48   ;;  %v166_v31 = vpop.permute.xlu1 %165 }
 0x145   :  { %10242 = vst [vmem:[#allocation52_spill] sm:$0xff] %v8013_v8  ;;  %v9887_v29 = vand.u32 4294901760, %v8013_v8  ;;  %v259_v55 = vsel %vm82_vm1, %v166_v31, %v7643_v43 }
 0x147   :  { %v982_v62 = vsub.f32 %v8013_v8, %v9887_v29 }
 0x148   :  { %7073 = vset.pattern.permute.xlu1 %v10216_v2  ;;  %v171_v52 = vpop.permute.xlu1 %170 }
 0x149   :  { %220 = vperm.xlu1 %7073, %v7330_v37   ;;  %v983_v42 = vand.u32 4294901760, %v982_v62 }
 0x14b   :  { %5404 = vmatprep.mubr.f32.mxu0 %v983_v42 }
 0x14c   :  { %5405 = vmatmul.mubr.f32.gmra.mrb[14].mxu0 %v993_v56 }
 0x14d   :  { %7074 = vset.pattern.permute.xlu1 %v10218_v54  ;;  %v342_v48 = vpop.permute.xlu1 %341 }
 0x14e   :  { %385 = vperm.xlu1 %7074, %v7330_v37   ;;  %v420_v58 = vsel %vm275_vm2, %v342_v48, %v259_v55 }
 0x152   :  { %7075 = vset.pattern.permute.xlu1 %v10217_v59  ;;  %v503_v29 = vpop.permute.xlu1 %502 }
 0x153   :  { %v581_v26 = vsel %vm436_vm3, %v503_v29, %v420_v58  ;;  %542 = vperm.xlu1 %7075, %v7244_v22   ;;  %v10245_v29 = vld [vmem:[#allocation3_spill] sm:$0xff] }
 0x154   :  { %v742_v62 = vsel %vm597_vm4, %v7627_v45, %v581_v26  ;;  %v10246_v55 = vand.u32 4294901760, %v10245_v29  ;;  %v10247_v26 = vld [vmem:[#allocation4_spill] sm:$0xff] }
 0x155   :  { %v8039_v37 = vand.u32 4294901760, %v742_v62  ;;  %v10248_v1 = vand.u32 4294901760, %v10247_v26  ;;  %10255 = vst [vmem:[#allocation4_spill] sm:$0xff] %v8086_v47 }
 0x156   :  { %v507_v42 = vpop.permute.xlu1 %506  ;;  %v8053_v45 = vsub.f32 %v10245_v29, %v10246_v55  ;;  %v10250_v29 = vld [vmem:[#allocation30_spill] sm:$0xff] }
 0x157   :  { %10243 = vst [vmem:[#allocation53_spill] sm:$0xff] %v8039_v37  ;;  %v8042_v31 = vsub.f32 %v742_v62, %v8039_v37  ;;  %7076 = vset.pattern.permute.xlu1 %v10222_v61  ;;  %v8058_v62 = vsub.f32 %v10247_v26, %v10248_v1 }
 0x158   :  { %703 = vperm.xlu1 %7076, %v7244_v22   ;;  %v260_v22 = vsel %vm82_vm1, %v171_v52, %v7643_v43 }
 0x159   :  { %10244 = vst [vmem:[#allocation54_spill] sm:$0xff] %v8042_v31  ;;  %v9891_v56 = vand.u32 4294901760, %v8042_v31  ;;  %v9900_v13 = vand.u32 4294901760, %v8058_v62  ;;  %v421_v55 = vsel %vm275_vm2, %v10250_v29, %v260_v22 }
 0x15b   :  { %v176_v48 = vpop.permute.xlu1 %175  ;;  %v1002_v58 = vsub.f32 %v8042_v31, %v9891_v56  ;;  %v9903_v56 = vand.u32 4294901760, %v8053_v45  ;;  %v1170_v52 = vsub.f32 %v8058_v62, %v9900_v13  ;;  %v10257_v13 = vand.u32 4294901760, %v10256_v39 }
 0x15c   :  { %7077 = vset.pattern.permute.xlu1 %v10216_v2 }
 0x15d   :  { %225 = vperm.xlu1 %7077, %v10249_v5   ;;  %v1003_v20 = vand.u32 4294901760, %v1002_v58  ;;  %v1163_v1 = vsub.f32 %v8053_v45, %v9903_v56  ;;  %v582_v58 = vsel %vm436_vm3, %v507_v42, %v421_v55  ;;  %v1171_v22 = vand.u32 4294901760, %v1170_v52  ;;  %v181_v56 = vpop.permute.xlu0 %180 }
 0x15e   :  { %v8091_v42 = vsub.f32 %v10256_v39, %v10257_v13  ;;  %v9901_v52 = vand.u32 4294901760, %v8086_v47 }
 0x15f   :  { %5407 = vmatprep.mubr.f32.mxu0 %v1003_v20  ;;  %v1164_v24 = vand.u32 4294901760, %v1163_v1 }
 0x160   :  { %v668_v26 = vpop.permute.xlu1 %667  ;;  %10258 = vst [vmem:[#allocation11_spill] sm:$0xff] %v8091_v42  ;;  %v1177_v39 = vsub.f32 %v8086_v47, %v9901_v52 }
 0x161   :  { %v743_v3 = vsel %vm597_vm4, %v668_v26, %v582_v58  ;;  %230 = vperm.xlu1 %7077, %v10251_v7   ;;  %v6343_v29 = vpack.c.bf16 %v1171_v22, %v1164_v24  ;;  %v9902_v24 = vand.u32 4294901760, %v8091_v42 }
 0x162   :  { %v8081_v20 = vand.u32 4294901760, %v743_v3  ;;  %v1178_v58 = vand.u32 4294901760, %v1177_v39 }
 0x163   :  { %6344 = vmatprep.subr.bf16.mxu0 %v6343_v29  ;;  %v1184_v30 = vsub.f32 %v8091_v42, %v9902_v24  ;;  %v261_v24 = vsel %vm82_vm1, %v176_v48, %v7643_v43 }
 0x164   :  { %10252 = vst [vmem:[#allocation3_spill] sm:$0xff] %v8081_v20  ;;  %v8094_v55 = vsub.f32 %v743_v3, %v8081_v20  ;;  %6346 = vmatpush3.bf16.msra.mxu0 %v6343_v29 }
 0x165   :  { %7078 = vset.pattern.permute.xlu1 %v10218_v54  ;;  %v350_v1 = vpop.permute.xlu1 %349  ;;  %v1185_v26 = vand.u32 4294901760, %v1184_v30 }
 0x166   :  { %10259 = vst [vmem:[#allocation30_spill] sm:$0xff] %v8094_v55  ;;  %389 = vperm.xlu1 %7078, %v10249_v5   ;;  %v9904_v36 = vand.u32 4294901760, %v8094_v55  ;;  %v422_v48 = vsel %vm275_vm2, %v350_v1, %v261_v24  ;;  %v10272_v1 = vld [vmem:[#allocation28_spill] sm:$0xff] }
 0x167   :  { %v6347_v29 = vpack.c.bf16 %v1185_v26, %v1178_v58  ;;  %v10266_v58 = vld [vmem:[#allocation13_spill] sm:$0xff]  ;;  %v583_v24 = vsel %vm436_vm3, %v10272_v1, %v422_v48 }
 0x168   :  { %v1012_v13 = vsub.f32 %v8094_v55, %v9904_v36  ;;  %v10260_v36 = vld [vmem:[#allocation9_spill] sm:$0xff]  ;;  %v10267_v26 = vand.u32 4294901760, %v10266_v58 }
 0x169   :  { %v354_v3 = vpop.permute.xlu1 %353  ;;  %6348 = vmatprep.subr.bf16.mxu0 %v6347_v29  ;;  %v10261_v39 = vand.u32 4294901760, %v10260_v36 }
 0x16a   :  { %7080 = vset.pattern.permute.xlu1 %v10217_v59  ;;  %v1013_v22 = vand.u32 4294901760, %v1012_v13  ;;  %6350 = vmatpush3.bf16.msra.mxu0 %v6347_v29  ;;  %v10263_v13 = vld [vmem:[#allocation10_spill] sm:$0xff] }
 0x16b   :  { %550 = vperm.xlu1 %7080, %v10249_v5   ;;  %v8119_v30 = vsub.f32 %v10260_v36, %v10261_v39  ;;  %v10264_v55 = vand.u32 4294901760, %v10263_v13  ;;  %v10269_v29 = vld [vmem:[#allocation14_spill] sm:$0xff] }
 0x16c   :  { %5408 = vmatmul.mubr.f32.gmra.mrb[16].mxu0 %v1013_v22  ;;  %v8129_v22 = vsub.f32 %v10266_v58, %v10267_v26 }
 0x16d   :  { %10262 = vst [vmem:[#allocation2_spill] sm:$0xff] %v8119_v30  ;;  %v8124_v5 = vsub.f32 %v10263_v13, %v10264_v55  ;;  %v9909_v36 = vand.u32 4294901760, %v8119_v30  ;;  %v262_v13 = vsel %vm82_vm1, %v181_v56, %v7643_v43 }
 0x16e   :  { %v515_v52 = vpop.permute.xlu1 %514  ;;  %10268 = vst [vmem:[#allocation7_spill] sm:$0xff] %v8129_v22  ;;  %v9917_v55 = vand.u32 4294901760, %v8129_v22 }
 0x16f   :  { %554 = vperm.xlu1 %7080, %v10251_v7   ;;  %10265 = vst [vmem:[#allocation6_spill] sm:$0xff] %v8124_v5  ;;  %v10270_v7 = vand.u32 4294901760, %v10269_v29  ;;  %v9914_v39 = vand.u32 4294901760, %v8124_v5 }
 0x170   :  { %v1205_v56 = vsub.f32 %v8129_v22, %v9917_v55 }
 0x171   :  { %v8136_v31 = vsub.f32 %v10269_v29, %v10270_v7  ;;  %v1191_v29 = vsub.f32 %v8119_v30, %v9909_v36  ;;  %v1198_v7 = vsub.f32 %v8124_v5, %v9914_v39  ;;  %v423_v39 = vsel %vm275_vm2, %v354_v3, %v262_v13  ;;  %v7089_v3 = vld [vmem:[%s9807_s0 + $0xe8] sm:$0xff]  ;;  %v10280_v13 = vld [vmem:[#allocation17_spill] sm:$0xff] }
 0x172   :  { %v1206_v8 = vand.u32 4294901760, %v1205_v56  ;;  %v584_v55 = vsel %vm436_vm3, %v515_v52, %v423_v39  ;;  %v10281_v56 = vand.u32 4294901760, %v10280_v13 }
 0x173   :  { %10271 = vst [vmem:[#allocation9_spill] sm:$0xff] %v8136_v31  ;;  %v9920_v58 = vand.u32 4294901760, %v8136_v31  ;;  %7082 = vset.pattern.permute.xlu1 %v10216_v2  ;;  %v672_v26 = vpop.permute.xlu1 %671  ;;  %v1192_v36 = vand.u32 4294901760, %v1191_v29  ;;  %v1199_v46 = vand.u32 4294901760, %v1198_v7 }
 0x174   :  { %v744_v2 = vsel %vm597_vm4, %v672_v26, %v583_v24  ;;  %235 = vperm.xlu1 %7082, %v7680_v28  }
 0x175   :  { %v1212_v48 = vsub.f32 %v8136_v31, %v9920_v58  ;;  %v8164_v1 = vand.u32 4294901760, %v744_v2  ;;  %v6351_v40 = vpack.c.bf16 %v1199_v46, %v1192_v36 }
 0x177   :  { %10273 = vst [vmem:[#allocation10_spill] sm:$0xff] %v8164_v1  ;;  %v1213_v35 = vand.u32 4294901760, %v1212_v48  ;;  %v8171_v24 = vsub.f32 %v744_v2, %v8164_v1  ;;  %v676_v26 = vpop.permute.xlu1 %675  ;;  %6352 = vmatprep.subr.bf16.mxu0 %v6351_v40  ;;  %v8196_v2 = vsub.f32 %v10280_v13, %v10281_v56 }
 0x178   :  { %v745_v58 = vsel %vm597_vm4, %v676_v26, %v584_v55  ;;  %7083 = vset.pattern.permute.xlu1 %v10222_v61  ;;  %6354 = vmatpush3.bf16.msra.mxu0 %v6351_v40 }
 0x179   :  { %10274 = vst [vmem:[#allocation13_spill] sm:$0xff] %v8171_v24  ;;  %v6355_v29 = vpack.c.bf16 %v1213_v35, %v1206_v8  ;;  %v8176_v7 = vand.u32 4294901760, %v745_v58  ;;  %715 = vperm.xlu1 %7083, %v7089_v3   ;;  %v9922_v52 = vand.u32 4294901760, %v8171_v24  ;;  %v10277_v8 = vld [vmem:[#allocation16_spill] sm:$0xff]  ;;  %10282 = vst [vmem:[#allocation17_spill] sm:$0xff] %v8196_v2  ;;  %v9926_v26 = vand.u32 4294901760, %v8196_v2 }
 0x17a   :  { %v10278_v36 = vand.u32 4294901760, %v10277_v8 }
 0x17b   :  { %10275 = vst [vmem:[#allocation14_spill] sm:$0xff] %v8176_v7  ;;  %v8183_v39 = vsub.f32 %v745_v58, %v8176_v7  ;;  %v1022_v46 = vsub.f32 %v8171_v24, %v9922_v52  ;;  %6356 = vmatprep.subr.bf16.mxu0 %v6355_v29 }
 0x17c   :  { %v191_v35 = vpop.permute.xlu1 %190  ;;  %v8191_v55 = vsub.f32 %v10277_v8, %v10278_v36  ;;  %6358 = vmatpush3.bf16.msra.mxu0 %v6355_v29 }
 0x17d   :  { %10276 = vst [vmem:[#allocation28_spill] sm:$0xff] %v8183_v39  ;;  %7085 = vset.pattern.permute.xlu1 %v10218_v54  ;;  %v1023_v40 = vand.u32 4294901760, %v1022_v46  ;;  %v9921_v58 = vand.u32 4294901760, %v8183_v39  ;;  %v1226_v54 = vsub.f32 %v8196_v2, %v9926_v26  ;;  %v264_v29 = vsel %vm82_vm1, %v191_v35, %v7643_v43  ;;  %v10287_v35 = vld [vmem:[#allocation20_spill] sm:$0xff] }
 0x17e   :  { %10279 = vst [vmem:[#allocation16_spill] sm:$0xff] %v8191_v55  ;;  %397 = vperm.xlu1 %7085, %v7680_v28   ;;  %v9923_v48 = vand.u32 4294901760, %v8191_v55  ;;  %v10288_v24 = vand.u32 4294901760, %v10287_v35 }
 0x17f   :  { %5410 = vmatprep.mubr.f32.mxu0 %v1023_v40  ;;  %v1032_v3 = vsub.f32 %v8183_v39, %v9921_v58  ;;  %v1227_v40 = vand.u32 4294901760, %v1226_v54  ;;  %v10283_v58 = vld [vmem:[#allocation19_spill] sm:$0xff]  ;;  %v10286_v39 = vld [vmem:[#allocation29_spill] sm:$0xff] }
 0x180   :  { %v1219_v8 = vsub.f32 %v8191_v55, %v9923_v48  ;;  %v10284_v52 = vand.u32 4294901760, %v10283_v58 }
 0x181   :  { %v362_v46 = vpop.permute.xlu1 %361  ;;  %v1033_v36 = vand.u32 4294901760, %v1032_v3  ;;  %v8229_v3 = vsub.f32 %v10287_v35, %v10288_v24 }
 0x182   :  { %v425_v13 = vsel %vm275_vm2, %v362_v46, %v264_v29  ;;  %401 = vperm.xlu1 %7085, %v7560_v0   ;;  %v1220_v56 = vand.u32 4294901760, %v1219_v8  ;;  %v8221_v48 = vsub.f32 %v10283_v58, %v10284_v52  ;;  %v10290_v29 = vld [vmem:[#allocation35_spill] sm:$0xff]  ;;  %v186_v58 = vpop.permute.xlu0 %185 }
 0x183   :  { %v586_v26 = vsel %vm436_vm3, %v10286_v39, %v425_v13  ;;  %5411 = vmatmul.mubr.f32.gmra.mrb[18].mxu0 %v1033_v36  ;;  %10289 = vst [vmem:[#allocation29_spill] sm:$0xff] %v8229_v3  ;;  %v9931_v52 = vand.u32 4294901760, %v8229_v3 }
 0x184   :  { %10285 = vst [vmem:[#allocation19_spill] sm:$0xff] %v8221_v48  ;;  %v747_v8 = vsel %vm597_vm4, %v10290_v29, %v586_v26  ;;  %v6359_v54 = vpack.c.bf16 %v1227_v40, %v1220_v56  ;;  %v9932_v46 = vand.u32 4294901760, %v8221_v48  ;;  %v263_v26 = vsel %vm82_vm1, %v186_v58, %v7643_v43  ;;  %v10293_v40 = vld [vmem:[#allocation31_spill] sm:$0xff]  ;;  %v7090_v58 = vld [vmem:[%s9808_s1 + $0x60] sm:$0xff] }
 0x185   :  { %v8236_v10 = vand.u32 4294901760, %v747_v8  ;;  %v1240_v36 = vsub.f32 %v8229_v3, %v9931_v52  ;;  %v424_v35 = vsel %vm275_vm2, %v10293_v40, %v263_v26  ;;  %v10297_v26 = vld [vmem:[#allocation23_spill] sm:$0xff] }
 0x186   :  { %7086 = vset.pattern.permute.xlu1 %v10217_v59  ;;  %v519_v39 = vpop.permute.xlu1 %518  ;;  %6360 = vmatprep.subr.bf16.mxu0 %v6359_v54  ;;  %v1233_v24 = vsub.f32 %v8221_v48, %v9932_v46  ;;  %v10298_v40 = vand.u32 4294901760, %v10297_v26  ;;  %v7093_v26 = vld [vmem:[%s9808_s1 + $0x78] sm:$0xff] }
 0x187   :  { %10291 = vst [vmem:[#allocation20_spill] sm:$0xff] %v8236_v10  ;;  %562 = vperm.xlu1 %7086, %v7560_v0   ;;  %6362 = vmatpush3.bf16.msra.mxu0 %v6359_v54  ;;  %v1241_v56 = vand.u32 4294901760, %v1240_v36  ;;  %v8250_v59 = vsub.f32 %v747_v8, %v8236_v10  ;;  %v585_v29 = vsel %vm436_vm3, %v519_v39, %v424_v35  ;;  %v7091_v8 = vld [vmem:[%s9808_s1 + $0x68] sm:$0xff] }
 0x188   :  { %v1234_v13 = vand.u32 4294901760, %v1233_v24  ;;  %v10294_v24 = vld [vmem:[#allocation22_spill] sm:$0xff]  ;;  %v8270_v46 = vsub.f32 %v7091_v8, %v10298_v40 }
 0x189   :  { %10292 = vst [vmem:[#allocation35_spill] sm:$0xff] %v8250_v59  ;;  %v10295_v36 = vand.u32 4294901760, %v10294_v24  ;;  %v10304_v40 = vld [vmem:[#allocation26_spill] sm:$0xff]  ;;  %v10307_v38 = vand.u32 4294901760, %v8250_v59 }
 0x18a   :  { %v6363_v54 = vpack.c.bf16 %v1241_v56, %v1234_v13  ;;  %10299 = vst [vmem:[#allocation22_spill] sm:$0xff] %v8270_v46  ;;  %v9934_v56 = vand.u32 4294901760, %v8270_v46 }
 0x18b   :  { %7087 = vset.pattern.permute.xlu1 %v10222_v61  ;;  %v680_v0 = vpop.permute.xlu1 %679  ;;  %v8263_v52 = vsub.f32 %v7090_v58, %v10295_v36  ;;  %v1052_v57 = vsub.f32 %v8250_v59, %v10307_v38 }
 0x18c   :  { %v746_v61 = vsel %vm597_vm4, %v680_v0, %v585_v29  ;;  %719 = vperm.xlu1 %7087, %v7680_v28   ;;  %6364 = vmatprep.subr.bf16.mxu0 %v6363_v54  ;;  %v1254_v28 = vsub.f32 %v8270_v46, %v9934_v56  ;;  %v7092_v29 = vld [vmem:[%s9808_s1 + $0x70] sm:$0xff]  ;;  %v10301_v0 = vld [vmem:[#allocation25_spill] sm:$0xff] }
 0x18d   :  { %10296 = vst [vmem:[#allocation31_spill] sm:$0xff] %v8263_v52  ;;  %v8275_v39 = vand.u32 4294901760, %v746_v61  ;;  %v9933_v13 = vand.u32 4294901760, %v8263_v52  ;;  %6366 = vmatpush3.bf16.msra.mxu0 %v6363_v54  ;;  %v10302_v36 = vand.u32 4294901760, %v10301_v0  ;;  %v1053_v38 = vand.u32 4294901760, %v1052_v57 }
 0x18e   :  { %v1255_v51 = vand.u32 4294901760, %v1254_v28 }
 0x18f   :  { %10300 = vst [vmem:[#allocation23_spill] sm:$0xff] %v8275_v39  ;;  %v8281_v58 = vsub.f32 %v746_v61, %v8275_v39  ;;  %v1247_v24 = vsub.f32 %v8263_v52, %v9933_v13  ;;  %v8294_v8 = vsub.f32 %v7092_v29, %v10302_v36  ;;  %v10305_v61 = vand.u32 4294901760, %v10304_v40 }
 0x190   :  { %v196_v54 = vpop.permute.xlu1 %195 }
 0x191   :  { %10303 = vst [vmem:[#allocation25_spill] sm:$0xff] %v8294_v8  ;;  %v8301_v13 = vsub.f32 %v7093_v26, %v10305_v61  ;;  %v9947_v35 = vand.u32 4294901760, %v8281_v58  ;;  %v1248_v56 = vand.u32 4294901760, %v1247_v24  ;;  %v9949_v29 = vand.u32 4294901760, %v8294_v8 }
 0x193   :  { %10306 = vst [vmem:[#allocation26_spill] sm:$0xff] %v8301_v13  ;;  %v9948_v0 = vand.u32 4294901760, %v8301_v13  ;;  %v1042_v36 = vsub.f32 %v8281_v58, %v9947_v35  ;;  %v6367_v32 = vpack.c.bf16 %v1255_v51, %v1248_v56  ;;  %v1261_v26 = vsub.f32 %v8294_v8, %v9949_v29 }
 0x194   :  { %v201_v40 = vpop.permute.xlu1 %200  ;;  %v8320_v51 = vpack.c.bf16 %v8058_v62, %v8053_v45  ;;  %v265_v56 = vsel %vm82_vm1, %v196_v54, %v7643_v43 }
 0x195   :  { %v1268_v24 = vsub.f32 %v8301_v13, %v9948_v0  ;;  %v1043_v28 = vand.u32 4294901760, %v1042_v36  ;;  %6368 = vmatprep.subr.bf16.mxu0 %v6367_v32  ;;  %v1262_v61 = vand.u32 4294901760, %v1261_v26  ;;  %v10308_v36 = vld [vmem:[#allocation36_spill] sm:$0xff] }
 0x196   :  { %6370 = vmatpush3.bf16.msra.mxu0 %v6367_v32 }
 0x197   :  { %v1269_v59 = vand.u32 4294901760, %v1268_v24  ;;  %5413 = vmatprep.mubr.f32.mxu0 %v1043_v28 }
 0x198   :  { %5414 = vmatmul.mubr.f32.gmra.mrb[20].mxu0 %v1053_v38 }
 0x199   :  { %v6371_v15 = vpack.c.bf16 %v1269_v59, %v1262_v61  ;;  %v366_v35 = vpop.permute.xlu1 %365 }
 0x19a   :  { %v426_v32 = vsel %vm275_vm2, %v366_v35, %v265_v56  ;;  %v266_v56 = vsel %vm82_vm1, %v201_v40, %v7643_v43 }
 0x19b   :  { %6372 = vmatprep.subr.bf16.mxu0 %v6371_v15 }
 0x19c   :  { %6374 = vmatpush3.bf16.msra.mxu0 %v6371_v15  ;;  %v8337_v15 = vpack.c.bf16 %v8091_v42, %v8086_v47 }
 0x19d   :  { %6376 = vmatprep.subr.bf16.mxu0 %v8320_v51 }
 0x19e   :  { %v527_v57 = vpop.permute.xlu1 %526 }
 0x19f   :  { %v587_v59 = vsel %vm436_vm3, %v527_v57, %v426_v32  ;;  %v8351_v57 = vpack.c.bf16 %v8124_v5, %v8119_v30  ;;  %v8367_v5 = vpack.c.bf16 %v8136_v31, %v8129_v22 }
 0x1a0   :  { %v748_v26 = vsel %vm597_vm4, %v10308_v36, %v587_v59  ;;  %v10310_v59 = vld [vmem:[#allocation32_spill] sm:$0xff] }
 0x1a1   :  { %v8333_v24 = vand.u32 4294901760, %v748_v26  ;;  %v427_v36 = vsel %vm275_vm2, %v10310_v59, %v266_v56 }
 0x1a2   :  { %v531_v28 = vpop.permute.xlu1 %530 }
 0x1a3   :  { %10309 = vst [vmem:[#allocation36_spill] sm:$0xff] %v8333_v24  ;;  %v8340_v54 = vsub.f32 %v748_v26, %v8333_v24  ;;  %v211_v26 = vpop.permute.xlu0 %210  ;;  %v588_v0 = vsel %vm436_vm3, %v531_v28, %v427_v36 }
 0x1a5   :  { %v9950_v35 = vand.u32 4294901760, %v8340_v54 }
 0x1a7   :  { %v206_v38 = vpop.permute.xlu1 %205  ;;  %v1062_v61 = vsub.f32 %v8340_v54, %v9950_v35  ;;  %v216_v56 = vpop.permute.xlu0 %215 }
 0x1a8   :  { %v267_v31 = vsel %vm82_vm1, %v206_v38, %v7643_v43  ;;  %v8395_v38 = vpack.c.bf16 %v8229_v3, %v8221_v48 }
 0x1a9   :  { %v1063_v32 = vand.u32 4294901760, %v1062_v61 }
 0x1ab   :  { %5416 = vmatprep.mubr.f32.mxu0 %v1063_v32  ;;  %v8373_v36 = vpop.permute.xlu0 %240 }
 0x1ac   :  { %v692_v29 = vpop.permute.xlu1 %691 }
 0x1ad   :  { %v749_v35 = vsel %vm597_vm4, %v692_v29, %v588_v0  ;;  %v8377_v0 = vpack.c.bf16 %v8196_v2, %v8191_v55 }
 0x1ae   :  { %v8360_v42 = vand.u32 4294901760, %v749_v35 }
 0x1af   :  { %v535_v30 = vpop.permute.xlu0 %534 }
 0x1b0   :  { %10311 = vst [vmem:[#allocation32_spill] sm:$0xff] %v8360_v42  ;;  %v8363_v40 = vsub.f32 %v749_v35, %v8360_v42 }
 0x1b1   :  { %v374_v61 = vpop.permute.xlu1 %373 }
 0x1b2   :  { %10312 = vst [vmem:[#allocation55_spill] sm:$0xff] %v8363_v40  ;;  %v9956_v32 = vand.u32 4294901760, %v8363_v40  ;;  %v428_v22 = vsel %vm275_vm2, %v374_v61, %v267_v31 }
 0x1b4   :  { %v1072_v28 = vsub.f32 %v8363_v40, %v9956_v32  ;;  %v268_v32 = vsel %vm82_vm1, %v211_v26, %v7643_v43 }
 0x1b5   :  { %v378_v59 = vpop.permute.xlu1 %377 }
 0x1b6   :  { %v1073_v29 = vand.u32 4294901760, %v1072_v28  ;;  %v589_v28 = vsel %vm436_vm3, %v535_v30, %v428_v22  ;;  %v429_v31 = vsel %vm275_vm2, %v378_v59, %v268_v32 }
 0x1b8   :  { %5417 = vmatmul.mubr.f32.gmra.mrb[22].mxu0 %v1073_v29 }
 0x1ba   :  { %v539_v35 = vpop.permute.xlu1 %538 }
 0x1bb   :  { %v590_v61 = vsel %vm436_vm3, %v539_v35, %v429_v31  ;;  %v8418_v31 = vpack.c.bf16 %v8270_v46, %v8263_v52  ;;  %v10317_v46 = vld [vmem:[#allocation37_spill] sm:$0xff] }
 0x1bf   :  { %v696_v29 = vpop.permute.xlu1 %695 }
 0x1c0   :  { %v750_v2 = vsel %vm597_vm4, %v696_v29, %v589_v28 }
 0x1c1   :  { %v8391_v55 = vand.u32 4294901760, %v750_v2 }
 0x1c3   :  { %10313 = vst [vmem:[#allocation56_spill] sm:$0xff] %v8391_v55  ;;  %v8402_v26 = vsub.f32 %v750_v2, %v8391_v55  ;;  %v700_v30 = vpop.permute.xlu1 %699 }
 0x1c4   :  { %v751_v22 = vsel %vm597_vm4, %v700_v30, %v590_v61  ;;  %v547_v30 = vpop.permute.xlu0 %546 }
 0x1c5   :  { %10314 = vst [vmem:[#allocation57_spill] sm:$0xff] %v8402_v26  ;;  %v8406_v28 = vand.u32 4294901760, %v751_v22  ;;  %v9961_v29 = vand.u32 4294901760, %v8402_v26 }
 0x1c7   :  { %10315 = vst [vmem:[#allocation58_spill] sm:$0xff] %v8406_v28  ;;  %v8410_v3 = vsub.f32 %v751_v22, %v8406_v28  ;;  %v1082_v32 = vsub.f32 %v8402_v26, %v9961_v29 }
 0x1c8   :  { %v221_v59 = vpop.permute.xlu1 %220 }
 0x1c9   :  { %10316 = vst [vmem:[#allocation59_spill] sm:$0xff] %v8410_v3  ;;  %v1083_v35 = vand.u32 4294901760, %v1082_v32  ;;  %v9964_v2 = vand.u32 4294901760, %v8410_v3  ;;  %v270_v22 = vsel %vm82_vm1, %v221_v59, %v7643_v43 }
 0x1cb   :  { %5419 = vmatprep.mubr.f32.mxu0 %v1083_v35  ;;  %v1092_v61 = vsub.f32 %v8410_v3, %v9964_v2  ;;  %v8435_v2 = vpack.c.bf16 %v8301_v13, %v8294_v8 }
 0x1cd   :  { %v386_v48 = vpop.permute.xlu1 %385  ;;  %v1093_v29 = vand.u32 4294901760, %v1092_v61  ;;  %v269_v61 = vsel %vm82_vm1, %v216_v56, %v7643_v43 }
 0x1ce   :  { %v431_v32 = vsel %vm275_vm2, %v386_v48, %v270_v22 }
 0x1cf   :  { %v592_v47 = vsel %vm436_vm3, %v547_v30, %v431_v32  ;;  %5420 = vmatmul.mubr.f32.gmra.mrb[24].mxu0 %v1093_v29  ;;  %v10320_v30 = vld [vmem:[#allocation33_spill] sm:$0xff] }
 0x1d0   :  { %v753_v35 = vsel %vm597_vm4, %v10317_v46, %v592_v47  ;;  %v430_v29 = vsel %vm275_vm2, %v10320_v30, %v269_v61 }
 0x1d1   :  { %v8437_v52 = vand.u32 4294901760, %v753_v35 }
 0x1d2   :  { %v543_v59 = vpop.permute.xlu1 %542 }
 0x1d3   :  { %10318 = vst [vmem:[#allocation37_spill] sm:$0xff] %v8437_v52  ;;  %v8443_v48 = vsub.f32 %v753_v35, %v8437_v52  ;;  %v591_v47 = vsel %vm436_vm3, %v543_v59, %v430_v29 }
 0x1d5   :  { %10319 = vst [vmem:[#allocation60_spill] sm:$0xff] %v8443_v48  ;;  %v9972_v13 = vand.u32 4294901760, %v8443_v48 }
 0x1d7   :  { %v704_v46 = vpop.permute.xlu1 %703  ;;  %v1112_v61 = vsub.f32 %v8443_v48, %v9972_v13  ;;  %v10323_v48 = vld [vmem:[#allocation38_spill] sm:$0xff] }
 0x1d8   :  { %v752_v22 = vsel %vm597_vm4, %v704_v46, %v591_v47 }
 0x1d9   :  { %v8452_v32 = vand.u32 4294901760, %v752_v22  ;;  %v1113_v47 = vand.u32 4294901760, %v1112_v61 }
 0x1db   :  { %10321 = vst [vmem:[#allocation33_spill] sm:$0xff] %v8452_v32  ;;  %v8456_v56 = vsub.f32 %v752_v22, %v8452_v32 }
 0x1dc   :  { %v226_v35 = vpop.permute.xlu1 %225 }
 0x1dd   :  { %10322 = vst [vmem:[#allocation61_spill] sm:$0xff] %v8456_v56  ;;  %v9975_v8 = vand.u32 4294901760, %v8456_v56  ;;  %v271_v22 = vsel %vm82_vm1, %v226_v35, %v7643_v43 }
 0x1df   :  { %v1102_v59 = vsub.f32 %v8456_v56, %v9975_v8 }
 0x1e0   :  { %v231_v30 = vpop.permute.xlu1 %230 }
 0x1e1   :  { %v1103_v29 = vand.u32 4294901760, %v1102_v59 }
 0x1e3   :  { %5422 = vmatprep.mubr.f32.mxu0 %v1103_v29 }
 0x1e4   :  { %5423 = vmatmul.mubr.f32.gmra.mrb[26].mxu0 %v1113_v47 }
 0x1e5   :  { %v390_v46 = vpop.permute.xlu1 %389 }
 0x1e6   :  { %v432_v3 = vsel %vm275_vm2, %v390_v46, %v271_v22  ;;  %v10326_v22 = vld [vmem:[#allocation34_spill] sm:$0xff] }
 0x1ea   :  { %v551_v26 = vpop.permute.xlu1 %550 }
 0x1eb   :  { %v593_v13 = vsel %vm436_vm3, %v551_v26, %v432_v3  ;;  %v272_v3 = vsel %vm82_vm1, %v231_v30, %v7643_v43 }
 0x1ec   :  { %v754_v8 = vsel %vm597_vm4, %v10323_v48, %v593_v13  ;;  %v433_v13 = vsel %vm275_vm2, %v10326_v22, %v272_v3  ;;  %v559_v3 = vpop.permute.xlu0 %558 }
 0x1ed   :  { %v8475_v59 = vand.u32 4294901760, %v754_v8 }
 0x1ee   :  { %v555_v61 = vpop.permute.xlu1 %554 }
 0x1ef   :  { %10324 = vst [vmem:[#allocation38_spill] sm:$0xff] %v8475_v59  ;;  %v8478_v29 = vsub.f32 %v754_v8, %v8475_v59  ;;  %v594_v8 = vsel %vm436_vm3, %v555_v61, %v433_v13  ;;  %v274_v61 = vsel %vm82_vm1, %v8373_v36, %v7643_v43 }
 0x1f0   :  { %v724_v13 = vpop.permute.xlu0 %723 }
 0x1f1   :  { %10325 = vst [vmem:[#allocation62_spill] sm:$0xff] %v8478_v29  ;;  %v9980_v47 = vand.u32 4294901760, %v8478_v29 }
 0x1f3   :  { %v236_v35 = vpop.permute.xlu1 %235  ;;  %v1122_v46 = vsub.f32 %v8478_v29, %v9980_v47 }
 0x1f5   :  { %v1123_v26 = vand.u32 4294901760, %v1122_v46 }
 0x1f7   :  { %5425 = vmatprep.mubr.f32.mxu0 %v1123_v26 }
 0x1f8   :  { %v716_v48 = vpop.permute.xlu1 %715 }
 0x1f9   :  { %v755_v56 = vsel %vm597_vm4, %v716_v48, %v594_v8  ;;  %v273_v48 = vsel %vm82_vm1, %v236_v35, %v7643_v43 }
 0x1fa   :  { %v8494_v40 = vand.u32 4294901760, %v755_v56 }
 0x1fc   :  { %10327 = vst [vmem:[#allocation34_spill] sm:$0xff] %v8494_v40  ;;  %v8497_v47 = vsub.f32 %v755_v56, %v8494_v40 }
 0x1fd   :  { %v398_v29 = vpop.permute.xlu1 %397 }
 0x1fe   :  { %10328 = vst [vmem:[#allocation63_spill] sm:$0xff] %v8497_v47  ;;  %v9983_v30 = vand.u32 4294901760, %v8497_v47 }
 0x200   :  { %v1132_v46 = vsub.f32 %v8497_v47, %v9983_v30 }
 0x201   :  { %v402_v26 = vpop.permute.xlu1 %401 }
 0x202   :  { %v1133_v22 = vand.u32 4294901760, %v1132_v46  ;;  %v435_v56 = vsel %vm275_vm2, %v402_v26, %v274_v61  ;;  %v434_v46 = vsel %vm275_vm2, %v398_v29, %v273_v48  ;;  %v10339_v48 = vld [vmem:[#allocation41_spill] sm:$0xff] }
 0x203   :  { %v595_v36 = vsel %vm436_vm3, %v559_v3, %v434_v46  ;;  %v10340_v46 = vld [vmem:[#allocation42_spill] sm:$0xff] }
 0x204   :  { %5426 = vmatmul.mubr.f32.gmra.mrb[28].mxu0 %v1133_v22 }
 0x206   :  { %v563_v8 = vpop.permute.xlu1 %562 }
 0x207   :  { %v596_v30 = vsel %vm436_vm3, %v563_v8, %v435_v56 }
 0x208   :  { %v757_v22 = vsel %vm597_vm4, %v724_v13, %v596_v30 }
 0x209   :  { %v8518_v47 = vand.u32 4294901760, %v757_v22 }
 0x20b   :  { %10329 = vst [vmem:[#allocation64_spill] sm:$0xff] %v8518_v47  ;;  %v8523_v26 = vsub.f32 %v757_v22, %v8518_v47  ;;  %v720_v61 = vpop.permute.xlu1 %719  ;;  %v10341_v22 = vld [vmem:[#allocation21_spill] sm:$0xff] }
 0x20c   :  { %v756_v43 = vsel %vm597_vm4, %v720_v61, %v595_v36  ;;  %v10342_v36 = vld [vmem:[#allocation44_spill] sm:$0xff]  ;;  %v10343_v61 = vld [vmem:[#allocation46_spill] sm:$0xff] }
 0x20d   :  { %v8527_v35 = vand.u32 4294901760, %v756_v43  ;;  %v9986_v56 = vand.u32 4294901760, %v8523_v26 }
 0x20f   :  { %10330 = vst [vmem:[#allocation65_spill] sm:$0xff] %v8527_v35  ;;  %v8531_v29 = vsub.f32 %v756_v43, %v8527_v35  ;;  %v1152_v3 = vsub.f32 %v8523_v26, %v9986_v56  ;;  %v10344_v43 = vld [vmem:[#allocation24_spill] sm:$0xff]  ;;  %v10349_v56 = vand.u32 4294901760, %v8058_v62  ;;  %v10357_v62 = vld [vmem:[#allocation57_spill] sm:$0xff] }
 0x211   :  { %v9987_v30 = vand.u32 4294901760, %v8531_v29  ;;  %v1153_v34 = vand.u32 4294901760, %v1152_v3  ;;  %v10345_v3 = vld [vmem:[#allocation48_spill] sm:$0xff] }
 0x213   :  { %v1142_v13 = vsub.f32 %v8531_v29, %v9987_v30 }
 0x215   :  { %v1143_v8 = vand.u32 4294901760, %v1142_v13  ;;  %v10346_v13 = vld [vmem:[#allocation52_spill] sm:$0xff] }
 0x217   :  { %5428 = vmatprep.mubr.f32.mxu0 %v1143_v8  ;;  %v10347_v8 = vld [vmem:[#allocation27_spill] sm:$0xff] }
 0x218   :  { %5429 = vmatmul.mubr.f32.gmra.mrb[30].mxu0 %v1153_v34  ;;  %v10348_v34 = vand.u32 4294901760, %v8053_v45  ;;  %v10356_v45 = vld [vmem:[#allocation55_spill] sm:$0xff] }
 0x219   :  { %5463 = vmatprep.mubr.f32.mxu0 %v7726_v18 }
 0x21a   :  { %v6439_v30 = vpack.c.bf16 %v10349_v56, %v10348_v34  ;;  %v10358_v56 = vld [vmem:[#allocation59_spill] sm:$0xff]  ;;  %v10359_v34 = vld [vmem:[#allocation61_spill] sm:$0xff] }
 0x21c   :  { %5464 = vmatmul.mubr.f32.vlgmr.msra.gmra.mrb[0].mxu0 %v7763_v33 }
 0x21d   :  { %6378 = vmatpush3.bf16.msra.mxu0 %v8320_v51  ;;  %5466 = vmatprep.mubr.f32.mxu0 %v7797_v14  ;;  %v10332_v51 = vld [vmem:[#allocation8_spill] sm:$0xff] }
 0x21e   :  { %6380 = vmatprep.subr.bf16.mxu0 %v8337_v15 }
 0x220   :  { %5467 = vmatmul.mubr.f32.gmra.mrb[2].mxu0 %v7714_v44 }
 0x221   :  { %5469 = vmatprep.mubr.f32.mxu0 %v7729_v4  ;;  %6382 = vmatpush3.bf16.msra.mxu0 %v8337_v15  ;;  %v10333_v15 = vld [vmem:[#allocation12_spill] sm:$0xff] }
 0x222   :  { %6384 = vmatprep.subr.bf16.mxu0 %v8351_v57 }
 0x224   :  { %5470 = vmatmul.mubr.f32.gmra.mrb[4].mxu0 %v7747_v11 }
 0x225   :  { %5472 = vmatprep.mubr.f32.mxu0 %v7773_v41  ;;  %6386 = vmatpush3.bf16.msra.mxu0 %v8351_v57  ;;  %v10334_v57 = vld [vmem:[#allocation39_spill] sm:$0xff] }
 0x226   :  { %6388 = vmatprep.subr.bf16.mxu0 %v8367_v5 }
 0x228   :  { %5473 = vmatmul.mubr.f32.gmra.mrb[6].mxu0 %v7834_v49 }
 0x229   :  { %5475 = vmatprep.mubr.f32.mxu0 %v7870_v12  ;;  %6390 = vmatpush3.bf16.msra.mxu0 %v8367_v5  ;;  %v10331_v5 = vld [vmem:[#allocation5_spill] sm:$0xff] }
 0x22a   :  { %6392 = vmatprep.subr.bf16.mxu0 %v8377_v0 }
 0x22c   :  { %5476 = vmatmul.mubr.f32.gmra.mrb[8].mxu0 %v7840_v27 }
 0x22d   :  { %5478 = vmatprep.mubr.f32.mxu0 %v7872_v9  ;;  %6394 = vmatpush3.bf16.msra.mxu0 %v8377_v0  ;;  %v10335_v0 = vld [vmem:[#allocation15_spill] sm:$0xff] }
 0x22e   :  { %6396 = vmatprep.subr.bf16.mxu0 %v8395_v38 }
 0x230   :  { %5479 = vmatmul.mubr.f32.gmra.mrb[10].mxu0 %v7921_v23 }
 0x231   :  { %5481 = vmatprep.mubr.f32.mxu0 %v7950_v16  ;;  %6398 = vmatpush3.bf16.msra.mxu0 %v8395_v38  ;;  %v10336_v38 = vld [vmem:[#allocation40_spill] sm:$0xff] }
 0x232   :  { %6400 = vmatprep.subr.bf16.mxu0 %v8418_v31 }
 0x234   :  { %5482 = vmatmul.mubr.f32.gmra.mrb[12].mxu0 %v7962_v50  ;;  %v10372_v50 = vld [vmem:[#allocation6_spill] sm:$0xff] }
 0x235   :  { %5484 = vmatprep.mubr.f32.mxu0 %v8009_v25  ;;  %6402 = vmatpush3.bf16.msra.mxu0 %v8418_v31  ;;  %v10338_v31 = vld [vmem:[#allocation18_spill] sm:$0xff] }
 0x236   :  { %6404 = vmatprep.subr.bf16.mxu0 %v8435_v2 }
 0x238   :  { %5485 = vmatmul.mubr.f32.gmra.mrb[14].mxu0 %v7993_v21  ;;  %v10369_v21 = vand.u32 4294901760, %v7822_v63 }
 0x239   :  { %5487 = vmatprep.mubr.f32.mxu0 %v8039_v37  ;;  %6406 = vmatpush3.bf16.msra.mxu0 %v8435_v2  ;;  %v10337_v2 = vld [vmem:[#allocation43_spill] sm:$0xff]  ;;  %v10368_v37 = vand.u32 4294901760, %v7785_v60 }
 0x23a   :  { %6408 = vmatprep.subr.bf16.mxu0 %v10331_v5 }
 0x23c   :  { %5488 = vmatmul.mubr.f32.gmra.mrb[16].mxu0 %v8081_v20 }
 0x23d   :  { %5490 = vmatprep.mubr.f32.mxu0 %v8164_v1 }
 0x240   :  { %5491 = vmatmul.mubr.f32.gmra.mrb[18].mxu0 %v8176_v7  ;;  %v10366_v7 = vld [vmem:[#allocation11_spill] sm:$0xff] }
 0x241   :  { %5493 = vmatprep.mubr.f32.mxu0 %v8275_v39  ;;  %v10367_v1 = vand.u32 4294901760, %v10366_v7 }
 0x244   :  { %5494 = vmatmul.mubr.f32.gmra.mrb[20].mxu0 %v8236_v10  ;;  %v10364_v10 = vld [vmem:[#allocation4_spill] sm:$0xff] }
 0x245   :  { %5496 = vmatprep.mubr.f32.mxu0 %v8333_v24  ;;  %v10363_v24 = vand.u32 4294901760, %v7745_v17  ;;  %v10365_v39 = vand.u32 4294901760, %v10364_v10  ;;  %v10375_v10 = vand.u32 4294901760, %v7771_v53 }
 0x247   :  { %v6443_v20 = vpack.c.bf16 %v10367_v1, %v10365_v39  ;;  %v10378_v1 = vld [vmem:[#allocation9_spill] sm:$0xff]  ;;  %v10381_v39 = vand.u32 4294901760, %v10334_v57 }
 0x248   :  { %5497 = vmatmul.mubr.f32.gmra.mrb[22].mxu0 %v8360_v42  ;;  %v10362_v42 = vld [vmem:[#allocation63_spill] sm:$0xff]  ;;  %v10379_v7 = vand.u32 4294901760, %v10378_v1 }
 0x249   :  { %5499 = vmatprep.mubr.f32.mxu0 %v8391_v55  ;;  %v10361_v55 = vld [vmem:[#allocation62_spill] sm:$0xff] }
 0x24c   :  { %5500 = vmatmul.mubr.f32.gmra.mrb[24].mxu0 %v8406_v28  ;;  %v10360_v28 = vld [vmem:[#allocation60_spill] sm:$0xff] }
 0x24d   :  { %5502 = vmatprep.mubr.f32.mxu0 %v8452_v32  ;;  %v10355_v32 = vld [vmem:[#allocation35_spill] sm:$0xff] }
 0x250   :  { %5503 = vmatmul.mubr.f32.gmra.mrb[26].mxu0 %v8437_v52  ;;  %v10354_v52 = vld [vmem:[#allocation28_spill] sm:$0xff] }
 0x251   :  { %5505 = vmatprep.mubr.f32.mxu0 %v8475_v59  ;;  %v10353_v59 = vld [vmem:[#allocation13_spill] sm:$0xff] }
 0x254   :  { %5506 = vmatmul.mubr.f32.gmra.mrb[28].mxu0 %v8494_v40  ;;  %v10352_v40 = vld [vmem:[#allocation30_spill] sm:$0xff] }
 0x255   :  { %5508 = vmatprep.mubr.f32.mxu0 %v8527_v35  ;;  %v10351_v35 = vld [vmem:[#allocation54_spill] sm:$0xff] }
 0x258   :  { %5509 = vmatmul.mubr.f32.gmra.mrb[30].mxu0 %v8518_v47  ;;  %v10350_v47 = vld [vmem:[#allocation50_spill] sm:$0xff] }
 0x259   :  { %5543 = vmatprep.mubr.f32.mxu0 %v7745_v17  ;;  %v10374_v17 = vand.u32 4294901760, %v7750_v6 }
 0x25c   :  { %5544 = vmatmul.mubr.f32.vlgmr.msra.gmra.mrb[0].mxu0 %v7785_v60  ;;  %v10376_v60 = vld [vmem:[#allocation7_spill] sm:$0xff] }
 0x25d   :  { %6410 = vmatpush3.bf16.msra.mxu0 %v10331_v5  ;;  %5546 = vmatprep.mubr.f32.mxu0 %v7822_v63 }
 0x25e   :  { %6412 = vmatprep.subr.bf16.mxu0 %v10332_v51 }
 0x260   :  { %5547 = vmatmul.mubr.f32.gmra.mrb[2].mxu0 %v7750_v6  ;;  %v10382_v6 = vld [vmem:[#allocation16_spill] sm:$0xff] }
 0x261   :  { %5549 = vmatprep.mubr.f32.mxu0 %v7771_v53  ;;  %6414 = vmatpush3.bf16.msra.mxu0 %v10332_v51 }
 0x262   :  { %6416 = vmatprep.subr.bf16.mxu0 %v10333_v15 }
 0x264   :  { %5550 = vmatmul.mubr.f32.gmra.mrb[4].mxu0 %v7788_v19 }
 0x265   :  { %5552 = vmatprep.mubr.f32.mxu0 %v10334_v57  ;;  %6418 = vmatpush3.bf16.msra.mxu0 %v10333_v15 }
 0x266   :  { %6420 = vmatprep.subr.bf16.mxu0 %v10335_v0 }
 0x268   :  { %5553 = vmatmul.mubr.f32.gmra.mrb[6].mxu0 %v10336_v38 }
 0x269   :  { %5555 = vmatprep.mubr.f32.mxu0 %v10337_v2  ;;  %6422 = vmatpush3.bf16.msra.mxu0 %v10335_v0 }
 0x26a   :  { %6424 = vmatprep.subr.bf16.mxu0 %v10338_v31 }
 0x26c   :  { %5556 = vmatmul.mubr.f32.gmra.mrb[8].mxu0 %v10339_v48 }
 0x26d   :  { %5558 = vmatprep.mubr.f32.mxu0 %v10340_v46  ;;  %6426 = vmatpush3.bf16.msra.mxu0 %v10338_v31 }
 0x26e   :  { %6428 = vmatprep.subr.bf16.mxu0 %v10341_v22 }
 0x270   :  { %5559 = vmatmul.mubr.f32.gmra.mrb[10].mxu0 %v10342_v36 }
 0x271   :  { %5561 = vmatprep.mubr.f32.mxu0 %v10343_v61  ;;  %6430 = vmatpush3.bf16.msra.mxu0 %v10341_v22 }
 0x272   :  { %6432 = vmatprep.subr.bf16.mxu0 %v10344_v43 }
 0x274   :  { %5562 = vmatmul.mubr.f32.gmra.mrb[12].mxu0 %v10345_v3 }
 0x275   :  { %5564 = vmatprep.mubr.f32.mxu0 %v10346_v13  ;;  %6434 = vmatpush3.bf16.msra.mxu0 %v10344_v43  ;;  %v10373_v43 = vand.u32 4294901760, %v10372_v50  ;;  %v10383_v50 = vand.u32 4294901760, %v10382_v6 }
 0x276   :  { %6436 = vmatprep.subr.bf16.mxu0 %v10347_v8 }
 0x278   :  { %5565 = vmatmul.mubr.f32.gmra.mrb[14].mxu0 %v10350_v47 }
 0x279   :  { %5567 = vmatprep.mubr.f32.mxu0 %v10351_v35  ;;  %6438 = vmatpush3.bf16.msra.mxu0 %v10347_v8  ;;  %v10370_v8 = vld [vmem:[#allocation2_spill] sm:$0xff] }
 0x27a   :  { %6440 = vmatprep.subr.bf16.mxu0 %v6439_v30  ;;  %v10371_v25 = vand.u32 4294901760, %v10370_v8  ;;  %v10390_v8 = vld [vmem:[#allocation29_spill] sm:$0xff] }
 0x27b   :  { %v10391_v57 = vand.u32 4294901760, %v10390_v8 }
 0x27c   :  { %5568 = vmatmul.mubr.f32.gmra.mrb[16].mxu0 %v10352_v40  ;;  %v6447_v16 = vpack.c.bf16 %v10373_v43, %v10371_v25  ;;  %v10384_v25 = vld [vmem:[#allocation17_spill] sm:$0xff] }
 0x27d   :  { %5570 = vmatprep.mubr.f32.mxu0 %v10353_v59  ;;  %v10385_v53 = vand.u32 4294901760, %v10384_v25  ;;  %v10405_v25 = vand.u32 4294901760, %v10346_v13  ;;  %v10410_v13 = vand.u32 4294901760, %v10354_v52 }
 0x280   :  { %5571 = vmatmul.mubr.f32.gmra.mrb[18].mxu0 %v10354_v52  ;;  %v10417_v52 = vand.u32 4294901760, %v10359_v34 }
 0x281   :  { %5573 = vmatprep.mubr.f32.mxu0 %v8281_v58 }
 0x284   :  { %5574 = vmatmul.mubr.f32.gmra.mrb[20].mxu0 %v10355_v32 }
 0x285   :  { %5576 = vmatprep.mubr.f32.mxu0 %v8340_v54 }
 0x288   :  { %5577 = vmatmul.mubr.f32.gmra.mrb[22].mxu0 %v10356_v45 }
 0x289   :  { %5579 = vmatprep.mubr.f32.mxu0 %v10357_v62 }
 0x28c   :  { %5580 = vmatmul.mubr.f32.gmra.mrb[24].mxu0 %v10358_v56 }
 0x28d   :  { %5582 = vmatprep.mubr.f32.mxu0 %v10359_v34 }
 0x290   :  { %5583 = vmatmul.mubr.f32.gmra.mrb[26].mxu0 %v10360_v28 }
 0x291   :  { %5585 = vmatprep.mubr.f32.mxu0 %v10361_v55 }
 0x294   :  { %5586 = vmatmul.mubr.f32.gmra.mrb[28].mxu0 %v10362_v42 }
 0x295   :  { %5588 = vmatprep.mubr.f32.mxu0 %v8531_v29 }
 0x298   :  { %5589 = vmatmul.mubr.f32.gmra.mrb[30].mxu0 %v8523_v26 }
 0x299   :  { %5623 = vmatprep.mubr.f32.mxu0 %v10363_v24  ;;  %v6455_v24 = vpack.c.bf16 %v10385_v53, %v10383_v50  ;;  %v10404_v50 = vand.u32 4294901760, %v10345_v3  ;;  %v10408_v53 = vand.u32 4294901760, %v10352_v40  ;;  %v10409_v3 = vand.u32 4294901760, %v10353_v59 }
 0x29a   :  { %v10415_v40 = vand.u32 4294901760, %v10357_v62  ;;  %v10416_v59 = vand.u32 4294901760, %v10358_v56  ;;  %v10422_v62 = vand.u32 4294901760, %v8523_v26  ;;  %v8736_v56 = vld [vmem:[%s9809_s2] sm:$0xff] }
 0x29c   :  { %5624 = vmatmul.mubr.f32.vlgmr.msra.gmra.mrb[0].mxu0 %v10368_v37  ;;  %v10377_v37 = vand.u32 4294901760, %v10376_v60 }
 0x29d   :  { %6442 = vmatpush3.bf16.msra.mxu0 %v6439_v30  ;;  %5626 = vmatprep.mubr.f32.mxu0 %v10369_v21  ;;  %v10380_v21 = vand.u32 4294901760, %v7788_v19  ;;  %v10387_v30 = vand.u32 4294901760, %v10337_v2  ;;  %v10388_v19 = vld [vmem:[#allocation19_spill] sm:$0xff] }
 0x29e   :  { %6444 = vmatprep.subr.bf16.mxu0 %v6443_v20  ;;  %v6451_v63 = vpack.c.bf16 %v10379_v7, %v10377_v37  ;;  %v10389_v43 = vand.u32 4294901760, %v10388_v19  ;;  %v10396_v37 = vld [vmem:[#allocation22_spill] sm:$0xff]  ;;  %v10398_v7 = vand.u32 4294901760, %v10342_v36  ;;  %v10406_v36 = vand.u32 4294901760, %v10350_v47  ;;  %v8764_v19 = vld [vmem:[%s9809_s2 + $0x28] sm:$0xff] }
 0x29f   :  { %v10397_v2 = vand.u32 4294901760, %v10396_v37  ;;  %v10412_v47 = vand.u32 4294901760, %v10355_v32  ;;  %v10419_v32 = vand.u32 4294901760, %v10361_v55  ;;  %v8741_v55 = vld [vmem:[%s9809_s2 + $0x8] sm:$0xff] }
 0x2a0   :  { %5627 = vmatmul.mubr.f32.gmra.mrb[2].mxu0 %v10374_v17  ;;  %v6459_v17 = vpack.c.bf16 %v10391_v57, %v10389_v43  ;;  %v2768_v26 = vand.u32 4294901760, %v8741_v55 }
 0x2a1   :  { %5629 = vmatprep.mubr.f32.mxu0 %v10375_v10  ;;  %6446 = vmatpush3.bf16.msra.mxu0 %v6443_v20  ;;  %v10386_v20 = vand.u32 4294901760, %v10336_v38  ;;  %v10393_v10 = vand.u32 4294901760, %v10340_v46  ;;  %v10394_v38 = vld [vmem:[#allocation31_spill] sm:$0xff] }
 0x2a2   :  { %6448 = vmatprep.subr.bf16.mxu0 %v6447_v16  ;;  %v10395_v60 = vand.u32 4294901760, %v10394_v38  ;;  %v8792_v38 = vld [vmem:[%s9809_s2 + $0x38] sm:$0xff] }
 0x2a3   :  { %v2786_v37 = vand.u32 4294901760, %v8792_v38 }
 0x2a4   :  { %5630 = vmatmul.mubr.f32.gmra.mrb[4].mxu0 %v10380_v21  ;;  %v6463_v1 = vpack.c.bf16 %v10397_v2, %v10395_v60  ;;  %v8812_v2 = vld [vmem:[%s9809_s2 + $0x40] sm:$0xff] }
 0x2a5   :  { %5632 = vmatprep.mubr.f32.mxu0 %v10381_v39  ;;  %6450 = vmatpush3.bf16.msra.mxu0 %v6447_v16  ;;  %v10392_v16 = vand.u32 4294901760, %v10339_v48  ;;  %v10400_v48 = vld [vmem:[#allocation25_spill] sm:$0xff]  ;;  %v10402_v39 = vld [vmem:[#allocation26_spill] sm:$0xff] }
 0x2a6   :  { %6452 = vmatprep.subr.bf16.mxu0 %v6451_v63  ;;  %v10401_v21 = vand.u32 4294901760, %v10400_v48  ;;  %v10403_v46 = vand.u32 4294901760, %v10402_v39  ;;  %v10429_v39 = vld [vmem:[#allocation51_spill] sm:$0xff] }
 0x2a8   :  { %5633 = vmatmul.mubr.f32.gmra.mrb[6].mxu0 %v10386_v20  ;;  %v6467_v6 = vpack.c.bf16 %v10403_v46, %v10401_v21  ;;  %v10414_v20 = vand.u32 4294901760, %v10356_v45  ;;  %v10421_v45 = vand.u32 4294901760, %v8531_v29  ;;  %v8753_v29 = vld [vmem:[%s9809_s2 + $0x18] sm:$0xff]  ;;  %v10428_v21 = vld [vmem:[#allocation47_spill] sm:$0xff] }
 0x2a9   :  { %5635 = vmatprep.mubr.f32.mxu0 %v10387_v30  ;;  %6454 = vmatpush3.bf16.msra.mxu0 %v6451_v63  ;;  %v10399_v63 = vand.u32 4294901760, %v10343_v61  ;;  %v10407_v61 = vand.u32 4294901760, %v10351_v35  ;;  %v10413_v35 = vand.u32 4294901760, %v8340_v54  ;;  %v10420_v54 = vand.u32 4294901760, %v10362_v42  ;;  %v8746_v42 = vld [vmem:[%s9809_s2 + $0x10] sm:$0xff]  ;;  %v8759_v30 = vld [vmem:[%s9809_s2 + $0x20] sm:$0xff] }
 0x2aa   :  { %6456 = vmatprep.subr.bf16.mxu0 %v6455_v24  ;;  %v2771_v34 = vand.u32 4294901760, %v8746_v42  ;;  %v2774_v43 = vand.u32 4294901760, %v8753_v29  ;;  %v2777_v57 = vand.u32 4294901760, %v8759_v30  ;;  %v10430_v46 = vld [vmem:[#allocation27_spill] sm:$0xff] }
 0x2ac   :  { %5636 = vmatmul.mubr.f32.gmra.mrb[8].mxu0 %v10392_v16  ;;  %v8782_v16 = vpack.c.bf16 %v2774_v43, %v2771_v34 }
 0x2ad   :  { %5638 = vmatprep.mubr.f32.mxu0 %v10393_v10  ;;  %6458 = vmatpush3.bf16.msra.mxu0 %v6455_v24  ;;  %v10411_v24 = vand.u32 4294901760, %v8281_v58  ;;  %v10418_v58 = vand.u32 4294901760, %v10360_v28  ;;  %v2765_v28 = vand.u32 4294901760, %v8736_v56  ;;  %v8787_v10 = vld [vmem:[%s9809_s2 + $0x30] sm:$0xff] }
 0x2ae   :  { %6460 = vmatprep.subr.bf16.mxu0 %v6459_v17  ;;  %v2783_v60 = vand.u32 4294901760, %v8787_v10 }
 0x2af   :  { %v8772_v8 = vpack.c.bf16 %v2768_v26, %v2765_v28 }
 0x2b0   :  { %5639 = vmatmul.mubr.f32.gmra.mrb[10].mxu0 %v10398_v7  ;;  %v2789_v7 = vand.u32 4294901760, %v8812_v2 }
 0x2b1   :  { %5641 = vmatprep.mubr.f32.mxu0 %v10399_v63  ;;  %6462 = vmatpush3.bf16.msra.mxu0 %v6459_v17  ;;  %v2780_v17 = vand.u32 4294901760, %v8764_v19 }
 0x2b2   :  { %6464 = vmatprep.subr.bf16.mxu0 %v6463_v1  ;;  %6504 = vmatprep.subr.bf16.mxu1 %v8772_v8 }
 0x2b3   :  { %6506 = vmatpush3.bf16.msra.mxu1 %v8772_v8 }
 0x2b4   :  { %5642 = vmatmul.mubr.f32.gmra.mrb[12].mxu0 %v10404_v50  ;;  %6508 = vmatprep.subr.bf16.mxu1 %v8782_v16  ;;  %v10433_v50 = vld [vmem:[#allocation3_spill] sm:$0xff] }
 0x2b5   :  { %5644 = vmatprep.mubr.f32.mxu0 %v10405_v25  ;;  %6466 = vmatpush3.bf16.msra.mxu0 %v6463_v1  ;;  %v8817_v1 = vld [vmem:[%s9809_s2 + $0x48] sm:$0xff]  ;;  %v10434_v25 = vld [vmem:[#allocation10_spill] sm:$0xff] }
 0x2b6   :  { %6468 = vmatprep.subr.bf16.mxu0 %v6467_v6  ;;  %v2792_v63 = vand.u32 4294901760, %v8817_v1 }
 0x2b7   :  { %6510 = vmatpush3.bf16.msra.mxu1 %v8782_v16 }
 0x2b8   :  { %5645 = vmatmul.mubr.f32.gmra.mrb[14].mxu0 %v10406_v36  ;;  %v8841_v48 = vpack.c.bf16 %v2792_v63, %v2789_v7  ;;  %v10436_v36 = vld [vmem:[#allocation23_spill] sm:$0xff] }
 0x2b9   :  { %5647 = vmatprep.mubr.f32.mxu0 %v10407_v61  ;;  %6470 = vmatpush3.bf16.msra.mxu0 %v6467_v6  ;;  %v10432_v6 = vld [vmem:[#allocation53_spill] sm:$0xff]  ;;  %v10437_v61 = vld [vmem:[#allocation20_spill] sm:$0xff] }
 0x2ba   :  { %6472 = vmatprep.subr.bf16.mxu0 %v10331_v5  ;;  %10425 = vst [vmem:[#allocation12_spill] sm:$0xff] %v8841_v48 }
 0x2bc   :  { %5648 = vmatmul.mubr.f32.gmra.mrb[16].mxu0 %v10408_v53  ;;  %v10438_v53 = vld [vmem:[#allocation36_spill] sm:$0xff] }
 0x2bd   :  { %5650 = vmatprep.mubr.f32.mxu0 %v10409_v3  ;;  %v10439_v3 = vld [vmem:[#allocation32_spill] sm:$0xff] }
 0x2c0   :  { %5651 = vmatmul.mubr.f32.gmra.mrb[18].mxu0 %v10410_v13  ;;  %v10440_v13 = vld [vmem:[#allocation56_spill] sm:$0xff] }
 0x2c1   :  { %5653 = vmatprep.mubr.f32.mxu0 %v10411_v24  ;;  %v10441_v24 = vld [vmem:[#allocation58_spill] sm:$0xff] }
 0x2c4   :  { %5654 = vmatmul.mubr.f32.gmra.mrb[20].mxu0 %v10412_v47  ;;  %v10442_v47 = vld [vmem:[#allocation33_spill] sm:$0xff] }
 0x2c5   :  { %5656 = vmatprep.mubr.f32.mxu0 %v10413_v35  ;;  %v10443_v35 = vld [vmem:[#allocation37_spill] sm:$0xff] }
 0x2c8   :  { %5657 = vmatmul.mubr.f32.gmra.mrb[22].mxu0 %v10414_v20  ;;  %v10444_v20 = vld [vmem:[#allocation38_spill] sm:$0xff] }
 0x2c9   :  { %5659 = vmatprep.mubr.f32.mxu0 %v10415_v40  ;;  %v10445_v40 = vld [vmem:[#allocation34_spill] sm:$0xff] }
 0x2cc   :  { %5660 = vmatmul.mubr.f32.gmra.mrb[24].mxu0 %v10416_v59  ;;  %v10446_v59 = vld [vmem:[#allocation65_spill] sm:$0xff] }
 0x2cd   :  { %5662 = vmatprep.mubr.f32.mxu0 %v10417_v52  ;;  %v10447_v52 = vld [vmem:[#allocation64_spill] sm:$0xff] }
 0x2d0   :  { %5663 = vmatmul.mubr.f32.gmra.mrb[26].mxu0 %v10418_v58 }
 0x2d1   :  { %5665 = vmatprep.mubr.f32.mxu0 %v10419_v32 }
 0x2d4   :  { %5666 = vmatmul.mubr.f32.gmra.mrb[28].mxu0 %v10420_v54 }
 0x2d5   :  { %5668 = vmatprep.mubr.f32.mxu0 %v10421_v45  ;;  %v8944_v45 = vsub.f32 %v8736_v56, %v2765_v28 }
 0x2d7   :  { %10451 = vst [vmem:[#allocation43_spill] sm:$0xff] %v8944_v45 }
 0x2d8   :  { %5669 = vmatmul.mubr.f32.gmra.mrb[30].mxu0 %v10422_v62  ;;  %v8949_v62 = vsub.f32 %v8741_v55, %v2768_v26 }
 0x2d9   :  { %5703 = vmatprep.mubr.f32.mxu0 %v7726_v18 }
 0x2da   :  { %10452 = vst [vmem:[#allocation18_spill] sm:$0xff] %v8949_v62 }
 0x2dc   :  { %5704 = vmatmul.mubr.f32.vlgmr.msra.gmra.mrb[0].mxu0 %v7763_v33 }
 0x2dd   :  { %6474 = vmatpush3.bf16.msra.mxu0 %v10331_v5  ;;  %5706 = vmatprep.mubr.f32.mxu0 %v7797_v14  ;;  %v8803_v5 = vpack.c.bf16 %v2780_v17, %v2777_v57 }
 0x2de   :  { %6476 = vmatprep.subr.bf16.mxu0 %v10332_v51 }
 0x2df   :  { %10423 = vst [vmem:[#allocation5_spill] sm:$0xff] %v8803_v5  ;;  %6512 = vmatprep.subr.bf16.mxu1 %v8803_v5 }
 0x2e0   :  { %5707 = vmatmul.mubr.f32.gmra.mrb[2].mxu0 %v7714_v44  ;;  %6514 = vmatpush3.bf16.msra.mxu1 %v8803_v5 }
 0x2e1   :  { %5709 = vmatprep.mubr.f32.mxu0 %v7729_v4  ;;  %6478 = vmatpush3.bf16.msra.mxu0 %v10332_v51  ;;  %v8827_v51 = vpack.c.bf16 %v2786_v37, %v2783_v60 }
 0x2e2   :  { %6480 = vmatprep.subr.bf16.mxu0 %v10333_v15 }
 0x2e3   :  { %10424 = vst [vmem:[#allocation8_spill] sm:$0xff] %v8827_v51  ;;  %6516 = vmatprep.subr.bf16.mxu1 %v8827_v51 }
 0x2e4   :  { %5710 = vmatmul.mubr.f32.gmra.mrb[4].mxu0 %v7747_v11  ;;  %6518 = vmatpush3.bf16.msra.mxu1 %v8827_v51 }
 0x2e5   :  { %5712 = vmatprep.mubr.f32.mxu0 %v7773_v41  ;;  %6482 = vmatpush3.bf16.msra.mxu0 %v10333_v15  ;;  %v10426_v15 = vld [vmem:[#allocation45_spill] sm:$0xff] }
 0x2e6   :  { %6484 = vmatprep.subr.bf16.mxu0 %v10335_v0  ;;  %6520 = vmatprep.subr.bf16.mxu1 %v8841_v48 }
 0x2e8   :  { %5713 = vmatmul.mubr.f32.gmra.mrb[6].mxu0 %v7834_v49  ;;  %6522 = vmatpush3.bf16.msra.mxu1 %v8841_v48 }
 0x2e9   :  { %5715 = vmatprep.mubr.f32.mxu0 %v7870_v12  ;;  %6486 = vmatpush3.bf16.msra.mxu0 %v10335_v0  ;;  %v10427_v0 = vld [vmem:[#allocation24_spill] sm:$0xff] }
 0x2ea   :  { %6488 = vmatprep.subr.bf16.mxu0 %v10338_v31 }
 0x2ec   :  { %5716 = vmatmul.mubr.f32.gmra.mrb[8].mxu0 %v7840_v27 }
 0x2ed   :  { %5718 = vmatprep.mubr.f32.mxu0 %v7872_v9  ;;  %6490 = vmatpush3.bf16.msra.mxu0 %v10338_v31  ;;  %v10431_v31 = vld [vmem:[#allocation49_spill] sm:$0xff] }
 0x2ee   :  { %6492 = vmatprep.subr.bf16.mxu0 %v10341_v22 }
 0x2f0   :  { %5719 = vmatmul.mubr.f32.gmra.mrb[10].mxu0 %v7921_v23 }
 0x2f1   :  { %5721 = vmatprep.mubr.f32.mxu0 %v10426_v15  ;;  %6494 = vmatpush3.bf16.msra.mxu0 %v10341_v22  ;;  %v10435_v22 = vld [vmem:[#allocation14_spill] sm:$0xff] }
 0x2f2   :  { %6496 = vmatprep.subr.bf16.mxu0 %v10427_v0 }
 0x2f4   :  { %5722 = vmatmul.mubr.f32.gmra.mrb[12].mxu0 %v10428_v21 }
 0x2f5   :  { %5724 = vmatprep.mubr.f32.mxu0 %v10429_v39  ;;  %6498 = vmatpush3.bf16.msra.mxu0 %v10427_v0  ;;  %v10043_v0 = vand.u32 4294901760, %v8949_v62 }
 0x2f6   :  { %6500 = vmatprep.subr.bf16.mxu0 %v10430_v46 }
 0x2f8   :  { %5725 = vmatmul.mubr.f32.gmra.mrb[14].mxu0 %v10431_v31 }
 0x2f9   :  { %5727 = vmatprep.mubr.f32.mxu0 %v10432_v6  ;;  %6502 = vmatpush3.bf16.msra.mxu0 %v10430_v46 }
 0x2fc   :  { %5728 = vmatmul.mubr.f32.gmra.mrb[16].mxu0 %v10433_v50 }
 0x2fd   :  { %5730 = vmatprep.mubr.f32.mxu0 %v10434_v25 }
 0x300   :  { %5731 = vmatmul.mubr.f32.gmra.mrb[18].mxu0 %v10435_v22 }
 0x301   :  { %5733 = vmatprep.mubr.f32.mxu0 %v10436_v36 }
 0x304   :  { %5734 = vmatmul.mubr.f32.gmra.mrb[20].mxu0 %v10437_v61 }
 0x305   :  { %5736 = vmatprep.mubr.f32.mxu0 %v10438_v53 }
 0x308   :  { %5737 = vmatmul.mubr.f32.gmra.mrb[22].mxu0 %v10439_v3 }
 0x309   :  { %5739 = vmatprep.mubr.f32.mxu0 %v10440_v13 }
 0x30c   :  { %5740 = vmatmul.mubr.f32.gmra.mrb[24].mxu0 %v10441_v24 }
 0x30d   :  { %5742 = vmatprep.mubr.f32.mxu0 %v10442_v47 }
 0x310   :  { %5743 = vmatmul.mubr.f32.gmra.mrb[26].mxu0 %v10443_v35 }
 0x311   :  { %5745 = vmatprep.mubr.f32.mxu0 %v10444_v20 }
 0x314   :  { %5746 = vmatmul.mubr.f32.gmra.mrb[28].mxu0 %v10445_v40 }
 0x315   :  { %5748 = vmatprep.mubr.f32.mxu0 %v10446_v59 }
 0x318   :  { %5749 = vmatmul.mubr.f32.gmra.mrb[30].mxu0 %v10447_v52 }
 0x319   :  { %5783 = vmatprep.mubr.f32.mxu0 %v7726_v18  ;;  %v41_v18 = vld [vmem:[%s9809_s2 + $0x58] sm:$0xff] }
 0x31c   :  { %5784 = vmatmul.mubr.f32.vlgmr.msra.gmra.mrb[0].mxu0 %v7763_v33 }
 0x31d   :  { %5786 = vmatprep.mubr.f32.mxu0 %v7797_v14  ;;  %v43_v14 = vld [vmem:[%s9809_s2 + $0x68] sm:$0xff] }
 0x320   :  { %5787 = vmatmul.mubr.f32.gmra.mrb[2].mxu0 %v7714_v44  ;;  %v40_v44 = vld [vmem:[%s9809_s2 + $0x50] sm:$0xff] }
 0x321   :  { %5789 = vmatprep.mubr.f32.mxu0 %v7729_v4  ;;  %v2795_v4 = vand.u32 4294901760, %v40_v44 }
 0x323   :  { %v8962_v55 = vsub.f32 %v40_v44, %v2795_v4 }
 0x324   :  { %5790 = vmatmul.mubr.f32.gmra.mrb[4].mxu0 %v7747_v11  ;;  %v2798_v11 = vand.u32 4294901760, %v41_v18 }
 0x325   :  { %5792 = vmatprep.mubr.f32.mxu0 %v7773_v41  ;;  %v42_v41 = vld [vmem:[%s9809_s2 + $0x60] sm:$0xff]  ;;  %10453 = vst [vmem:[#allocation41_spill] sm:$0xff] %v8962_v55 }
 0x326   :  { %v8917_v33 = vpack.c.bf16 %v2798_v11, %v2795_v4  ;;  %v8964_v26 = vsub.f32 %v41_v18, %v2798_v11 }
 0x328   :  { %5793 = vmatmul.mubr.f32.gmra.mrb[6].mxu0 %v7834_v49  ;;  %10448 = vst [vmem:[#allocation39_spill] sm:$0xff] %v8917_v33  ;;  %6524 = vmatprep.subr.bf16.mxu1 %v8917_v33  ;;  %v2801_v49 = vand.u32 4294901760, %v42_v41  ;;  %10454 = vst [vmem:[#allocation42_spill] sm:$0xff] %v8964_v26 }
 0x329   :  { %5795 = vmatprep.mubr.f32.mxu0 %v7870_v12  ;;  %6526 = vmatpush3.bf16.msra.mxu1 %v8917_v33 }
 0x32c   :  { %5796 = vmatmul.mubr.f32.gmra.mrb[8].mxu0 %v7840_v27  ;;  %v2804_v27 = vand.u32 4294901760, %v43_v14 }
 0x32d   :  { %5798 = vmatprep.mubr.f32.mxu0 %v7872_v9  ;;  %v44_v9 = vld [vmem:[%s9809_s2 + $0x70] sm:$0xff] }
 0x32e   :  { %v8927_v12 = vpack.c.bf16 %v2804_v27, %v2801_v49  ;;  %v2807_v58 = vand.u32 4294901760, %v44_v9 }
 0x330   :  { %5799 = vmatmul.mubr.f32.gmra.mrb[10].mxu0 %v7921_v23  ;;  %10449 = vst [vmem:[#allocation15_spill] sm:$0xff] %v8927_v12  ;;  %v45_v23 = vld [vmem:[%s9809_s2 + $0x78] sm:$0xff]  ;;  %6528 = vmatprep.subr.bf16.mxu1 %v8927_v12 }
 0x331   :  { %5801 = vmatprep.mubr.f32.mxu0 %v10426_v15  ;;  %v2810_v32 = vand.u32 4294901760, %v45_v23  ;;  %6530 = vmatpush3.bf16.msra.mxu1 %v8927_v12  ;;  %v10044_v15 = vand.u32 4294901760, %v8944_v45 }
 0x333   :  { %v8937_v54 = vpack.c.bf16 %v2810_v32, %v2807_v58 }
 0x334   :  { %5802 = vmatmul.mubr.f32.gmra.mrb[12].mxu0 %v10428_v21  ;;  %v3169_v21 = vsub.f32 %v8944_v45, %v10044_v15 }
 0x335   :  { %5804 = vmatprep.mubr.f32.mxu0 %v10429_v39  ;;  %10450 = vst [vmem:[#allocation40_spill] sm:$0xff] %v8937_v54  ;;  %6532 = vmatprep.subr.bf16.mxu1 %v8937_v54  ;;  %v3176_v39 = vsub.f32 %v8949_v62, %v10043_v0 }
 0x336   :  { %6534 = vmatpush3.bf16.msra.mxu1 %v8937_v54  ;;  %v3170_v46 = vand.u32 4294901760, %v3169_v21  ;;  %v9025_v21 = vsub.f32 %v8759_v30, %v2777_v57 }
 0x337   :  { %v3177_v56 = vand.u32 4294901760, %v3176_v39  ;;  %v9030_v39 = vsub.f32 %v8764_v19, %v2780_v17  ;;  %v9053_v19 = vsub.f32 %v8812_v2, %v2789_v7  ;;  %v9066_v17 = vpack.c.bf16 %v8964_v26, %v8962_v55 }
 0x338   :  { %5805 = vmatmul.mubr.f32.gmra.mrb[14].mxu0 %v10431_v31  ;;  %v10035_v31 = vand.u32 4294901760, %v8962_v55  ;;  %10461 = vst [vmem:[#allocation54_spill] sm:$0xff] %v9025_v21 }
 0x339   :  { %5807 = vmatprep.mubr.f32.mxu0 %v10432_v6  ;;  %v8959_v28 = vpack.c.bf16 %v3177_v56, %v3170_v46  ;;  %v10034_v6 = vand.u32 4294901760, %v8964_v26  ;;  %10462 = vst [vmem:[#allocation30_spill] sm:$0xff] %v9030_v39  ;;  %10465 = vst [vmem:[#allocation35_spill] sm:$0xff] %v9053_v19  ;;  %v10036_v2 = vand.u32 4294901760, %v9030_v39 }
 0x33b   :  { %6536 = vmatprep.subr.bf16.mxu1 %v8959_v28 }
 0x33c   :  { %5808 = vmatmul.mubr.f32.gmra.mrb[16].mxu0 %v10433_v50  ;;  %v3239_v50 = vsub.f32 %v8962_v55, %v10035_v31 }
 0x33d   :  { %5810 = vmatprep.mubr.f32.mxu0 %v10434_v25  ;;  %v3246_v25 = vsub.f32 %v8964_v26, %v10034_v6 }
 0x340   :  { %5811 = vmatmul.mubr.f32.gmra.mrb[18].mxu0 %v10435_v22  ;;  %v8974_v22 = vsub.f32 %v42_v41, %v2801_v49 }
 0x341   :  { %5813 = vmatprep.mubr.f32.mxu0 %v10436_v36  ;;  %v8976_v36 = vsub.f32 %v43_v14, %v2804_v27 }
 0x342   :  { %10455 = vst [vmem:[#allocation21_spill] sm:$0xff] %v8974_v22 }
 0x343   :  { %10456 = vst [vmem:[#allocation44_spill] sm:$0xff] %v8976_v36 }
 0x344   :  { %5814 = vmatmul.mubr.f32.gmra.mrb[20].mxu0 %v10437_v61  ;;  %v3240_v61 = vand.u32 4294901760, %v3239_v50 }
 0x345   :  { %5816 = vmatprep.mubr.f32.mxu0 %v10438_v53  ;;  %v3247_v53 = vand.u32 4294901760, %v3246_v25  ;;  %v3204_v25 = vsub.f32 %v9030_v39, %v10036_v2 }
 0x348   :  { %5817 = vmatmul.mubr.f32.gmra.mrb[22].mxu0 %v10439_v3  ;;  %v10033_v3 = vand.u32 4294901760, %v8974_v22 }
 0x349   :  { %5819 = vmatprep.mubr.f32.mxu0 %v10440_v13  ;;  %v10032_v13 = vand.u32 4294901760, %v8976_v36 }
 0x34c   :  { %5820 = vmatmul.mubr.f32.gmra.mrb[24].mxu0 %v10441_v24  ;;  %v8980_v24 = vpack.c.bf16 %v3247_v53, %v3240_v61 }
 0x34d   :  { %5822 = vmatprep.mubr.f32.mxu0 %v10442_v47  ;;  %v3253_v47 = vsub.f32 %v8974_v22, %v10033_v3 }
 0x350   :  { %5823 = vmatmul.mubr.f32.gmra.mrb[26].mxu0 %v10443_v35  ;;  %v3260_v35 = vsub.f32 %v8976_v36, %v10032_v13 }
 0x351   :  { %5825 = vmatprep.mubr.f32.mxu0 %v10444_v20  ;;  %v8988_v20 = vsub.f32 %v44_v9, %v2807_v58  ;;  %v9006_v9 = vpack.c.bf16 %v8949_v62, %v8944_v45  ;;  %v9016_v58 = vsub.f32 %v8753_v29, %v2774_v43  ;;  %v9039_v29 = vsub.f32 %v8787_v10, %v2783_v60 }
 0x352   :  { %v9058_v43 = vsub.f32 %v8817_v1, %v2792_v63  ;;  %v9072_v60 = vpack.c.bf16 %v8976_v36, %v8974_v22 }
 0x353   :  { %10457 = vst [vmem:[#allocation46_spill] sm:$0xff] %v8988_v20  ;;  %v10031_v44 = vand.u32 4294901760, %v8988_v20  ;;  %10460 = vst [vmem:[#allocation50_spill] sm:$0xff] %v9016_v58  ;;  %v10042_v13 = vand.u32 4294901760, %v9039_v29 }
 0x354   :  { %5826 = vmatmul.mubr.f32.gmra.mrb[28].mxu0 %v10445_v40  ;;  %v8990_v40 = vsub.f32 %v45_v23, %v2810_v32  ;;  %v9011_v23 = vsub.f32 %v8746_v42, %v2771_v34  ;;  %v9034_v42 = vpack.c.bf16 %v9030_v39, %v9025_v21  ;;  %10463 = vst [vmem:[#allocation13_spill] sm:$0xff] %v9039_v29  ;;  %10466 = vst [vmem:[#allocation55_spill] sm:$0xff] %v9058_v43 }
 0x355   :  { %5828 = vmatprep.mubr.f32.mxu0 %v10446_v59  ;;  %v3254_v59 = vand.u32 4294901760, %v3253_v47  ;;  %v3267_v11 = vsub.f32 %v8988_v20, %v10031_v44  ;;  %v9044_v34 = vsub.f32 %v8792_v38, %v2786_v37  ;;  %v9062_v57 = vpack.c.bf16 %v9058_v43, %v9053_v19 }
 0x356   :  { %10458 = vst [vmem:[#allocation48_spill] sm:$0xff] %v8990_v40  ;;  %v10030_v18 = vand.u32 4294901760, %v8990_v40  ;;  %10459 = vst [vmem:[#allocation52_spill] sm:$0xff] %v9011_v23  ;;  %v9020_v32 = vpack.c.bf16 %v9016_v58, %v9011_v23  ;;  %v10039_v10 = vand.u32 4294901760, %v9011_v23  ;;  %v10038_v38 = vand.u32 4294901760, %v9016_v58 }
 0x357   :  { %v3268_v14 = vand.u32 4294901760, %v3267_v11  ;;  %10464 = vst [vmem:[#allocation28_spill] sm:$0xff] %v9044_v34  ;;  %v9048_v30 = vpack.c.bf16 %v9044_v34, %v9039_v29  ;;  %v10037_v37 = vand.u32 4294901760, %v9025_v21  ;;  %v9094_v11 = vpack.c.bf16 %v8990_v40, %v8988_v20 }
 0x358   :  { %5829 = vmatmul.mubr.f32.gmra.mrb[30].mxu0 %v10447_v52  ;;  %v3261_v52 = vand.u32 4294901760, %v3260_v35  ;;  %v3274_v41 = vsub.f32 %v8990_v40, %v10030_v18  ;;  %v3183_v7 = vsub.f32 %v9011_v23, %v10039_v10  ;;  %v3190_v63 = vsub.f32 %v9016_v58, %v10038_v38 }
 0x359   :  { %v3197_v50 = vsub.f32 %v9025_v21, %v10037_v37  ;;  %v3205_v18 = vand.u32 4294901760, %v3204_v25 }
 0x35a   :  { %v8994_v4 = vpack.c.bf16 %v3261_v52, %v3254_v59  ;;  %v3275_v49 = vand.u32 4294901760, %v3274_v41  ;;  %v3184_v59 = vand.u32 4294901760, %v3183_v7  ;;  %v3191_v52 = vand.u32 4294901760, %v3190_v63 }
 0x35b   :  { %v10046_v63 = vand.u32 4294901760, %v9044_v34 }
 0x35c   :  { %v9002_v27 = vpack.c.bf16 %v3275_v49, %v3268_v14  ;;  %v6539_v31 = vpack.c.bf16 %v3191_v52, %v3184_v59  ;;  %v3211_v59 = vsub.f32 %v9039_v29, %v10042_v13 }
 0x3ef   :  { %v5785_v1 = vpop.f32.mrb[0].mxu0 }
 0x3f0   :  { %v2733_v46 = vmax.f32 %v5785_v1, 0.0  ;;  %v2542_v56 = vpop.f32.mrb[1].mxu0  ;;  %v3198_v1 = vand.u32 4294901760, %v3197_v50 }
 0x3f1   :  { %v2732_v61 = vmax.f32 %v2542_v56, 0.0 }
 0x3f2   :  { %v9088_v53 = vand.u32 4294901760, %v2733_v46  ;;  %v9116_v2 = vpack.c.bf16 %v3205_v18, %v3198_v1  ;;  %v3218_v18 = vsub.f32 %v9044_v34, %v10046_v63 }
 0x3f3   :  { %v9090_v47 = vand.u32 4294901760, %v2732_v61  ;;  %v5788_v35 = vpop.f32.mrb[2].mxu0 }
 0x3f4   :  { %v9097_v41 = vsub.f32 %v2733_v46, %v9088_v53  ;;  %v2735_v14 = vmax.f32 %v5788_v35, 0.0  ;;  %v2554_v49 = vpop.f32.mrb[3].mxu0 }
 0x3f5   :  { %v9100_v56 = vsub.f32 %v2732_v61, %v9090_v47  ;;  %v2734_v44 = vmax.f32 %v2554_v49, 0.0 }
 0x3f6   :  { %v9103_v3 = vand.u32 4294901760, %v2735_v14  ;;  %v10040_v7 = vand.u32 4294901760, %v9097_v41 }
 0x3f7   :  { %v9107_v6 = vand.u32 4294901760, %v2734_v44  ;;  %v5791_v46 = vpop.f32.mrb[4].mxu0  ;;  %v10041_v35 = vand.u32 4294901760, %v9100_v56 }
 0x3f8   :  { %v9111_v50 = vsub.f32 %v2735_v14, %v9103_v3  ;;  %v2737_v25 = vmax.f32 %v5791_v46, 0.0  ;;  %v2566_v61 = vpop.f32.mrb[5].mxu0  ;;  %v2858_v49 = vsub.f32 %v9097_v41, %v10040_v7 }
 0x3f9   :  { %v9119_v37 = vsub.f32 %v2734_v44, %v9107_v6  ;;  %v2736_v38 = vmax.f32 %v2566_v61, 0.0  ;;  %v2848_v10 = vsub.f32 %v9100_v56, %v10041_v35  ;;  %v3212_v35 = vand.u32 4294901760, %v3211_v59 }
 0x3fa   :  { %v9127_v52 = vand.u32 4294901760, %v2737_v25  ;;  %v2859_v14 = vand.u32 4294901760, %v2858_v49  ;;  %v10468_v40 = vand.u32 4294901760, %v9111_v50  ;;  %v3219_v49 = vand.u32 4294901760, %v3218_v18 }
 0x3fb   :  { %v9134_v1 = vand.u32 4294901760, %v2736_v38  ;;  %v5794_v46 = vpop.f32.mrb[6].mxu0  ;;  %v2849_v61 = vand.u32 4294901760, %v2848_v10  ;;  %v10050_v7 = vand.u32 4294901760, %v9119_v37  ;;  %v10470_v59 = vand.u32 4294901760, %v9058_v43 }
 0x3fc   :  { %v9139_v13 = vsub.f32 %v2737_v25, %v9127_v52  ;;  %v2739_v0 = vmax.f32 %v5794_v46, 0.0  ;;  %v2578_v15 = vpop.f32.mrb[7].mxu0  ;;  %v2878_v63 = vsub.f32 %v9111_v50, %v10468_v40  ;;  %v10469_v46 = vand.u32 4294901760, %v9053_v19 }
 0x3fd   :  { %v9145_v44 = vsub.f32 %v2736_v38, %v9134_v1  ;;  %v2738_v20 = vmax.f32 %v2578_v15, 0.0  ;;  %5863 = vmatprep.mubr.f32.mxu1 %v2849_v61  ;;  %v2868_v10 = vsub.f32 %v9119_v37, %v10050_v7  ;;  %v3232_v7 = vsub.f32 %v9058_v43, %v10470_v59 }
 0x3fe   :  { %10467 = vst [vmem:[#allocation57_spill] sm:$0xff] %v9139_v13  ;;  %v9150_v36 = vand.u32 4294901760, %v2739_v0  ;;  %5864 = vmatmul.mubr.f32.vlgmr.msra.gmra.mrb[0].mxu1 %v2859_v14  ;;  %v3225_v40 = vsub.f32 %v9053_v19, %v10469_v46  ;;  %v2879_v26 = vand.u32 4294901760, %v2878_v63  ;;  %v10472_v46 = vand.u32 4294901760, %v9139_v13 }
 0x3ff   :  { %v9156_v22 = vand.u32 4294901760, %v2738_v20  ;;  %6538 = vmatpush3.bf16.msra.mxu1 %v8959_v28  ;;  %v5797_v15 = vpop.f32.mrb[8].mxu0  ;;  %v2869_v38 = vand.u32 4294901760, %v2868_v10  ;;  %v10057_v61 = vand.u32 4294901760, %v9145_v44  ;;  %v6547_v63 = vpack.c.bf16 %v3219_v49, %v3212_v35 }
 0x400   :  { %v9164_v14 = vsub.f32 %v2739_v0, %v9150_v36  ;;  %v2741_v18 = vmax.f32 %v5797_v15, 0.0  ;;  %v2590_v25 = vpop.f32.mrb[9].mxu0  ;;  %6540 = vmatprep.subr.bf16.mxu1 %v6539_v31  ;;  %v2898_v55 = vsub.f32 %v9139_v13, %v10472_v46  ;;  %v3226_v15 = vand.u32 4294901760, %v3225_v40 }
 0x401   :  { %v9170_v28 = vsub.f32 %v2738_v20, %v9156_v22  ;;  %v2740_v10 = vmax.f32 %v2590_v25, 0.0  ;;  %5866 = vmatprep.mubr.f32.mxu1 %v2869_v38  ;;  %v2888_v59 = vsub.f32 %v9145_v44, %v10057_v61  ;;  %v3233_v25 = vand.u32 4294901760, %v3232_v7 }
 0x402   :  { %10471 = vst [vmem:[#allocation59_spill] sm:$0xff] %v9164_v14  ;;  %v9175_v43 = vand.u32 4294901760, %v2741_v18  ;;  %5867 = vmatmul.mubr.f32.gmra.mrb[2].mxu1 %v2879_v26  ;;  %v10059_v0 = vand.u32 4294901760, %v9164_v14  ;;  %v2899_v39 = vand.u32 4294901760, %v2898_v55 }
 0x403   :  { %10473 = vst [vmem:[#allocation61_spill] sm:$0xff] %v9170_v28  ;;  %v9178_v19 = vand.u32 4294901760, %v2740_v10  ;;  %v5800_v34 = vpop.f32.mrb[10].mxu0  ;;  %v2889_v46 = vand.u32 4294901760, %v2888_v59  ;;  %6542 = vmatpush3.bf16.msra.mxu1 %v6539_v31  ;;  %v10060_v20 = vand.u32 4294901760, %v9170_v28 }
 0x404   :  { %v9182_v38 = vsub.f32 %v2741_v18, %v9175_v43  ;;  %v2743_v29 = vmax.f32 %v5800_v34, 0.0  ;;  %v2602_v61 = vpop.f32.mrb[11].mxu0  ;;  %v2918_v26 = vsub.f32 %v9164_v14, %v10059_v0  ;;  %6544 = vmatprep.subr.bf16.mxu1 %v9116_v2 }
 0x405   :  { %v9189_v35 = vsub.f32 %v2740_v10, %v9178_v19  ;;  %v2742_v49 = vmax.f32 %v2602_v61, 0.0  ;;  %5869 = vmatprep.mubr.f32.mxu1 %v2889_v46  ;;  %v2908_v31 = vsub.f32 %v9170_v28, %v10060_v20  ;;  %v6551_v10 = vpack.c.bf16 %v3233_v25, %v3226_v15 }
 0x406   :  { %10474 = vst [vmem:[#allocation60_spill] sm:$0xff] %v9182_v38  ;;  %v9194_v7 = vand.u32 4294901760, %v2743_v29  ;;  %5870 = vmatmul.mubr.f32.gmra.mrb[4].mxu1 %v2899_v39  ;;  %v10062_v55 = vand.u32 4294901760, %v9182_v38  ;;  %v2919_v20 = vand.u32 4294901760, %v2918_v26 }
 0x407   :  { %10475 = vst [vmem:[#allocation62_spill] sm:$0xff] %v9189_v35  ;;  %v9197_v34 = vand.u32 4294901760, %v2742_v49  ;;  %v5803_v40 = vpop.f32.mrb[12].mxu0  ;;  %v2909_v18 = vand.u32 4294901760, %v2908_v31  ;;  %v10064_v59 = vand.u32 4294901760, %v9189_v35  ;;  %6546 = vmatpush3.bf16.msra.mxu1 %v9116_v2 }
 0x408   :  { %v9202_v61 = vsub.f32 %v2743_v29, %v9194_v7  ;;  %v2745_v46 = vmax.f32 %v5803_v40, 0.0  ;;  %v2614_v0 = vpop.f32.mrb[13].mxu0  ;;  %v2938_v39 = vsub.f32 %v9182_v38, %v10062_v55  ;;  %6548 = vmatprep.subr.bf16.mxu1 %v6547_v63 }
 0x409   :  { %v9208_v21 = vsub.f32 %v2742_v49, %v9197_v34  ;;  %v2744_v31 = vmax.f32 %v2614_v0, 0.0  ;;  %5872 = vmatprep.mubr.f32.mxu1 %v2909_v18  ;;  %v2928_v2 = vsub.f32 %v9189_v35, %v10064_v59 }
 0x40a   :  { %10476 = vst [vmem:[#allocation63_spill] sm:$0xff] %v9202_v61  ;;  %v9213_v15 = vand.u32 4294901760, %v2745_v46  ;;  %5873 = vmatmul.mubr.f32.gmra.mrb[6].mxu1 %v2919_v20  ;;  %v10067_v29 = vand.u32 4294901760, %v9202_v61  ;;  %v2939_v58 = vand.u32 4294901760, %v2938_v39 }
 0x40b   :  { %10477 = vst [vmem:[#allocation4_spill] sm:$0xff] %v9208_v21  ;;  %v9216_v25 = vand.u32 4294901760, %v2744_v31  ;;  %v5806_v26 = vpop.f32.mrb[14].mxu0  ;;  %v2929_v40 = vand.u32 4294901760, %v2928_v2  ;;  %v10069_v55 = vand.u32 4294901760, %v9208_v21  ;;  %6550 = vmatpush3.bf16.msra.mxu1 %v6547_v63 }
 0x40c   :  { %10478 = vst [vmem:[#allocation11_spill] sm:$0xff] %v9213_v15  ;;  %v9220_v49 = vsub.f32 %v2745_v46, %v9213_v15  ;;  %v2747_v0 = vmax.f32 %v5806_v26, 0.0  ;;  %v2626_v18 = vpop.f32.mrb[15].mxu0  ;;  %v2958_v59 = vsub.f32 %v9202_v61, %v10067_v29  ;;  %6552 = vmatprep.subr.bf16.mxu1 %v6551_v10 }
 0x40d   :  { %10479 = vst [vmem:[#allocation2_spill] sm:$0xff] %v9216_v25  ;;  %v9226_v20 = vsub.f32 %v2744_v31, %v9216_v25  ;;  %v2746_v23 = vmax.f32 %v2626_v18, 0.0  ;;  %5875 = vmatprep.mubr.f32.mxu1 %v2929_v40  ;;  %v2948_v63 = vsub.f32 %v9208_v21, %v10069_v55 }
 0x40e   :  { %10480 = vst [vmem:[#allocation6_spill] sm:$0xff] %v9220_v49  ;;  %v9231_v2 = vand.u32 4294901760, %v2747_v0  ;;  %5876 = vmatmul.mubr.f32.gmra.mrb[8].mxu1 %v2939_v58  ;;  %v10072_v46 = vand.u32 4294901760, %v9220_v49  ;;  %v2959_v45 = vand.u32 4294901760, %v2958_v59 }
 0x40f   :  { %10481 = vst [vmem:[#allocation7_spill] sm:$0xff] %v9226_v20  ;;  %v9234_v39 = vand.u32 4294901760, %v2746_v23  ;;  %v5809_v26 = vpop.f32.mrb[16].mxu0  ;;  %v2949_v62 = vand.u32 4294901760, %v2948_v63  ;;  %v10077_v29 = vand.u32 4294901760, %v9226_v20  ;;  %6554 = vmatpush3.bf16.msra.mxu1 %v6551_v10 }
 0x410   :  { %10482 = vst [vmem:[#allocation9_spill] sm:$0xff] %v9231_v2  ;;  %v9238_v31 = vsub.f32 %v2747_v0, %v9231_v2  ;;  %v2749_v40 = vmax.f32 %v5809_v26, 0.0  ;;  %v2638_v18 = vpop.f32.mrb[17].mxu0  ;;  %v2978_v55 = vsub.f32 %v9220_v49, %v10072_v46  ;;  %6556 = vmatprep.subr.bf16.mxu1 %v8980_v24 }
 0x411   :  { %10483 = vst [vmem:[#allocation16_spill] sm:$0xff] %v9234_v39  ;;  %v9245_v58 = vsub.f32 %v2746_v23, %v9234_v39  ;;  %v2748_v54 = vmax.f32 %v2638_v18, 0.0  ;;  %5878 = vmatprep.mubr.f32.mxu1 %v2949_v62  ;;  %v2968_v10 = vsub.f32 %v9226_v20, %v10077_v29 }
 0x412   :  { %10484 = vst [vmem:[#allocation17_spill] sm:$0xff] %v9238_v31  ;;  %v9250_v0 = vand.u32 4294901760, %v2749_v40  ;;  %5879 = vmatmul.mubr.f32.gmra.mrb[10].mxu1 %v2959_v45  ;;  %v10080_v59 = vand.u32 4294901760, %v9238_v31  ;;  %v2979_v12 = vand.u32 4294901760, %v2978_v55 }
 0x413   :  { %10485 = vst [vmem:[#allocation19_spill] sm:$0xff] %v9245_v58  ;;  %v9253_v63 = vand.u32 4294901760, %v2748_v54  ;;  %v5812_v26 = vpop.f32.mrb[18].mxu0  ;;  %v2969_v46 = vand.u32 4294901760, %v2968_v10  ;;  %v10085_v49 = vand.u32 4294901760, %v9245_v58  ;;  %6558 = vmatpush3.bf16.msra.mxu1 %v8980_v24 }
 0x414   :  { %10486 = vst [vmem:[#allocation29_spill] sm:$0xff] %v9250_v0  ;;  %v9258_v23 = vsub.f32 %v2749_v40, %v9250_v0  ;;  %v2751_v62 = vmax.f32 %v5812_v26, 0.0  ;;  %v2650_v18 = vpop.f32.mrb[19].mxu0  ;;  %v2998_v45 = vsub.f32 %v9238_v31, %v10080_v59  ;;  %6560 = vmatprep.subr.bf16.mxu1 %v8994_v4 }
 0x415   :  { %10487 = vst [vmem:[#allocation31_spill] sm:$0xff] %v9253_v63  ;;  %v9265_v29 = vsub.f32 %v2748_v54, %v9253_v63  ;;  %v2750_v10 = vmax.f32 %v2650_v18, 0.0  ;;  %5881 = vmatprep.mubr.f32.mxu1 %v2969_v46  ;;  %v2988_v24 = vsub.f32 %v9245_v58, %v10085_v49 }
 0x416   :  { %10488 = vst [vmem:[#allocation22_spill] sm:$0xff] %v9258_v23  ;;  %v9270_v40 = vand.u32 4294901760, %v2751_v62  ;;  %5882 = vmatmul.mubr.f32.gmra.mrb[12].mxu1 %v2979_v12  ;;  %v10088_v55 = vand.u32 4294901760, %v9258_v23  ;;  %v2999_v61 = vand.u32 4294901760, %v2998_v45 }
 0x417   :  { %10489 = vst [vmem:[#allocation25_spill] sm:$0xff] %v9265_v29  ;;  %v9273_v26 = vand.u32 4294901760, %v2750_v10  ;;  %v5815_v20 = vpop.f32.mrb[20].mxu0  ;;  %v2989_v59 = vand.u32 4294901760, %v2988_v24  ;;  %v10093_v31 = vand.u32 4294901760, %v9265_v29  ;;  %6562 = vmatpush3.bf16.msra.mxu1 %v8994_v4 }
 0x418   :  { %10490 = vst [vmem:[#allocation26_spill] sm:$0xff] %v9270_v40  ;;  %v9278_v54 = vsub.f32 %v2751_v62, %v9270_v40  ;;  %v2753_v46 = vmax.f32 %v5815_v20, 0.0  ;;  %v2662_v18 = vpop.f32.mrb[21].mxu0  ;;  %v3018_v12 = vsub.f32 %v9258_v23, %v10088_v55  ;;  %6564 = vmatprep.subr.bf16.mxu1 %v9002_v27 }
 0x419   :  { %10491 = vst [vmem:[#allocation45_spill] sm:$0xff] %v9273_v26  ;;  %v9285_v49 = vsub.f32 %v2750_v10, %v9273_v26  ;;  %v2752_v24 = vmax.f32 %v2662_v18, 0.0  ;;  %5884 = vmatprep.mubr.f32.mxu1 %v2989_v59  ;;  %v3008_v4 = vsub.f32 %v9265_v29, %v10093_v31 }
 0x41a   :  { %10492 = vst [vmem:[#allocation24_spill] sm:$0xff] %v9278_v54  ;;  %v9290_v62 = vand.u32 4294901760, %v2753_v46  ;;  %5885 = vmatmul.mubr.f32.gmra.mrb[14].mxu1 %v2999_v61  ;;  %v10096_v20 = vand.u32 4294901760, %v9278_v54  ;;  %v3019_v33 = vand.u32 4294901760, %v3018_v12 }
 0x41b   :  { %10493 = vst [vmem:[#allocation47_spill] sm:$0xff] %v9285_v49  ;;  %v9293_v45 = vand.u32 4294901760, %v2752_v24  ;;  %v5818_v58 = vpop.f32.mrb[22].mxu0  ;;  %v3009_v55 = vand.u32 4294901760, %v3008_v4  ;;  %v10101_v23 = vand.u32 4294901760, %v9285_v49  ;;  %6566 = vmatpush3.bf16.msra.mxu1 %v9002_v27 }
 0x41c   :  { %10494 = vst [vmem:[#allocation51_spill] sm:$0xff] %v9290_v62  ;;  %v9298_v10 = vsub.f32 %v2753_v46, %v9290_v62  ;;  %v2755_v59 = vmax.f32 %v5818_v58, 0.0  ;;  %v2674_v18 = vpop.f32.mrb[23].mxu0  ;;  %v3038_v61 = vsub.f32 %v9278_v54, %v10096_v20  ;;  %6568 = vmatprep.subr.bf16.mxu1 %v9006_v9 }
 0x41d   :  { %10495 = vst [vmem:[#allocation27_spill] sm:$0xff] %v9293_v45  ;;  %v9305_v31 = vsub.f32 %v2752_v24, %v9293_v45  ;;  %v2754_v4 = vmax.f32 %v2674_v18, 0.0  ;;  %5887 = vmatprep.mubr.f32.mxu1 %v3009_v55  ;;  %v3028_v27 = vsub.f32 %v9285_v49, %v10101_v23 }
 0x41e   :  { %10496 = vst [vmem:[#allocation49_spill] sm:$0xff] %v9298_v10  ;;  %v9310_v46 = vand.u32 4294901760, %v2755_v59  ;;  %5888 = vmatmul.mubr.f32.gmra.mrb[16].mxu1 %v3019_v33  ;;  %v10108_v58 = vand.u32 4294901760, %v9298_v10  ;;  %v3039_v21 = vand.u32 4294901760, %v3038_v61 }
 0x41f   :  { %10497 = vst [vmem:[#allocation53_spill] sm:$0xff] %v9305_v31  ;;  %v9313_v12 = vand.u32 4294901760, %v2754_v4  ;;  %v5821_v29 = vpop.f32.mrb[24].mxu0  ;;  %v3029_v20 = vand.u32 4294901760, %v3028_v27  ;;  %v10111_v54 = vand.u32 4294901760, %v9305_v31 }
 0x420   :  { %10498 = vst [vmem:[#allocation3_spill] sm:$0xff] %v9310_v46  ;;  %v9317_v24 = vsub.f32 %v2755_v59, %v9310_v46  ;;  %v2757_v18 = vmax.f32 %v5821_v29, 0.0  ;;  %v2686_v55 = vpop.f32.mrb[25].mxu0  ;;  %v3058_v23 = vsub.f32 %v9298_v10, %v10108_v58 }
 0x421   :  { %10499 = vst [vmem:[#allocation10_spill] sm:$0xff] %v9313_v12  ;;  %v9323_v33 = vsub.f32 %v2754_v4, %v9313_v12  ;;  %v2756_v49 = vmax.f32 %v2686_v55, 0.0  ;;  %5890 = vmatprep.mubr.f32.mxu1 %v3029_v20  ;;  %v3048_v27 = vsub.f32 %v9305_v31, %v10111_v54 }
 0x422   :  { %10500 = vst [vmem:[#allocation14_spill] sm:$0xff] %v9317_v24  ;;  %v9328_v38 = vand.u32 4294901760, %v2757_v18  ;;  %5891 = vmatmul.mubr.f32.gmra.mrb[18].mxu1 %v3039_v21  ;;  %v10118_v29 = vand.u32 4294901760, %v9317_v24  ;;  %v3059_v10 = vand.u32 4294901760, %v3058_v23 }
 0x423   :  { %10501 = vst [vmem:[#allocation23_spill] sm:$0xff] %v9323_v33  ;;  %v9331_v59 = vand.u32 4294901760, %v2756_v49  ;;  %v5824_v61 = vpop.f32.mrb[26].mxu0  ;;  %v3049_v48 = vand.u32 4294901760, %v3048_v27  ;;  %v10121_v58 = vand.u32 4294901760, %v9323_v33 }
 0x424   :  { %10502 = vst [vmem:[#allocation20_spill] sm:$0xff] %v9328_v38  ;;  %v9335_v4 = vsub.f32 %v2757_v18, %v9328_v38  ;;  %v2759_v55 = vmax.f32 %v5824_v61, 0.0  ;;  %v2698_v20 = vpop.f32.mrb[27].mxu0  ;;  %v3078_v54 = vsub.f32 %v9317_v24, %v10118_v29 }
 0x425   :  { %10503 = vst [vmem:[#allocation36_spill] sm:$0xff] %v9331_v59  ;;  %v9341_v21 = vsub.f32 %v2756_v49, %v9331_v59  ;;  %v2758_v31 = vmax.f32 %v2698_v20, 0.0  ;;  %5893 = vmatprep.mubr.f32.mxu1 %v3049_v48  ;;  %v3068_v27 = vsub.f32 %v9323_v33, %v10121_v58 }
 0x426   :  { %10504 = vst [vmem:[#allocation32_spill] sm:$0xff] %v9335_v4  ;;  %v9346_v35 = vand.u32 4294901760, %v2759_v55  ;;  %5894 = vmatmul.mubr.f32.gmra.mrb[20].mxu1 %v3059_v10  ;;  %v10128_v18 = vand.u32 4294901760, %v9335_v4  ;;  %v3079_v24 = vand.u32 4294901760, %v3078_v54 }
 0x427   :  { %10505 = vst [vmem:[#allocation56_spill] sm:$0xff] %v9341_v21  ;;  %v9349_v61 = vand.u32 4294901760, %v2758_v31  ;;  %v5827_v23 = vpop.f32.mrb[28].mxu0  ;;  %v3069_v14 = vand.u32 4294901760, %v3068_v27  ;;  %v10131_v29 = vand.u32 4294901760, %v9341_v21 }
 0x428   :  { %10506 = vst [vmem:[#allocation58_spill] sm:$0xff] %v9346_v35  ;;  %v9353_v49 = vsub.f32 %v2759_v55, %v9346_v35  ;;  %v2761_v20 = vmax.f32 %v5827_v23, 0.0  ;;  %v2710_v48 = vpop.f32.mrb[29].mxu0  ;;  %v3098_v58 = vsub.f32 %v9335_v4, %v10128_v18 }
 0x429   :  { %10507 = vst [vmem:[#allocation33_spill] sm:$0xff] %v9349_v61  ;;  %v9359_v10 = vsub.f32 %v2758_v31, %v9349_v61  ;;  %v2760_v33 = vmax.f32 %v2710_v48, 0.0  ;;  %5896 = vmatprep.mubr.f32.mxu1 %v3069_v14  ;;  %v3088_v27 = vsub.f32 %v9341_v21, %v10131_v29 }
 0x42a   :  { %10508 = vst [vmem:[#allocation37_spill] sm:$0xff] %v9353_v49  ;;  %v9364_v51 = vand.u32 4294901760, %v2761_v20  ;;  %5897 = vmatmul.mubr.f32.gmra.mrb[22].mxu1 %v3079_v24  ;;  %v10138_v55 = vand.u32 4294901760, %v9353_v49  ;;  %v3099_v4 = vand.u32 4294901760, %v3098_v58 }
 0x42b   :  { %v9367_v23 = vand.u32 4294901760, %v2760_v33  ;;  %v5830_v54 = vpop.f32.mrb[30].mxu0  ;;  %v3089_v28 = vand.u32 4294901760, %v3088_v27  ;;  %v10139_v18 = vand.u32 4294901760, %v9359_v10 }
 0x42c   :  { %10509 = vst [vmem:[#allocation38_spill] sm:$0xff] %v9364_v51  ;;  %v9371_v31 = vsub.f32 %v2761_v20, %v9364_v51  ;;  %v2763_v48 = vmax.f32 %v5830_v54, 0.0  ;;  %v2722_v14 = vpop.f32.mrb[31].mxu0  ;;  %v3118_v29 = vsub.f32 %v9353_v49, %v10138_v55 }
 0x42d   :  { %10510 = vst [vmem:[#allocation34_spill] sm:$0xff] %v9367_v23  ;;  %v9377_v24 = vsub.f32 %v2760_v33, %v9367_v23  ;;  %v2762_v21 = vmax.f32 %v2722_v14, 0.0  ;;  %5899 = vmatprep.mubr.f32.mxu1 %v3089_v28  ;;  %v3108_v27 = vsub.f32 %v9359_v10, %v10139_v18 }
 0x42e   :  { %v9382_v13 = vand.u32 4294901760, %v2763_v48  ;;  %5900 = vmatmul.mubr.f32.gmra.mrb[24].mxu1 %v3099_v4  ;;  %v10142_v20 = vand.u32 4294901760, %v9371_v31  ;;  %v3119_v33 = vand.u32 4294901760, %v3118_v29 }
 0x42f   :  { %v9385_v54 = vand.u32 4294901760, %v2762_v21  ;;  %v3109_v58 = vand.u32 4294901760, %v3108_v27  ;;  %v10145_v5 = vand.u32 4294901760, %v9377_v24 }
 0x430   :  { %10511 = vst [vmem:[#allocation65_spill] sm:$0xff] %v9382_v13  ;;  %v9389_v55 = vsub.f32 %v2763_v48, %v9382_v13  ;;  %v3138_v28 = vsub.f32 %v9371_v31, %v10142_v20 }
 0x431   :  { %10512 = vst [vmem:[#allocation64_spill] sm:$0xff] %v9385_v54  ;;  %v9395_v14 = vsub.f32 %v2762_v21, %v9385_v54  ;;  %5902 = vmatprep.mubr.f32.mxu1 %v3109_v58  ;;  %v3128_v4 = vsub.f32 %v9377_v24, %v10145_v5 }
 0x432   :  { %5903 = vmatmul.mubr.f32.gmra.mrb[26].mxu1 %v3119_v33  ;;  %v10143_v27 = vand.u32 4294901760, %v9389_v55  ;;  %v3139_v49 = vand.u32 4294901760, %v3138_v28  ;;  %v10523_v33 = vld [vmem:[#allocation63_spill] sm:$0xff] }
 0x433   :  { %v10144_v18 = vand.u32 4294901760, %v9395_v14  ;;  %v3129_v48 = vand.u32 4294901760, %v3128_v4  ;;  %v10524_v28 = vld [vmem:[#allocation7_spill] sm:$0xff] }
 0x434   :  { %v3158_v29 = vsub.f32 %v9389_v55, %v10143_v27  ;;  %v10525_v4 = vld [vmem:[#allocation15_spill] sm:$0xff] }
 0x435   :  { %5905 = vmatprep.mubr.f32.mxu1 %v3129_v48  ;;  %v3148_v21 = vsub.f32 %v9395_v14, %v10144_v18  ;;  %v10526_v48 = vld [vmem:[#allocation6_spill] sm:$0xff] }
 0x436   :  { %5906 = vmatmul.mubr.f32.gmra.mrb[28].mxu1 %v3139_v49  ;;  %v3159_v20 = vand.u32 4294901760, %v3158_v29  ;;  %v10521_v49 = vld [vmem:[#allocation4_spill] sm:$0xff]  ;;  %v10527_v29 = vld [vmem:[#allocation19_spill] sm:$0xff]  ;;  %v10531_v18 = vld [vmem:[#allocation18_spill] sm:$0xff] }
 0x437   :  { %v3149_v58 = vand.u32 4294901760, %v3148_v21  ;;  %v10528_v21 = vld [vmem:[#allocation40_spill] sm:$0xff]  ;;  %v10532_v5 = vand.u32 4294901760, %v10531_v18 }
 0x438   :  { %v10542_v18 = vld [vmem:[#allocation56_spill] sm:$0xff] }
 0x439   :  { %5908 = vmatprep.mubr.f32.mxu1 %v3149_v58  ;;  %v10529_v58 = vld [vmem:[#allocation43_spill] sm:$0xff] }
 0x43a   :  { %5909 = vmatmul.mubr.f32.gmra.mrb[30].mxu1 %v3159_v20  ;;  %v10522_v20 = vld [vmem:[#allocation39_spill] sm:$0xff]  ;;  %v10530_v27 = vand.u32 4294901760, %v10529_v58 }
 0x43b   :  { %5943 = vmatprep.mubr.f32.mxu1 %v9090_v47  ;;  %v10540_v58 = vld [vmem:[#allocation23_spill] sm:$0xff] }
 0x43e   :  { %5944 = vmatmul.mubr.f32.vlgmr.msra.gmra.mrb[0].mxu1 %v9088_v53 }
 0x43f   :  { %6570 = vmatpush3.bf16.msra.mxu1 %v9006_v9  ;;  %5946 = vmatprep.mubr.f32.mxu1 %v9107_v6  ;;  %v10513_v9 = vld [vmem:[#allocation5_spill] sm:$0xff] }
 0x440   :  { %6572 = vmatprep.subr.bf16.mxu1 %v9020_v32 }
 0x442   :  { %5947 = vmatmul.mubr.f32.gmra.mrb[2].mxu1 %v9103_v3 }
 0x443   :  { %5949 = vmatprep.mubr.f32.mxu1 %v9134_v1  ;;  %6574 = vmatpush3.bf16.msra.mxu1 %v9020_v32  ;;  %v10514_v32 = vld [vmem:[#allocation57_spill] sm:$0xff] }
 0x444   :  { %6576 = vmatprep.subr.bf16.mxu1 %v9034_v42 }
 0x446   :  { %5950 = vmatmul.mubr.f32.gmra.mrb[4].mxu1 %v9127_v52 }
 0x447   :  { %5952 = vmatprep.mubr.f32.mxu1 %v9156_v22  ;;  %6578 = vmatpush3.bf16.msra.mxu1 %v9034_v42  ;;  %v10515_v42 = vld [vmem:[#allocation61_spill] sm:$0xff] }
 0x448   :  { %6580 = vmatprep.subr.bf16.mxu1 %v9048_v30 }
 0x44a   :  { %5953 = vmatmul.mubr.f32.gmra.mrb[6].mxu1 %v9150_v36 }
 0x44b   :  { %5955 = vmatprep.mubr.f32.mxu1 %v9178_v19  ;;  %6582 = vmatpush3.bf16.msra.mxu1 %v9048_v30  ;;  %v10516_v30 = vld [vmem:[#allocation8_spill] sm:$0xff] }
 0x44c   :  { %6584 = vmatprep.subr.bf16.mxu1 %v9062_v57 }
 0x44e   :  { %5956 = vmatmul.mubr.f32.gmra.mrb[8].mxu1 %v9175_v43 }
 0x44f   :  { %5958 = vmatprep.mubr.f32.mxu1 %v9197_v34  ;;  %6586 = vmatpush3.bf16.msra.mxu1 %v9062_v57  ;;  %v10517_v57 = vld [vmem:[#allocation59_spill] sm:$0xff] }
 0x450   :  { %6588 = vmatprep.subr.bf16.mxu1 %v9066_v17 }
 0x452   :  { %5959 = vmatmul.mubr.f32.gmra.mrb[10].mxu1 %v9194_v7 }
 0x453   :  { %5961 = vmatprep.mubr.f32.mxu1 %v9216_v25  ;;  %6590 = vmatpush3.bf16.msra.mxu1 %v9066_v17  ;;  %v10518_v17 = vld [vmem:[#allocation62_spill] sm:$0xff] }
 0x454   :  { %6592 = vmatprep.subr.bf16.mxu1 %v9072_v60 }
 0x456   :  { %5962 = vmatmul.mubr.f32.gmra.mrb[12].mxu1 %v9213_v15  ;;  %v10554_v15 = vld [vmem:[#allocation30_spill] sm:$0xff] }
 0x457   :  { %5964 = vmatprep.mubr.f32.mxu1 %v9234_v39  ;;  %6594 = vmatpush3.bf16.msra.mxu1 %v9072_v60  ;;  %v10519_v60 = vld [vmem:[#allocation12_spill] sm:$0xff] }
 0x458   :  { %6596 = vmatprep.subr.bf16.mxu1 %v9094_v11 }
 0x45a   :  { %5965 = vmatmul.mubr.f32.gmra.mrb[14].mxu1 %v9231_v2  ;;  %v10551_v2 = vand.u32 4294901760, %v9119_v37 }
 0x45b   :  { %5967 = vmatprep.mubr.f32.mxu1 %v9253_v63  ;;  %6598 = vmatpush3.bf16.msra.mxu1 %v9094_v11  ;;  %v10520_v11 = vld [vmem:[#allocation60_spill] sm:$0xff]  ;;  %v10550_v63 = vand.u32 4294901760, %v9097_v41 }
 0x45c   :  { %6600 = vmatprep.subr.bf16.mxu1 %v8772_v8 }
 0x45e   :  { %5968 = vmatmul.mubr.f32.gmra.mrb[16].mxu1 %v9250_v0 }
 0x45f   :  { %5970 = vmatprep.mubr.f32.mxu1 %v9273_v26 }
 0x462   :  { %5971 = vmatmul.mubr.f32.gmra.mrb[18].mxu1 %v9270_v40  ;;  %v10548_v40 = vld [vmem:[#allocation50_spill] sm:$0xff] }
 0x463   :  { %5973 = vmatprep.mubr.f32.mxu1 %v9293_v45  ;;  %v10549_v26 = vand.u32 4294901760, %v10548_v40 }
 0x466   :  { %5974 = vmatmul.mubr.f32.gmra.mrb[20].mxu1 %v9290_v62  ;;  %v10546_v62 = vld [vmem:[#allocation52_spill] sm:$0xff] }
 0x467   :  { %5976 = vmatprep.mubr.f32.mxu1 %v9313_v12  ;;  %v10545_v12 = vand.u32 4294901760, %v9100_v56  ;;  %v10547_v45 = vand.u32 4294901760, %v10546_v62  ;;  %v10557_v62 = vand.u32 4294901760, %v9145_v44 }
 0x469   :  { %v6635_v0 = vpack.c.bf16 %v10549_v26, %v10547_v45  ;;  %v10563_v26 = vand.u32 4294901760, %v10515_v42 }
 0x46a   :  { %5977 = vmatmul.mubr.f32.gmra.mrb[22].mxu1 %v9310_v46  ;;  %v10544_v46 = vld [vmem:[#allocation37_spill] sm:$0xff] }
 0x46b   :  { %5979 = vmatprep.mubr.f32.mxu1 %v9331_v59  ;;  %v10539_v59 = vld [vmem:[#allocation49_spill] sm:$0xff] }
 0x46e   :  { %5980 = vmatmul.mubr.f32.gmra.mrb[24].mxu1 %v9328_v38  ;;  %v10538_v38 = vld [vmem:[#allocation53_spill] sm:$0xff] }
 0x46f   :  { %5982 = vmatprep.mubr.f32.mxu1 %v9349_v61  ;;  %v10537_v61 = vld [vmem:[#allocation24_spill] sm:$0xff] }
 0x472   :  { %5983 = vmatmul.mubr.f32.gmra.mrb[26].mxu1 %v9346_v35  ;;  %v10536_v35 = vld [vmem:[#allocation47_spill] sm:$0xff] }
 0x473   :  { %5985 = vmatprep.mubr.f32.mxu1 %v9367_v23  ;;  %v10535_v23 = vld [vmem:[#allocation22_spill] sm:$0xff] }
 0x476   :  { %5986 = vmatmul.mubr.f32.gmra.mrb[28].mxu1 %v9364_v51  ;;  %v10534_v51 = vld [vmem:[#allocation25_spill] sm:$0xff] }
 0x477   :  { %5988 = vmatprep.mubr.f32.mxu1 %v9385_v54  ;;  %v10533_v54 = vld [vmem:[#allocation17_spill] sm:$0xff] }
 0x47a   :  { %5989 = vmatmul.mubr.f32.gmra.mrb[30].mxu1 %v9382_v13  ;;  %v6631_v13 = vpack.c.bf16 %v10532_v5, %v10530_v27  ;;  %v10541_v5 = vld [vmem:[#allocation14_spill] sm:$0xff]  ;;  %v10543_v27 = vld [vmem:[#allocation32_spill] sm:$0xff] }
 0x47b   :  { %6023 = vmatprep.mubr.f32.mxu1 %v9100_v56  ;;  %v10556_v56 = vand.u32 4294901760, %v9111_v50 }
 0x47e   :  { %6024 = vmatmul.mubr.f32.vlgmr.msra.gmra.mrb[0].mxu1 %v9097_v41  ;;  %v10558_v41 = vld [vmem:[#allocation13_spill] sm:$0xff] }
 0x47f   :  { %6602 = vmatpush3.bf16.msra.mxu1 %v8772_v8  ;;  %6026 = vmatprep.mubr.f32.mxu1 %v9119_v37 }
 0x480   :  { %6604 = vmatprep.subr.bf16.mxu1 %v8782_v16 }
 0x482   :  { %6027 = vmatmul.mubr.f32.gmra.mrb[2].mxu1 %v9111_v50  ;;  %v10564_v50 = vld [vmem:[#allocation35_spill] sm:$0xff] }
 0x483   :  { %6029 = vmatprep.mubr.f32.mxu1 %v9145_v44  ;;  %6606 = vmatpush3.bf16.msra.mxu1 %v8782_v16 }
 0x484   :  { %6608 = vmatprep.subr.bf16.mxu1 %v10513_v9 }
 0x486   :  { %6030 = vmatmul.mubr.f32.gmra.mrb[4].mxu1 %v10514_v32 }
 0x487   :  { %6032 = vmatprep.mubr.f32.mxu1 %v10515_v42  ;;  %6610 = vmatpush3.bf16.msra.mxu1 %v10513_v9 }
 0x488   :  { %6612 = vmatprep.subr.bf16.mxu1 %v10516_v30 }
 0x48a   :  { %6033 = vmatmul.mubr.f32.gmra.mrb[6].mxu1 %v10517_v57 }
 0x48b   :  { %6035 = vmatprep.mubr.f32.mxu1 %v10518_v17  ;;  %6614 = vmatpush3.bf16.msra.mxu1 %v10516_v30 }
 0x48c   :  { %6616 = vmatprep.subr.bf16.mxu1 %v10519_v60 }
 0x48e   :  { %6036 = vmatmul.mubr.f32.gmra.mrb[8].mxu1 %v10520_v11 }
 0x48f   :  { %6038 = vmatprep.mubr.f32.mxu1 %v10521_v49  ;;  %6618 = vmatpush3.bf16.msra.mxu1 %v10519_v60 }
 0x490   :  { %6620 = vmatprep.subr.bf16.mxu1 %v10522_v20 }
 0x492   :  { %6039 = vmatmul.mubr.f32.gmra.mrb[10].mxu1 %v10523_v33 }
 0x493   :  { %6041 = vmatprep.mubr.f32.mxu1 %v10524_v28  ;;  %6622 = vmatpush3.bf16.msra.mxu1 %v10522_v20 }
 0x494   :  { %6624 = vmatprep.subr.bf16.mxu1 %v10525_v4 }
 0x496   :  { %6042 = vmatmul.mubr.f32.gmra.mrb[12].mxu1 %v10526_v48 }
 0x497   :  { %6044 = vmatprep.mubr.f32.mxu1 %v10527_v29  ;;  %6626 = vmatpush3.bf16.msra.mxu1 %v10525_v4  ;;  %v10555_v4 = vand.u32 4294901760, %v10554_v15  ;;  %v10565_v15 = vand.u32 4294901760, %v10564_v50 }
 0x498   :  { %6628 = vmatprep.subr.bf16.mxu1 %v10528_v21 }
 0x49a   :  { %6045 = vmatmul.mubr.f32.gmra.mrb[14].mxu1 %v10533_v54 }
 0x49b   :  { %6047 = vmatprep.mubr.f32.mxu1 %v10534_v51  ;;  %6630 = vmatpush3.bf16.msra.mxu1 %v10528_v21  ;;  %v10552_v21 = vld [vmem:[#allocation54_spill] sm:$0xff] }
 0x49c   :  { %6632 = vmatprep.subr.bf16.mxu1 %v6631_v13  ;;  %v10553_v39 = vand.u32 4294901760, %v10552_v21  ;;  %v10572_v21 = vld [vmem:[#allocation42_spill] sm:$0xff] }
 0x49d   :  { %v10573_v42 = vand.u32 4294901760, %v10572_v21  ;;  %v10621_v21 = vld [vmem:[#allocation33_spill] sm:$0xff] }
 0x49e   :  { %6048 = vmatmul.mubr.f32.gmra.mrb[16].mxu1 %v10535_v23  ;;  %v6639_v25 = vpack.c.bf16 %v10555_v4, %v10553_v39  ;;  %v10566_v39 = vld [vmem:[#allocation55_spill] sm:$0xff] }
 0x49f   :  { %6050 = vmatprep.mubr.f32.mxu1 %v10536_v35  ;;  %v10567_v44 = vand.u32 4294901760, %v10566_v39  ;;  %v10587_v39 = vand.u32 4294901760, %v10527_v29  ;;  %v10592_v29 = vand.u32 4294901760, %v10537_v61 }
 0x4a1   :  { %v6647_v45 = vpack.c.bf16 %v10567_v44, %v10565_v15  ;;  %v10586_v15 = vand.u32 4294901760, %v10526_v48  ;;  %v10590_v44 = vand.u32 4294901760, %v10535_v23  ;;  %v10591_v48 = vand.u32 4294901760, %v10536_v35 }
 0x4a2   :  { %6051 = vmatmul.mubr.f32.gmra.mrb[18].mxu1 %v10537_v61  ;;  %v10597_v23 = vand.u32 4294901760, %v10542_v18  ;;  %v10598_v35 = vand.u32 4294901760, %v10543_v27  ;;  %v10599_v61 = vand.u32 4294901760, %v9359_v10 }
 0x4a3   :  { %6053 = vmatprep.mubr.f32.mxu1 %v10538_v38 }
 0x4a6   :  { %6054 = vmatmul.mubr.f32.gmra.mrb[20].mxu1 %v10539_v59 }
 0x4a7   :  { %6056 = vmatprep.mubr.f32.mxu1 %v10540_v58 }
 0x4aa   :  { %6057 = vmatmul.mubr.f32.gmra.mrb[22].mxu1 %v10541_v5 }
 0x4ab   :  { %6059 = vmatprep.mubr.f32.mxu1 %v10542_v18  ;;  %v10604_v18 = vand.u32 4294901760, %v9389_v55 }
 0x4ae   :  { %6060 = vmatmul.mubr.f32.gmra.mrb[24].mxu1 %v10543_v27  ;;  %v10617_v27 = vld [vmem:[#allocation10_spill] sm:$0xff] }
 0x4af   :  { %6062 = vmatprep.mubr.f32.mxu1 %v9359_v10  ;;  %v10608_v10 = vld [vmem:[#allocation16_spill] sm:$0xff] }
 0x4b2   :  { %6063 = vmatmul.mubr.f32.gmra.mrb[26].mxu1 %v10544_v46 }
 0x4b3   :  { %6065 = vmatprep.mubr.f32.mxu1 %v9377_v24 }
 0x4b6   :  { %6066 = vmatmul.mubr.f32.gmra.mrb[28].mxu1 %v9371_v31 }
 0x4b7   :  { %6068 = vmatprep.mubr.f32.mxu1 %v9395_v14 }
 0x4ba   :  { %6069 = vmatmul.mubr.f32.gmra.mrb[30].mxu1 %v9389_v55  ;;  %v10609_v55 = vld [vmem:[#allocation40_spill] sm:$0xff] }
 0x4bb   :  { %6103 = vmatprep.mubr.f32.mxu1 %v10545_v12  ;;  %v10569_v12 = vand.u32 4294901760, %v10518_v17 }
 0x4be   :  { %6104 = vmatmul.mubr.f32.vlgmr.msra.gmra.mrb[0].mxu1 %v10550_v63  ;;  %v10559_v63 = vand.u32 4294901760, %v10558_v41 }
 0x4bf   :  { %6634 = vmatpush3.bf16.msra.mxu1 %v6631_v13  ;;  %6106 = vmatprep.mubr.f32.mxu1 %v10551_v2  ;;  %v10560_v13 = vld [vmem:[#allocation28_spill] sm:$0xff]  ;;  %v10562_v2 = vand.u32 4294901760, %v10514_v32  ;;  %v10570_v32 = vld [vmem:[#allocation41_spill] sm:$0xff] }
 0x4c0   :  { %6636 = vmatprep.subr.bf16.mxu1 %v6635_v0  ;;  %v10561_v40 = vand.u32 4294901760, %v10560_v13  ;;  %v10571_v4 = vand.u32 4294901760, %v10570_v32  ;;  %v10619_v32 = vld [vmem:[#allocation36_spill] sm:$0xff] }
 0x4c2   :  { %6107 = vmatmul.mubr.f32.gmra.mrb[2].mxu1 %v10556_v56  ;;  %v6643_v37 = vpack.c.bf16 %v10561_v40, %v10559_v63  ;;  %v6651_v56 = vpack.c.bf16 %v10573_v42, %v10571_v4  ;;  %v10578_v63 = vld [vmem:[#allocation44_spill] sm:$0xff]  ;;  %v10580_v40 = vand.u32 4294901760, %v10523_v33  ;;  %v10588_v33 = vand.u32 4294901760, %v10533_v54  ;;  %v10622_v42 = vld [vmem:[#allocation58_spill] sm:$0xff] }
 0x4c3   :  { %6109 = vmatprep.mubr.f32.mxu1 %v10557_v62  ;;  %6638 = vmatpush3.bf16.msra.mxu1 %v6635_v0  ;;  %v10568_v0 = vand.u32 4294901760, %v10517_v57  ;;  %v10575_v62 = vand.u32 4294901760, %v10521_v49  ;;  %v10576_v57 = vld [vmem:[#allocation21_spill] sm:$0xff]  ;;  %v10579_v17 = vand.u32 4294901760, %v10578_v63  ;;  %v10594_v54 = vand.u32 4294901760, %v10539_v59  ;;  %v10620_v4 = vld [vmem:[#allocation20_spill] sm:$0xff] }
 0x4c4   :  { %6640 = vmatprep.subr.bf16.mxu1 %v6639_v25  ;;  %v10577_v41 = vand.u32 4294901760, %v10576_v57  ;;  %v10601_v59 = vand.u32 4294901760, %v9377_v24  ;;  %v10611_v24 = vld [vmem:[#allocation31_spill] sm:$0xff]  ;;  %v10626_v57 = vld [vmem:[#allocation65_spill] sm:$0xff] }
 0x4c6   :  { %6110 = vmatmul.mubr.f32.gmra.mrb[4].mxu1 %v10562_v2  ;;  %v6655_v13 = vpack.c.bf16 %v10579_v17, %v10577_v41 }
 0x4c7   :  { %6112 = vmatprep.mubr.f32.mxu1 %v10563_v26  ;;  %6642 = vmatpush3.bf16.msra.mxu1 %v6639_v25  ;;  %v10574_v25 = vand.u32 4294901760, %v10520_v11  ;;  %v10582_v11 = vld [vmem:[#allocation46_spill] sm:$0xff]  ;;  %v10584_v26 = vld [vmem:[#allocation48_spill] sm:$0xff] }
 0x4c8   :  { %6644 = vmatprep.subr.bf16.mxu1 %v6643_v37  ;;  %v10583_v2 = vand.u32 4294901760, %v10582_v11  ;;  %v10585_v49 = vand.u32 4294901760, %v10584_v26 }
 0x4ca   :  { %6113 = vmatmul.mubr.f32.gmra.mrb[6].mxu1 %v10568_v0  ;;  %v6659_v50 = vpack.c.bf16 %v10585_v49, %v10583_v2  ;;  %v10596_v0 = vand.u32 4294901760, %v10541_v5  ;;  %v10603_v5 = vand.u32 4294901760, %v9395_v14  ;;  %v10612_v14 = vld [vmem:[#allocation29_spill] sm:$0xff] }
 0x4cb   :  { %6115 = vmatprep.mubr.f32.mxu1 %v10569_v12  ;;  %6646 = vmatpush3.bf16.msra.mxu1 %v6643_v37  ;;  %v10581_v37 = vand.u32 4294901760, %v10524_v28  ;;  %v10589_v28 = vand.u32 4294901760, %v10534_v51  ;;  %v10595_v51 = vand.u32 4294901760, %v10540_v58  ;;  %v10602_v58 = vand.u32 4294901760, %v9371_v31  ;;  %v10610_v31 = vld [vmem:[#allocation9_spill] sm:$0xff]  ;;  %v10618_v12 = vld [vmem:[#allocation3_spill] sm:$0xff] }
 0x4cc   :  { %6648 = vmatprep.subr.bf16.mxu1 %v6647_v45 }
 0x4ce   :  { %6116 = vmatmul.mubr.f32.gmra.mrb[8].mxu1 %v10574_v25  ;;  %v10624_v25 = vld [vmem:[#allocation38_spill] sm:$0xff] }
 0x4cf   :  { %6118 = vmatprep.mubr.f32.mxu1 %v10575_v62  ;;  %6650 = vmatpush3.bf16.msra.mxu1 %v6647_v45  ;;  %v10593_v45 = vand.u32 4294901760, %v10538_v38  ;;  %v10600_v38 = vand.u32 4294901760, %v10544_v46  ;;  %v10607_v46 = vld [vmem:[#allocation11_spill] sm:$0xff]  ;;  %v10625_v62 = vld [vmem:[#allocation64_spill] sm:$0xff] }
 0x4d0   :  { %6652 = vmatprep.subr.bf16.mxu1 %v6651_v56 }
 0x4d2   :  { %6119 = vmatmul.mubr.f32.gmra.mrb[10].mxu1 %v10580_v40 }
 0x4d3   :  { %6121 = vmatprep.mubr.f32.mxu1 %v10581_v37  ;;  %6654 = vmatpush3.bf16.msra.mxu1 %v6651_v56  ;;  %v10623_v56 = vld [vmem:[#allocation34_spill] sm:$0xff] }
 0x4d4   :  { %6656 = vmatprep.subr.bf16.mxu1 %v6655_v13 }
 0x4d6   :  { %6122 = vmatmul.mubr.f32.gmra.mrb[12].mxu1 %v10586_v15 }
 0x4d7   :  { %6124 = vmatprep.mubr.f32.mxu1 %v10587_v39  ;;  %6658 = vmatpush3.bf16.msra.mxu1 %v6655_v13 }
 0x4d8   :  { %6660 = vmatprep.subr.bf16.mxu1 %v6659_v50 }
 0x4da   :  { %6125 = vmatmul.mubr.f32.gmra.mrb[14].mxu1 %v10588_v33 }
 0x4db   :  { %6127 = vmatprep.mubr.f32.mxu1 %v10589_v28  ;;  %6662 = vmatpush3.bf16.msra.mxu1 %v6659_v50 }
 0x4dc   :  { %6664 = vmatprep.subr.bf16.mxu1 %v8772_v8 }
 0x4de   :  { %6128 = vmatmul.mubr.f32.gmra.mrb[16].mxu1 %v10590_v44 }
 0x4df   :  { %6130 = vmatprep.mubr.f32.mxu1 %v10591_v48 }
 0x4e2   :  { %6131 = vmatmul.mubr.f32.gmra.mrb[18].mxu1 %v10592_v29 }
 0x4e3   :  { %6133 = vmatprep.mubr.f32.mxu1 %v10593_v45 }
 0x4e6   :  { %6134 = vmatmul.mubr.f32.gmra.mrb[20].mxu1 %v10594_v54 }
 0x4e7   :  { %6136 = vmatprep.mubr.f32.mxu1 %v10595_v51 }
 0x4ea   :  { %6137 = vmatmul.mubr.f32.gmra.mrb[22].mxu1 %v10596_v0 }
 0x4eb   :  { %6139 = vmatprep.mubr.f32.mxu1 %v10597_v23 }
 0x4ee   :  { %6140 = vmatmul.mubr.f32.gmra.mrb[24].mxu1 %v10598_v35 }
 0x4ef   :  { %6142 = vmatprep.mubr.f32.mxu1 %v10599_v61 }
 0x4f2   :  { %6143 = vmatmul.mubr.f32.gmra.mrb[26].mxu1 %v10600_v38 }
 0x4f3   :  { %6145 = vmatprep.mubr.f32.mxu1 %v10601_v59 }
 0x4f6   :  { %6146 = vmatmul.mubr.f32.gmra.mrb[28].mxu1 %v10602_v58 }
 0x4f7   :  { %6148 = vmatprep.mubr.f32.mxu1 %v10603_v5 }
 0x4fa   :  { %6149 = vmatmul.mubr.f32.gmra.mrb[30].mxu1 %v10604_v18 }
 0x4fb   :  { %6183 = vmatprep.mubr.f32.mxu1 %v9090_v47 }
 0x4fe   :  { %6184 = vmatmul.mubr.f32.vlgmr.msra.gmra.mrb[0].mxu1 %v9088_v53 }
 0x4ff   :  { %6666 = vmatpush3.bf16.msra.mxu1 %v8772_v8  ;;  %6186 = vmatprep.mubr.f32.mxu1 %v9107_v6  ;;  %v10605_v8 = vld [vmem:[#allocation2_spill] sm:$0xff] }
 0x500   :  { %6668 = vmatprep.subr.bf16.mxu1 %v8782_v16 }
 0x502   :  { %6187 = vmatmul.mubr.f32.gmra.mrb[2].mxu1 %v9103_v3 }
 0x503   :  { %6189 = vmatprep.mubr.f32.mxu1 %v9134_v1  ;;  %6670 = vmatpush3.bf16.msra.mxu1 %v8782_v16  ;;  %v10606_v16 = vld [vmem:[#allocation15_spill] sm:$0xff] }
 0x504   :  { %6672 = vmatprep.subr.bf16.mxu1 %v10513_v9 }
 0x506   :  { %6190 = vmatmul.mubr.f32.gmra.mrb[4].mxu1 %v9127_v52 }
 0x507   :  { %6192 = vmatprep.mubr.f32.mxu1 %v9156_v22  ;;  %6674 = vmatpush3.bf16.msra.mxu1 %v10513_v9  ;;  %v10613_v9 = vld [vmem:[#allocation45_spill] sm:$0xff] }
 0x508   :  { %6676 = vmatprep.subr.bf16.mxu1 %v10516_v30 }
 0x50a   :  { %6193 = vmatmul.mubr.f32.gmra.mrb[6].mxu1 %v9150_v36 }
 0x50b   :  { %6195 = vmatprep.mubr.f32.mxu1 %v9178_v19  ;;  %6678 = vmatpush3.bf16.msra.mxu1 %v10516_v30  ;;  %v10614_v30 = vld [vmem:[#allocation26_spill] sm:$0xff] }
 0x50c   :  { %6680 = vmatprep.subr.bf16.mxu1 %v10519_v60 }
 0x50e   :  { %6196 = vmatmul.mubr.f32.gmra.mrb[8].mxu1 %v9175_v43 }
 0x50f   :  { %6198 = vmatprep.mubr.f32.mxu1 %v9197_v34  ;;  %6682 = vmatpush3.bf16.msra.mxu1 %v10519_v60  ;;  %v10615_v60 = vld [vmem:[#allocation27_spill] sm:$0xff] }
 0x510   :  { %6684 = vmatprep.subr.bf16.mxu1 %v10522_v20 }
 0x512   :  { %6199 = vmatmul.mubr.f32.gmra.mrb[10].mxu1 %v9194_v7 }
 0x513   :  { %6201 = vmatprep.mubr.f32.mxu1 %v10605_v8  ;;  %6686 = vmatpush3.bf16.msra.mxu1 %v10522_v20  ;;  %v10616_v20 = vld [vmem:[#allocation51_spill] sm:$0xff] }
 0x514   :  { %6688 = vmatprep.subr.bf16.mxu1 %v10606_v16 }
 0x516   :  { %6202 = vmatmul.mubr.f32.gmra.mrb[12].mxu1 %v10607_v46 }
 0x517   :  { %6204 = vmatprep.mubr.f32.mxu1 %v10608_v10  ;;  %6690 = vmatpush3.bf16.msra.mxu1 %v10606_v16 }
 0x518   :  { %6692 = vmatprep.subr.bf16.mxu1 %v10609_v55 }
 0x51a   :  { %6205 = vmatmul.mubr.f32.gmra.mrb[14].mxu1 %v10610_v31 }
 0x51b   :  { %6207 = vmatprep.mubr.f32.mxu1 %v10611_v24  ;;  %6694 = vmatpush3.bf16.msra.mxu1 %v10609_v55 }
 0x51e   :  { %6208 = vmatmul.mubr.f32.gmra.mrb[16].mxu1 %v10612_v14 }
 0x51f   :  { %6210 = vmatprep.mubr.f32.mxu1 %v10613_v9 }
 0x522   :  { %6211 = vmatmul.mubr.f32.gmra.mrb[18].mxu1 %v10614_v30 }
 0x523   :  { %6213 = vmatprep.mubr.f32.mxu1 %v10615_v60 }
 0x526   :  { %6214 = vmatmul.mubr.f32.gmra.mrb[20].mxu1 %v10616_v20 }
 0x527   :  { %6216 = vmatprep.mubr.f32.mxu1 %v10617_v27 }
 0x52a   :  { %6217 = vmatmul.mubr.f32.gmra.mrb[22].mxu1 %v10618_v12 }
 0x52b   :  { %6219 = vmatprep.mubr.f32.mxu1 %v10619_v32 }
 0x52e   :  { %6220 = vmatmul.mubr.f32.gmra.mrb[24].mxu1 %v10620_v4 }
 0x52f   :  { %6222 = vmatprep.mubr.f32.mxu1 %v10621_v21 }
 0x532   :  { %6223 = vmatmul.mubr.f32.gmra.mrb[26].mxu1 %v10622_v42 }
 0x533   :  { %6225 = vmatprep.mubr.f32.mxu1 %v10623_v56 }
 0x536   :  { %6226 = vmatmul.mubr.f32.gmra.mrb[28].mxu1 %v10624_v25 }
 0x537   :  { %6228 = vmatprep.mubr.f32.mxu1 %v10625_v62 }
 0x53a   :  { %6229 = vmatmul.mubr.f32.gmra.mrb[30].mxu1 %v10626_v57 }
 0x53b   :  { %6263 = vmatprep.mubr.f32.mxu1 %v9090_v47 }
 0x53e   :  { %6264 = vmatmul.mubr.f32.vlgmr.msra.gmra.mrb[0].mxu1 %v9088_v53 }
 0x53f   :  { %6266 = vmatprep.mubr.f32.mxu1 %v9107_v6 }
 0x542   :  { %6267 = vmatmul.mubr.f32.gmra.mrb[2].mxu1 %v9103_v3 }
 0x543   :  { %6269 = vmatprep.mubr.f32.mxu1 %v9134_v1 }
 0x546   :  { %6270 = vmatmul.mubr.f32.gmra.mrb[4].mxu1 %v9127_v52 }
 0x547   :  { %6272 = vmatprep.mubr.f32.mxu1 %v9156_v22 }
 0x54a   :  { %6273 = vmatmul.mubr.f32.gmra.mrb[6].mxu1 %v9150_v36 }
 0x54b   :  { %6275 = vmatprep.mubr.f32.mxu1 %v9178_v19 }
 0x54e   :  { %6276 = vmatmul.mubr.f32.gmra.mrb[8].mxu1 %v9175_v43 }
 0x54f   :  { %6278 = vmatprep.mubr.f32.mxu1 %v9197_v34 }
 0x552   :  { %6279 = vmatmul.mubr.f32.gmra.mrb[10].mxu1 %v9194_v7 }
 0x553   :  { %6281 = vmatprep.mubr.f32.mxu1 %v10605_v8 }
 0x556   :  { %6282 = vmatmul.mubr.f32.gmra.mrb[12].mxu1 %v10607_v46 }
 0x557   :  { %6284 = vmatprep.mubr.f32.mxu1 %v10608_v10 }
 0x55a   :  { %6285 = vmatmul.mubr.f32.gmra.mrb[14].mxu1 %v10610_v31 }
 0x55b   :  { %6287 = vmatprep.mubr.f32.mxu1 %v10611_v24 }
 0x55e   :  { %6288 = vmatmul.mubr.f32.gmra.mrb[16].mxu1 %v10612_v14 }
 0x55f   :  { %6290 = vmatprep.mubr.f32.mxu1 %v10613_v9 }
 0x562   :  { %6291 = vmatmul.mubr.f32.gmra.mrb[18].mxu1 %v10614_v30 }
 0x563   :  { %6293 = vmatprep.mubr.f32.mxu1 %v10615_v60 }
 0x566   :  { %6294 = vmatmul.mubr.f32.gmra.mrb[20].mxu1 %v10616_v20 }
 0x567   :  { %6296 = vmatprep.mubr.f32.mxu1 %v10617_v27 }
 0x56a   :  { %6297 = vmatmul.mubr.f32.gmra.mrb[22].mxu1 %v10618_v12 }
 0x56b   :  { %6299 = vmatprep.mubr.f32.mxu1 %v10619_v32 }
 0x56e   :  { %6300 = vmatmul.mubr.f32.gmra.mrb[24].mxu1 %v10620_v4 }
 0x56f   :  { %6302 = vmatprep.mubr.f32.mxu1 %v10621_v21 }
 0x572   :  { %6303 = vmatmul.mubr.f32.gmra.mrb[26].mxu1 %v10622_v42 }
 0x573   :  { %6305 = vmatprep.mubr.f32.mxu1 %v10623_v56 }
 0x576   :  { %6306 = vmatmul.mubr.f32.gmra.mrb[28].mxu1 %v10624_v25 }
 0x577   :  { %6308 = vmatprep.mubr.f32.mxu1 %v10625_v62 }
 0x57a   :  { %6309 = vmatmul.mubr.f32.gmra.mrb[30].mxu1 %v10626_v57 }
 0x611   :  { %v6265_v6 = vpop.f32.mrb[0].mxu1 }
 0x612   :  { %4740 = vst.msk [vmem:[%s9810_s3 + $0x8] sm:$0xff] %vm4738_vm5, %v6265_v6  ;;  %v4548_v22 = vpop.f32.mrb[1].mxu1 }
 0x613   :  { %4739 = vst.msk [vmem:[%s9810_s3] sm:$0xff] %vm4738_vm5, %v4548_v22 }
 0x615   :  { %v6268_v36 = vpop.f32.mrb[2].mxu1 }
 0x616   :  { %4742 = vst.msk [vmem:[%s9810_s3 + $0x18] sm:$0xff] %vm4738_vm5, %v6268_v36  ;;  %v4560_v3 = vpop.f32.mrb[3].mxu1 }
 0x617   :  { %4741 = vst.msk [vmem:[%s9810_s3 + $0x10] sm:$0xff] %vm4738_vm5, %v4560_v3 }
 0x619   :  { %v6271_v19 = vpop.f32.mrb[4].mxu1 }
 0x61a   :  { %4744 = vst.msk [vmem:[%s9810_s3 + $0x28] sm:$0xff] %vm4738_vm5, %v6271_v19  ;;  %v4572_v43 = vpop.f32.mrb[5].mxu1 }
 0x61b   :  { %4743 = vst.msk [vmem:[%s9810_s3 + $0x20] sm:$0xff] %vm4738_vm5, %v4572_v43 }
 0x61d   :  { %v6274_v53 = vpop.f32.mrb[6].mxu1 }
 0x61e   :  { %4746 = vst.msk [vmem:[%s9810_s3 + $0x38] sm:$0xff] %vm4738_vm5, %v6274_v53  ;;  %v4584_v47 = vpop.f32.mrb[7].mxu1 }
 0x61f   :  { %4745 = vst.msk [vmem:[%s9810_s3 + $0x30] sm:$0xff] %vm4738_vm5, %v4584_v47 }
 0x621   :  { %v6277_v52 = vpop.f32.mrb[8].mxu1 }
 0x622   :  { %4748 = vst.msk [vmem:[%s9810_s3 + $0x48] sm:$0xff] %vm4738_vm5, %v6277_v52  ;;  %v4596_v1 = vpop.f32.mrb[9].mxu1 }
 0x623   :  { %4747 = vst.msk [vmem:[%s9810_s3 + $0x40] sm:$0xff] %vm4738_vm5, %v4596_v1 }
 0x625   :  { %v6280_v7 = vpop.f32.mrb[10].mxu1 }
 0x626   :  { %4750 = vst.msk [vmem:[%s9810_s3 + $0x58] sm:$0xff] %vm4738_vm5, %v6280_v7  ;;  %v4608_v34 = vpop.f32.mrb[11].mxu1 }
 0x627   :  { %4749 = vst.msk [vmem:[%s9810_s3 + $0x50] sm:$0xff] %vm4738_vm5, %v4608_v34 }
 0x629   :  { %v6283_v41 = vpop.f32.mrb[12].mxu1 }
 0x62a   :  { %4752 = vst.msk [vmem:[%s9810_s3 + $0x68] sm:$0xff] %vm4738_vm5, %v6283_v41  ;;  %v4620_v63 = vpop.f32.mrb[13].mxu1 }
 0x62b   :  { %4751 = vst.msk [vmem:[%s9810_s3 + $0x60] sm:$0xff] %vm4738_vm5, %v4620_v63 }
 0x62d   :  { %v6286_v17 = vpop.f32.mrb[14].mxu1 }
 0x62e   :  { %4754 = vst.msk [vmem:[%s9810_s3 + $0x78] sm:$0xff] %vm4738_vm5, %v6286_v17  ;;  %v4632_v13 = vpop.f32.mrb[15].mxu1 }
 0x62f   :  { %4753 = vst.msk [vmem:[%s9810_s3 + $0x70] sm:$0xff] %vm4738_vm5, %v4632_v13 }
 0x631   :  { %v6289_v40 = vpop.f32.mrb[16].mxu1 }
 0x632   :  { %4756 = vst.msk [vmem:[%s9810_s3 + $0x88] sm:$0xff] %vm4738_vm5, %v6289_v40  ;;  %v4644_v37 = vpop.f32.mrb[17].mxu1 }
 0x633   :  { %4755 = vst.msk [vmem:[%s9810_s3 + $0x80] sm:$0xff] %vm4738_vm5, %v4644_v37 }
 0x635   :  { %v6292_v11 = vpop.f32.mrb[18].mxu1 }
 0x636   :  { %4758 = vst.msk [vmem:[%s9810_s3 + $0x98] sm:$0xff] %vm4738_vm5, %v6292_v11  ;;  %v4656_v2 = vpop.f32.mrb[19].mxu1 }
 0x637   :  { %4757 = vst.msk [vmem:[%s9810_s3 + $0x90] sm:$0xff] %vm4738_vm5, %v4656_v2 }
 0x639   :  { %v6295_v26 = vpop.f32.mrb[20].mxu1 }
 0x63a   :  { %4760 = vst.msk [vmem:[%s9810_s3 + $0xa8] sm:$0xff] %vm4738_vm5, %v6295_v26  ;;  %v4668_v49 = vpop.f32.mrb[21].mxu1 }
 0x63b   :  { %4759 = vst.msk [vmem:[%s9810_s3 + $0xa0] sm:$0xff] %vm4738_vm5, %v4668_v49 }
 0x63d   :  { %v6298_v50 = vpop.f32.mrb[22].mxu1 }
 0x63e   :  { %4762 = vst.msk [vmem:[%s9810_s3 + $0xb8] sm:$0xff] %vm4738_vm5, %v6298_v50  ;;  %v4680_v15 = vpop.f32.mrb[23].mxu1 }
 0x63f   :  { %4761 = vst.msk [vmem:[%s9810_s3 + $0xb0] sm:$0xff] %vm4738_vm5, %v4680_v15 }
 0x641   :  { %v6301_v39 = vpop.f32.mrb[24].mxu1 }
 0x642   :  { %4764 = vst.msk [vmem:[%s9810_s3 + $0xc8] sm:$0xff] %vm4738_vm5, %v6301_v39  ;;  %v4692_v33 = vpop.f32.mrb[25].mxu1 }
 0x643   :  { %4763 = vst.msk [vmem:[%s9810_s3 + $0xc0] sm:$0xff] %vm4738_vm5, %v4692_v33 }
 0x645   :  { %v6304_v28 = vpop.f32.mrb[26].mxu1 }
 0x646   :  { %4766 = vst.msk [vmem:[%s9810_s3 + $0xd8] sm:$0xff] %vm4738_vm5, %v6304_v28  ;;  %v4704_v44 = vpop.f32.mrb[27].mxu1 }
 0x647   :  { %4765 = vst.msk [vmem:[%s9810_s3 + $0xd0] sm:$0xff] %vm4738_vm5, %v4704_v44 }
 0x649   :  { %v6307_v48 = vpop.f32.mrb[28].mxu1 }
 0x64a   :  { %4768 = vst.msk [vmem:[%s9810_s3 + $0xe8] sm:$0xff] %vm4738_vm5, %v6307_v48  ;;  %v4716_v29 = vpop.f32.mrb[29].mxu1 }
 0x64b   :  { %4767 = vst.msk [vmem:[%s9810_s3 + $0xe0] sm:$0xff] %vm4738_vm5, %v4716_v29 }
 0x64d   :  { %v6310_v45 = vpop.f32.mrb[30].mxu1 }
 0x64e   :  { %4770 = vst.msk [vmem:[%s9810_s3 + $0xf8] sm:$0xff] %vm4738_vm5, %v6310_v45  ;;  %v4728_v54 = vpop.f32.mrb[31].mxu1 }
 0x64f   :  { %4769 = vst.msk [vmem:[%s9810_s3 + $0xf0] sm:$0xff] %vm4738_vm5, %v4728_v54 }

</bundles_post_ra>
